<compile_context>
chip_gen: v5e
topology: v5e:2x2
jax: 0.10.0
libtpu: 0.0.40
codegen_flags: <defaults>
</compile_context>

<pallas_src>
import jax
import jax.numpy as jnp
from jax.experimental import pallas as pl
from jax.experimental.pallas import tpu as pltpu


def _transdown_kernel(x_ref, scale_ref, shift_ref, w_ref, s_hw_ref, s_d_ref, o_ref):
    """Fused BN-apply + ReLU + 1x1x1 Conv3d + MaxPool3d(2) on one (1,C,TD,H*W) block.

    x_ref:     (1, C, TD, H*W)  input block (native dtype), lane axis = H*W
    scale_ref: (C,)    SMEM  per-channel BN scale  = gamma / sqrt(var + eps)
    shift_ref: (C,)    SMEM  per-channel BN shift  = beta - mean * scale
    w_ref:     (C, C)  SMEM  1x1x1 conv weight w[o, c]  (bias=False in the module)
    s_hw_ref:  (4, H*W, Ho*Wo) VMEM 0/1 selectors: k = 2*b + c picks source lane
               (2*ho + b)*W + (2*wo + c) for output lane ho*Wo + wo
    s_d_ref:   (2, TDo, TD)    VMEM 0/1 selectors: a picks block row 2*do + a
    o_ref:     (1, C, TDo, Ho*Wo) pooled output block
    """
    c_in = x_ref.shape[1]
    c_out = o_ref.shape[1]

    # BatchNorm apply + ReLU per input channel (VPU; f32 math for v5e safety).
    z = []
    for ci in range(c_in):
        xc = x_ref[0, ci].astype(jnp.float32)                        # (TD, H*W)
        z.append(jnp.maximum(xc * scale_ref[ci] + shift_ref[ci], 0.0))

    for co in range(c_out):
        # 1x1x1 conv = per-voxel channel mix: VPU multiply-accumulate loop
        # (MXU deliberately not used here: C << 128).
        acc = z[0] * w_ref[co, 0]
        for ci in range(1, c_in):
            acc = acc + z[ci] * w_ref[co, ci]

        # 2x2x2 max pool (max over offsets commutes, so order is free).
        #  (a) D pairs first: even/odd block rows selected with tiny 0/1
        #      matmuls, then maxed -> halves the rows for step (b).
        dmax = jnp.maximum(
            jnp.dot(s_d_ref[0], acc, preferred_element_type=jnp.float32),
            jnp.dot(s_d_ref[1], acc, preferred_element_type=jnp.float32))
        #  (b) H/W pairs: the four (b, c) window offsets are compacted onto the
        #      pooled lane grid with exact 0/1 selection matmuls, then maxed.
        t = jnp.dot(dmax, s_hw_ref[0], preferred_element_type=jnp.float32)
        for k in range(1, 4):
            t = jnp.maximum(
                t, jnp.dot(dmax, s_hw_ref[k], preferred_element_type=jnp.float32))
        o_ref[0, co] = t.astype(o_ref.dtype)


def _pool_selectors(h, w, td):
    """Exact 0/1 selection matrices implementing the 2x2x2 max-pool compaction."""
    ho, wo, tdo = h // 2, w // 2, td // 2
    hw, howo = h * w, ho * wo
    ho_idx = jnp.arange(howo, dtype=jnp.int32) // wo
    wo_idx = jnp.arange(howo, dtype=jnp.int32) % wo
    lane_sel = []
    for b in (0, 1):
        for cc in (0, 1):
            src = (2 * ho_idx + b) * w + (2 * wo_idx + cc)            # (howo,)
            lane_sel.append(jax.nn.one_hot(src, hw, dtype=jnp.float32).T)
    s_hw = jnp.stack(lane_sel)                                        # (4, hw, howo)
    row_sel = [jax.nn.one_hot(2 * jnp.arange(tdo, dtype=jnp.int32) + a, td,
                              dtype=jnp.float32) for a in (0, 1)]
    s_d = jnp.stack(row_sel)                                          # (2, tdo, td)
    return s_hw, s_d


def _pick_td(c, d, hw, itemsize, budget_bytes):
    """Largest D-tile (multiple of 16, or full D) whose input block fits the budget."""
    if c * d * hw * itemsize <= budget_bytes:
        return d                         # full D slab (block dims == full array dims)
    best, td = 0, 16
    while td < d:
        if d % td == 0 and c * td * hw * itemsize <= budget_bytes:
            best = td
        td += 16
    return best if best > 0 else d


def trans_down(x, gamma, beta, conv_w, *, eps=1e-5, block_bytes=8 * 1024 * 1024):
    """TransDown forward: BN3d (batch stats) -> ReLU -> 1x1x1 conv -> MaxPool3d(2).

    Dropout3d is identity (inference mode).  x is NCDHW; result is NCDHW, halved.
    """
    n, c, d, h, w = x.shape
    assert d % 2 == 0 and h % 2 == 0 and w % 2 == 0, "MaxPool3d(2) path assumes even dims"
    do, ho, wo = d // 2, h // 2, w // 2
    hw, howo = h * w, ho * wo

    # ---- BatchNorm3d batch statistics: plain XLA reduction (single fused pass,
    # f32 accumulation).  track_running_stats=False -> always uses batch stats.
    xf = x.astype(jnp.float32)            # fused into the reductions under jit
    mean = jnp.mean(xf, axis=(0, 2, 3, 4))
    var = jnp.maximum(jnp.mean(xf * xf, axis=(0, 2, 3, 4)) - mean * mean, 0.0)
    scale = gamma.astype(jnp.float32) / jnp.sqrt(var + eps)           # (C,)
    shift = beta.astype(jnp.float32) - mean * scale                   # (C,)
    wmat = conv_w.reshape(c, c).astype(jnp.float32)                   # (C_out, C_in)

    # ---- Fused Pallas pass.  Only *free* reshapes on the host:
    # input (N,C,D,H,W) -> (N,C,D,H*W), output (N,C,Do,Ho*Wo) -> (N,C,Do,Ho,Wo).
    x4 = x.reshape(n, c, d, hw)
    td = _pick_td(c, d, hw, x.dtype.itemsize, block_bytes)
    tdo = td // 2
    s_hw, s_d = _pool_selectors(h, w, td)

    out4 = pl.pallas_call(
        _transdown_kernel,
        out_shape=jax.ShapeDtypeStruct((n, c, do, howo), x.dtype),
        grid=(n, d // td),
        in_specs=[
            pl.BlockSpec((1, c, td, hw), lambda ni, di: (ni, 0, di, 0)),
            pl.BlockSpec(memory_space=pltpu.MemorySpace.SMEM),        # BN scale
            pl.BlockSpec(memory_space=pltpu.MemorySpace.SMEM),        # BN shift
            pl.BlockSpec(memory_space=pltpu.MemorySpace.SMEM),        # conv weight
            pl.BlockSpec((4, hw, howo), lambda ni, di: (0, 0, 0)),    # H/W pool selectors
            pl.BlockSpec((2, tdo, td), lambda ni, di: (0, 0, 0)),     # D pool selectors
        ],
        out_specs=pl.BlockSpec((1, c, tdo, howo), lambda ni, di: (ni, 0, di, 0)),
        compiler_params=pltpu.CompilerParams(
            dimension_semantics=("parallel", "parallel"),
            vmem_limit_bytes=48 * 1024 * 1024,   # stays under v7x's 64 MiB physical VMEM
        ),
    )(x4, scale, shift, wmat, s_hw, s_d)

    return out4.reshape(n, c, do, ho, wo)        # free reshape back to NCDHW


def _reference(x, gamma, beta, conv_w, eps=1e-5):
    """Pure-JAX reference matching the PyTorch forward (eval-mode dropout)."""
    mean = jnp.mean(x, axis=(0, 2, 3, 4), keepdims=True)
    var = jnp.var(x, axis=(0, 2, 3, 4), keepdims=True)                # biased, like BN
    xn = (x - mean) / jnp.sqrt(var + eps)
    xn = xn * gamma[None, :, None, None, None] + beta[None, :, None, None, None]
    xr = jnp.maximum(xn, 0.0)
    wmat = conv_w.reshape(conv_w.shape[0], conv_w.shape[1])
    y = jnp.einsum('oc,ncdhw->nodhw', wmat, xr)
    n, c, d, h, w = y.shape
    y = y.reshape(n, c, d // 2, 2, h // 2, 2, w // 2, 2)
    return y.max(axis=(3, 5, 7))


if __name__ == "__main__":
    key = jax.random.PRNGKey(0)
    k1, k2, k3, k4 = jax.random.split(key, 4)

    # Small demo shapes; Ho*Wo = 128 so the kernel's output blocks are lane-dense.
    N, C, D, H, W = 2, 4, 8, 16, 32
    x = jax.random.normal(k1, (N, C, D, H, W), jnp.float32)
    gamma = 1.0 + 0.1 * jax.random.normal(k2, (C,), jnp.float32)      # BN weight
    beta = 0.1 * jax.random.normal(k3, (C,), jnp.float32)             # BN bias
    conv_w = jax.random.normal(k4, (C, C, 1, 1, 1), jnp.float32) / jnp.sqrt(C)

    fwd = jax.jit(trans_down)
    out = jax.block_until_ready(fwd(x, gamma, beta, conv_w))
    assert out.shape == (N, C, D // 2, H // 2, W // 2), out.shape

    ref = _reference(x, gamma, beta, conv_w)
    err = float(jnp.max(jnp.abs(out - ref)))
    if err < 1e-3:
        print("KERNEL_OK")
    else:
        raise SystemExit(f"mismatch: max abs err {err}")
</pallas_src>

<mosaic_0001>
module attributes {stable_mosaic.version = 11 : i64} {
  func.func @_transdown_kernel(%arg0: i32, %arg1: i32, %arg2: memref<1x4x8x512xf32, #tpu.memory_space<vmem>>, %arg3: memref<4xf32, #tpu.memory_space<smem>>, %arg4: memref<4xf32, #tpu.memory_space<smem>>, %arg5: memref<4x4xf32, #tpu.memory_space<smem>>, %arg6: memref<4x512x128xf32, #tpu.memory_space<vmem>>, %arg7: memref<2x4x8xf32, #tpu.memory_space<vmem>>, %arg8: memref<1x4x4x128xf32, #tpu.memory_space<vmem>>) attributes {dimension_semantics = [#tpu.dimension_semantics<parallel>, #tpu.dimension_semantics<parallel>], iteration_bounds = array<i64: 2, 1>, scalar_prefetch = 0 : i64, scratch_operands = 0 : i64, tpu.core_type = #tpu.core_type<tc>, window_params = [{transform_indices = @transform_0, window_bounds = array<i64: 1, 4, 8, 512>}, {transform_indices = @transform_1, window_bounds = array<i64: 4>}, {transform_indices = @transform_2, window_bounds = array<i64: 4>}, {transform_indices = @transform_3, window_bounds = array<i64: 4, 4>}, {pipeline_mode = #tpu.pipeline_mode<synchronous>, transform_indices = @transform_4, window_bounds = array<i64: 4, 512, 128>}, {pipeline_mode = #tpu.pipeline_mode<synchronous>, transform_indices = @transform_5, window_bounds = array<i64: 2, 4, 8>}, {transform_indices = @transform_6, window_bounds = array<i64: 1, 4, 4, 128>}]} {
    %c0 = arith.constant 0 : index
    %c0_0 = arith.constant 0 : index
    %c0_1 = arith.constant 0 : index
    %c0_2 = arith.constant 0 : index
    %0 = vector.load %arg2[%c0, %c0_0, %c0_1, %c0_2] : memref<1x4x8x512xf32, #tpu.memory_space<vmem>>, vector<1x1x8x512xf32>
    %1 = vector.shape_cast %0 : vector<1x1x8x512xf32> to vector<8x512xf32>
    %c0_3 = arith.constant 0 : index
    %2 = memref.load %arg3[%c0_3] : memref<4xf32, #tpu.memory_space<smem>>
    %3 = vector.broadcast %2 : f32 to vector<8x512xf32>
    %4 = arith.mulf %1, %3 : vector<8x512xf32>
    %c0_4 = arith.constant 0 : index
    %5 = memref.load %arg4[%c0_4] : memref<4xf32, #tpu.memory_space<smem>>
    %6 = vector.broadcast %5 : f32 to vector<8x512xf32>
    %7 = arith.addf %4, %6 : vector<8x512xf32>
    %cst = arith.constant 0.000000e+00 : f32
    %8 = vector.broadcast %cst : f32 to vector<8x512xf32>
    %9 = arith.maximumf %7, %8 : vector<8x512xf32>
    %c0_5 = arith.constant 0 : index
    %c1 = arith.constant 1 : index
    %c0_6 = arith.constant 0 : index
    %c0_7 = arith.constant 0 : index
    %10 = vector.load %arg2[%c0_5, %c1, %c0_6, %c0_7] : memref<1x4x8x512xf32, #tpu.memory_space<vmem>>, vector<1x1x8x512xf32>
    %11 = vector.shape_cast %10 : vector<1x1x8x512xf32> to vector<8x512xf32>
    %c1_8 = arith.constant 1 : index
    %12 = memref.load %arg3[%c1_8] : memref<4xf32, #tpu.memory_space<smem>>
    %13 = vector.broadcast %12 : f32 to vector<8x512xf32>
    %14 = arith.mulf %11, %13 : vector<8x512xf32>
    %c1_9 = arith.constant 1 : index
    %15 = memref.load %arg4[%c1_9] : memref<4xf32, #tpu.memory_space<smem>>
    %16 = vector.broadcast %15 : f32 to vector<8x512xf32>
    %17 = arith.addf %14, %16 : vector<8x512xf32>
    %cst_10 = arith.constant 0.000000e+00 : f32
    %18 = vector.broadcast %cst_10 : f32 to vector<8x512xf32>
    %19 = arith.maximumf %17, %18 : vector<8x512xf32>
    %c0_11 = arith.constant 0 : index
    %c2 = arith.constant 2 : index
    %c0_12 = arith.constant 0 : index
    %c0_13 = arith.constant 0 : index
    %20 = vector.load %arg2[%c0_11, %c2, %c0_12, %c0_13] : memref<1x4x8x512xf32, #tpu.memory_space<vmem>>, vector<1x1x8x512xf32>
    %21 = vector.shape_cast %20 : vector<1x1x8x512xf32> to vector<8x512xf32>
    %c2_14 = arith.constant 2 : index
    %22 = memref.load %arg3[%c2_14] : memref<4xf32, #tpu.memory_space<smem>>
    %23 = vector.broadcast %22 : f32 to vector<8x512xf32>
    %24 = arith.mulf %21, %23 : vector<8x512xf32>
    %c2_15 = arith.constant 2 : index
    %25 = memref.load %arg4[%c2_15] : memref<4xf32, #tpu.memory_space<smem>>
    %26 = vector.broadcast %25 : f32 to vector<8x512xf32>
    %27 = arith.addf %24, %26 : vector<8x512xf32>
    %cst_16 = arith.constant 0.000000e+00 : f32
    %28 = vector.broadcast %cst_16 : f32 to vector<8x512xf32>
    %29 = arith.maximumf %27, %28 : vector<8x512xf32>
    %c0_17 = arith.constant 0 : index
    %c3 = arith.constant 3 : index
    %c0_18 = arith.constant 0 : index
    %c0_19 = arith.constant 0 : index
    %30 = vector.load %arg2[%c0_17, %c3, %c0_18, %c0_19] : memref<1x4x8x512xf32, #tpu.memory_space<vmem>>, vector<1x1x8x512xf32>
    %31 = vector.shape_cast %30 : vector<1x1x8x512xf32> to vector<8x512xf32>
    %c3_20 = arith.constant 3 : index
    %32 = memref.load %arg3[%c3_20] : memref<4xf32, #tpu.memory_space<smem>>
    %33 = vector.broadcast %32 : f32 to vector<8x512xf32>
    %34 = arith.mulf %31, %33 : vector<8x512xf32>
    %c3_21 = arith.constant 3 : index
    %35 = memref.load %arg4[%c3_21] : memref<4xf32, #tpu.memory_space<smem>>
    %36 = vector.broadcast %35 : f32 to vector<8x512xf32>
    %37 = arith.addf %34, %36 : vector<8x512xf32>
    %cst_22 = arith.constant 0.000000e+00 : f32
    %38 = vector.broadcast %cst_22 : f32 to vector<8x512xf32>
    %39 = arith.maximumf %37, %38 : vector<8x512xf32>
    %c0_23 = arith.constant 0 : index
    %c0_24 = arith.constant 0 : index
    %40 = memref.load %arg5[%c0_23, %c0_24] : memref<4x4xf32, #tpu.memory_space<smem>>
    %41 = vector.broadcast %40 : f32 to vector<8x512xf32>
    %42 = arith.mulf %9, %41 : vector<8x512xf32>
    %c0_25 = arith.constant 0 : index
    %c1_26 = arith.constant 1 : index
    %43 = memref.load %arg5[%c0_25, %c1_26] : memref<4x4xf32, #tpu.memory_space<smem>>
    %44 = vector.broadcast %43 : f32 to vector<8x512xf32>
    %45 = arith.mulf %19, %44 : vector<8x512xf32>
    %46 = arith.addf %42, %45 : vector<8x512xf32>
    %c0_27 = arith.constant 0 : index
    %c2_28 = arith.constant 2 : index
    %47 = memref.load %arg5[%c0_27, %c2_28] : memref<4x4xf32, #tpu.memory_space<smem>>
    %48 = vector.broadcast %47 : f32 to vector<8x512xf32>
    %49 = arith.mulf %29, %48 : vector<8x512xf32>
    %50 = arith.addf %46, %49 : vector<8x512xf32>
    %c0_29 = arith.constant 0 : index
    %c3_30 = arith.constant 3 : index
    %51 = memref.load %arg5[%c0_29, %c3_30] : memref<4x4xf32, #tpu.memory_space<smem>>
    %52 = vector.broadcast %51 : f32 to vector<8x512xf32>
    %53 = arith.mulf %39, %52 : vector<8x512xf32>
    %54 = arith.addf %50, %53 : vector<8x512xf32>
    %c0_31 = arith.constant 0 : index
    %c0_32 = arith.constant 0 : index
    %c0_33 = arith.constant 0 : index
    %55 = vector.load %arg7[%c0_31, %c0_32, %c0_33] : memref<2x4x8xf32, #tpu.memory_space<vmem>>, vector<1x4x8xf32>
    %56 = vector.shape_cast %55 : vector<1x4x8xf32> to vector<4x8xf32>
    %cst_34 = arith.constant dense<0.000000e+00> : vector<4x512xf32>
    %57 = tpu.matmul %56, %54, %cst_34 {dimension_numbers = #tpu.dot_dimension_numbers<[1], [0], [0], [1], [0, 0, 1, 1], [], []>} : vector<4x8xf32>, vector<8x512xf32>, vector<4x512xf32> -> vector<4x512xf32>
    %c1_35 = arith.constant 1 : index
    %c0_36 = arith.constant 0 : index
    %c0_37 = arith.constant 0 : index
    %58 = vector.load %arg7[%c1_35, %c0_36, %c0_37] : memref<2x4x8xf32, #tpu.memory_space<vmem>>, vector<1x4x8xf32>
    %59 = vector.shape_cast %58 : vector<1x4x8xf32> to vector<4x8xf32>
    %cst_38 = arith.constant dense<0.000000e+00> : vector<4x512xf32>
    %60 = tpu.matmul %59, %54, %cst_38 {dimension_numbers = #tpu.dot_dimension_numbers<[1], [0], [0], [1], [0, 0, 1, 1], [], []>} : vector<4x8xf32>, vector<8x512xf32>, vector<4x512xf32> -> vector<4x512xf32>
    %61 = arith.maximumf %57, %60 : vector<4x512xf32>
    %c0_39 = arith.constant 0 : index
    %c0_40 = arith.constant 0 : index
    %c0_41 = arith.constant 0 : index
    %62 = vector.load %arg6[%c0_39, %c0_40, %c0_41] : memref<4x512x128xf32, #tpu.memory_space<vmem>>, vector<1x512x128xf32>
    %63 = vector.shape_cast %62 : vector<1x512x128xf32> to vector<512x128xf32>
    %cst_42 = arith.constant dense<0.000000e+00> : vector<4x128xf32>
    %64 = tpu.matmul %61, %63, %cst_42 {dimension_numbers = #tpu.dot_dimension_numbers<[1], [0], [0], [1], [0, 0, 1, 1], [], []>} : vector<4x512xf32>, vector<512x128xf32>, vector<4x128xf32> -> vector<4x128xf32>
    %c1_43 = arith.constant 1 : index
    %c0_44 = arith.constant 0 : index
    %c0_45 = arith.constant 0 : index
    %65 = vector.load %arg6[%c1_43, %c0_44, %c0_45] : memref<4x512x128xf32, #tpu.memory_space<vmem>>, vector<1x512x128xf32>
    %66 = vector.shape_cast %65 : vector<1x512x128xf32> to vector<512x128xf32>
    %cst_46 = arith.constant dense<0.000000e+00> : vector<4x128xf32>
    %67 = tpu.matmul %61, %66, %cst_46 {dimension_numbers = #tpu.dot_dimension_numbers<[1], [0], [0], [1], [0, 0, 1, 1], [], []>} : vector<4x512xf32>, vector<512x128xf32>, vector<4x128xf32> -> vector<4x128xf32>
    %68 = arith.maximumf %64, %67 : vector<4x128xf32>
    %c2_47 = arith.constant 2 : index
    %c0_48 = arith.constant 0 : index
    %c0_49 = arith.constant 0 : index
    %69 = vector.load %arg6[%c2_47, %c0_48, %c0_49] : memref<4x512x128xf32, #tpu.memory_space<vmem>>, vector<1x512x128xf32>
    %70 = vector.shape_cast %69 : vector<1x512x128xf32> to vector<512x128xf32>
    %cst_50 = arith.constant dense<0.000000e+00> : vector<4x128xf32>
    %71 = tpu.matmul %61, %70, %cst_50 {dimension_numbers = #tpu.dot_dimension_numbers<[1], [0], [0], [1], [0, 0, 1, 1], [], []>} : vector<4x512xf32>, vector<512x128xf32>, vector<4x128xf32> -> vector<4x128xf32>
    %72 = arith.maximumf %68, %71 : vector<4x128xf32>
    %c3_51 = arith.constant 3 : index
    %c0_52 = arith.constant 0 : index
    %c0_53 = arith.constant 0 : index
    %73 = vector.load %arg6[%c3_51, %c0_52, %c0_53] : memref<4x512x128xf32, #tpu.memory_space<vmem>>, vector<1x512x128xf32>
    %74 = vector.shape_cast %73 : vector<1x512x128xf32> to vector<512x128xf32>
    %cst_54 = arith.constant dense<0.000000e+00> : vector<4x128xf32>
    %75 = tpu.matmul %61, %74, %cst_54 {dimension_numbers = #tpu.dot_dimension_numbers<[1], [0], [0], [1], [0, 0, 1, 1], [], []>} : vector<4x512xf32>, vector<512x128xf32>, vector<4x128xf32> -> vector<4x128xf32>
    %76 = arith.maximumf %72, %75 : vector<4x128xf32>
    %c0_55 = arith.constant 0 : index
    %c0_56 = arith.constant 0 : index
    %c0_57 = arith.constant 0 : index
    %c0_58 = arith.constant 0 : index
    %77 = vector.load %arg8[%c0_55, %c0_56, %c0_57, %c0_58] : memref<1x4x4x128xf32, #tpu.memory_space<vmem>>, vector<1x1x4x128xf32>
    %78 = vector.shape_cast %77 : vector<1x1x4x128xf32> to vector<4x128xf32>
    %79 = vector.shape_cast %76 : vector<4x128xf32> to vector<1x1x4x128xf32>
    tpu.vector_store %arg8[%c0_55, %c0_56, %c0_57, %c0_58], %79 {strides = array<i32>} : memref<1x4x4x128xf32, #tpu.memory_space<vmem>>, vector<1x1x4x128xf32>,
    %c1_59 = arith.constant 1 : index
    %c0_60 = arith.constant 0 : index
    %80 = memref.load %arg5[%c1_59, %c0_60] : memref<4x4xf32, #tpu.memory_space<smem>>
    %81 = vector.broadcast %80 : f32 to vector<8x512xf32>
    %82 = arith.mulf %9, %81 : vector<8x512xf32>
    %c1_61 = arith.constant 1 : index
    %c1_62 = arith.constant 1 : index
    %83 = memref.load %arg5[%c1_61, %c1_62] : memref<4x4xf32, #tpu.memory_space<smem>>
    %84 = vector.broadcast %83 : f32 to vector<8x512xf32>
    %85 = arith.mulf %19, %84 : vector<8x512xf32>
    %86 = arith.addf %82, %85 : vector<8x512xf32>
    %c1_63 = arith.constant 1 : index
    %c2_64 = arith.constant 2 : index
    %87 = memref.load %arg5[%c1_63, %c2_64] : memref<4x4xf32, #tpu.memory_space<smem>>
    %88 = vector.broadcast %87 : f32 to vector<8x512xf32>
    %89 = arith.mulf %29, %88 : vector<8x512xf32>
    %90 = arith.addf %86, %89 : vector<8x512xf32>
    %c1_65 = arith.constant 1 : index
    %c3_66 = arith.constant 3 : index
    %91 = memref.load %arg5[%c1_65, %c3_66] : memref<4x4xf32, #tpu.memory_space<smem>>
    %92 = vector.broadcast %91 : f32 to vector<8x512xf32>
    %93 = arith.mulf %39, %92 : vector<8x512xf32>
    %94 = arith.addf %90, %93 : vector<8x512xf32>
    %c0_67 = arith.constant 0 : index
    %c0_68 = arith.constant 0 : index
    %c0_69 = arith.constant 0 : index
    %95 = vector.load %arg7[%c0_67, %c0_68, %c0_69] : memref<2x4x8xf32, #tpu.memory_space<vmem>>, vector<1x4x8xf32>
    %96 = vector.shape_cast %95 : vector<1x4x8xf32> to vector<4x8xf32>
    %cst_70 = arith.constant dense<0.000000e+00> : vector<4x512xf32>
    %97 = tpu.matmul %96, %94, %cst_70 {dimension_numbers = #tpu.dot_dimension_numbers<[1], [0], [0], [1], [0, 0, 1, 1], [], []>} : vector<4x8xf32>, vector<8x512xf32>, vector<4x512xf32> -> vector<4x512xf32>
    %c1_71 = arith.constant 1 : index
    %c0_72 = arith.constant 0 : index
    %c0_73 = arith.constant 0 : index
    %98 = vector.load %arg7[%c1_71, %c0_72, %c0_73] : memref<2x4x8xf32, #tpu.memory_space<vmem>>, vector<1x4x8xf32>
    %99 = vector.shape_cast %98 : vector<1x4x8xf32> to vector<4x8xf32>
    %cst_74 = arith.constant dense<0.000000e+00> : vector<4x512xf32>
    %100 = tpu.matmul %99, %94, %cst_74 {dimension_numbers = #tpu.dot_dimension_numbers<[1], [0], [0], [1], [0, 0, 1, 1], [], []>} : vector<4x8xf32>, vector<8x512xf32>, vector<4x512xf32> -> vector<4x512xf32>
    %101 = arith.maximumf %97, %100 : vector<4x512xf32>
    %c0_75 = arith.constant 0 : index
    %c0_76 = arith.constant 0 : index
    %c0_77 = arith.constant 0 : index
    %102 = vector.load %arg6[%c0_75, %c0_76, %c0_77] : memref<4x512x128xf32, #tpu.memory_space<vmem>>, vector<1x512x128xf32>
    %103 = vector.shape_cast %102 : vector<1x512x128xf32> to vector<512x128xf32>
    %cst_78 = arith.constant dense<0.000000e+00> : vector<4x128xf32>
    %104 = tpu.matmul %101, %103, %cst_78 {dimension_numbers = #tpu.dot_dimension_numbers<[1], [0], [0], [1], [0, 0, 1, 1], [], []>} : vector<4x512xf32>, vector<512x128xf32>, vector<4x128xf32> -> vector<4x128xf32>
    %c1_79 = arith.constant 1 : index
    %c0_80 = arith.constant 0 : index
    %c0_81 = arith.constant 0 : index
    %105 = vector.load %arg6[%c1_79, %c0_80, %c0_81] : memref<4x512x128xf32, #tpu.memory_space<vmem>>, vector<1x512x128xf32>
    %106 = vector.shape_cast %105 : vector<1x512x128xf32> to vector<512x128xf32>
    %cst_82 = arith.constant dense<0.000000e+00> : vector<4x128xf32>
    %107 = tpu.matmul %101, %106, %cst_82 {dimension_numbers = #tpu.dot_dimension_numbers<[1], [0], [0], [1], [0, 0, 1, 1], [], []>} : vector<4x512xf32>, vector<512x128xf32>, vector<4x128xf32> -> vector<4x128xf32>
    %108 = arith.maximumf %104, %107 : vector<4x128xf32>
    %c2_83 = arith.constant 2 : index
    %c0_84 = arith.constant 0 : index
    %c0_85 = arith.constant 0 : index
    %109 = vector.load %arg6[%c2_83, %c0_84, %c0_85] : memref<4x512x128xf32, #tpu.memory_space<vmem>>, vector<1x512x128xf32>
    %110 = vector.shape_cast %109 : vector<1x512x128xf32> to vector<512x128xf32>
    %cst_86 = arith.constant dense<0.000000e+00> : vector<4x128xf32>
    %111 = tpu.matmul %101, %110, %cst_86 {dimension_numbers = #tpu.dot_dimension_numbers<[1], [0], [0], [1], [0, 0, 1, 1], [], []>} : vector<4x512xf32>, vector<512x128xf32>, vector<4x128xf32> -> vector<4x128xf32>
    %112 = arith.maximumf %108, %111 : vector<4x128xf32>
    %c3_87 = arith.constant 3 : index
    %c0_88 = arith.constant 0 : index
    %c0_89 = arith.constant 0 : index
    %113 = vector.load %arg6[%c3_87, %c0_88, %c0_89] : memref<4x512x128xf32, #tpu.memory_space<vmem>>, vector<1x512x128xf32>
    %114 = vector.shape_cast %113 : vector<1x512x128xf32> to vector<512x128xf32>
    %cst_90 = arith.constant dense<0.000000e+00> : vector<4x128xf32>
    %115 = tpu.matmul %101, %114, %cst_90 {dimension_numbers = #tpu.dot_dimension_numbers<[1], [0], [0], [1], [0, 0, 1, 1], [], []>} : vector<4x512xf32>, vector<512x128xf32>, vector<4x128xf32> -> vector<4x128xf32>
    %116 = arith.maximumf %112, %115 : vector<4x128xf32>
    %c0_91 = arith.constant 0 : index
    %c1_92 = arith.constant 1 : index
    %c0_93 = arith.constant 0 : index
    %c0_94 = arith.constant 0 : index
    %117 = vector.load %arg8[%c0_91, %c1_92, %c0_93, %c0_94] : memref<1x4x4x128xf32, #tpu.memory_space<vmem>>, vector<1x1x4x128xf32>
    %118 = vector.shape_cast %117 : vector<1x1x4x128xf32> to vector<4x128xf32>
    %119 = vector.shape_cast %116 : vector<4x128xf32> to vector<1x1x4x128xf32>
    tpu.vector_store %arg8[%c0_91, %c1_92, %c0_93, %c0_94], %119 {strides = array<i32>} : memref<1x4x4x128xf32, #tpu.memory_space<vmem>>, vector<1x1x4x128xf32>,
    %c2_95 = arith.constant 2 : index
    %c0_96 = arith.constant 0 : index
    %120 = memref.load %arg5[%c2_95, %c0_96] : memref<4x4xf32, #tpu.memory_space<smem>>
    %121 = vector.broadcast %120 : f32 to vector<8x512xf32>
    %122 = arith.mulf %9, %121 : vector<8x512xf32>
    %c2_97 = arith.constant 2 : index
    %c1_98 = arith.constant 1 : index
    %123 = memref.load %arg5[%c2_97, %c1_98] : memref<4x4xf32, #tpu.memory_space<smem>>
    %124 = vector.broadcast %123 : f32 to vector<8x512xf32>
    %125 = arith.mulf %19, %124 : vector<8x512xf32>
    %126 = arith.addf %122, %125 : vector<8x512xf32>
    %c2_99 = arith.constant 2 : index
    %c2_100 = arith.constant 2 : index
    %127 = memref.load %arg5[%c2_99, %c2_100] : memref<4x4xf32, #tpu.memory_space<smem>>
    %128 = vector.broadcast %127 : f32 to vector<8x512xf32>
    %129 = arith.mulf %29, %128 : vector<8x512xf32>
    %130 = arith.addf %126, %129 : vector<8x512xf32>
    %c2_101 = arith.constant 2 : index
    %c3_102 = arith.constant 3 : index
    %131 = memref.load %arg5[%c2_101, %c3_102] : memref<4x4xf32, #tpu.memory_space<smem>>
    %132 = vector.broadcast %131 : f32 to vector<8x512xf32>
    %133 = arith.mulf %39, %132 : vector<8x512xf32>
    %134 = arith.addf %130, %133 : vector<8x512xf32>
    %c0_103 = arith.constant 0 : index
    %c0_104 = arith.constant 0 : index
    %c0_105 = arith.constant 0 : index
    %135 = vector.load %arg7[%c0_103, %c0_104, %c0_105] : memref<2x4x8xf32, #tpu.memory_space<vmem>>, vector<1x4x8xf32>
    %136 = vector.shape_cast %135 : vector<1x4x8xf32> to vector<4x8xf32>
    %cst_106 = arith.constant dense<0.000000e+00> : vector<4x512xf32>
    %137 = tpu.matmul %136, %134, %cst_106 {dimension_numbers = #tpu.dot_dimension_numbers<[1], [0], [0], [1], [0, 0, 1, 1], [], []>} : vector<4x8xf32>, vector<8x512xf32>, vector<4x512xf32> -> vector<4x512xf32>
    %c1_107 = arith.constant 1 : index
    %c0_108 = arith.constant 0 : index
    %c0_109 = arith.constant 0 : index
    %138 = vector.load %arg7[%c1_107, %c0_108, %c0_109] : memref<2x4x8xf32, #tpu.memory_space<vmem>>, vector<1x4x8xf32>
    %139 = vector.shape_cast %138 : vector<1x4x8xf32> to vector<4x8xf32>
    %cst_110 = arith.constant dense<0.000000e+00> : vector<4x512xf32>
    %140 = tpu.matmul %139, %134, %cst_110 {dimension_numbers = #tpu.dot_dimension_numbers<[1], [0], [0], [1], [0, 0, 1, 1], [], []>} : vector<4x8xf32>, vector<8x512xf32>, vector<4x512xf32> -> vector<4x512xf32>
    %141 = arith.maximumf %137, %140 : vector<4x512xf32>
    %c0_111 = arith.constant 0 : index
    %c0_112 = arith.constant 0 : index
    %c0_113 = arith.constant 0 : index
    %142 = vector.load %arg6[%c0_111, %c0_112, %c0_113] : memref<4x512x128xf32, #tpu.memory_space<vmem>>, vector<1x512x128xf32>
    %143 = vector.shape_cast %142 : vector<1x512x128xf32> to vector<512x128xf32>
    %cst_114 = arith.constant dense<0.000000e+00> : vector<4x128xf32>
    %144 = tpu.matmul %141, %143, %cst_114 {dimension_numbers = #tpu.dot_dimension_numbers<[1], [0], [0], [1], [0, 0, 1, 1], [], []>} : vector<4x512xf32>, vector<512x128xf32>, vector<4x128xf32> -> vector<4x128xf32>
    %c1_115 = arith.constant 1 : index
    %c0_116 = arith.constant 0 : index
    %c0_117 = arith.constant 0 : index
    %145 = vector.load %arg6[%c1_115, %c0_116, %c0_117] : memref<4x512x128xf32, #tpu.memory_space<vmem>>, vector<1x512x128xf32>
    %146 = vector.shape_cast %145 : vector<1x512x128xf32> to vector<512x128xf32>
    %cst_118 = arith.constant dense<0.000000e+00> : vector<4x128xf32>
    %147 = tpu.matmul %141, %146, %cst_118 {dimension_numbers = #tpu.dot_dimension_numbers<[1], [0], [0], [1], [0, 0, 1, 1], [], []>} : vector<4x512xf32>, vector<512x128xf32>, vector<4x128xf32> -> vector<4x128xf32>
    %148 = arith.maximumf %144, %147 : vector<4x128xf32>
    %c2_119 = arith.constant 2 : index
    %c0_120 = arith.constant 0 : index
    %c0_121 = arith.constant 0 : index
    %149 = vector.load %arg6[%c2_119, %c0_120, %c0_121] : memref<4x512x128xf32, #tpu.memory_space<vmem>>, vector<1x512x128xf32>
    %150 = vector.shape_cast %149 : vector<1x512x128xf32> to vector<512x128xf32>
    %cst_122 = arith.constant dense<0.000000e+00> : vector<4x128xf32>
    %151 = tpu.matmul %141, %150, %cst_122 {dimension_numbers = #tpu.dot_dimension_numbers<[1], [0], [0], [1], [0, 0, 1, 1], [], []>} : vector<4x512xf32>, vector<512x128xf32>, vector<4x128xf32> -> vector<4x128xf32>
    %152 = arith.maximumf %148, %151 : vector<4x128xf32>
    %c3_123 = arith.constant 3 : index
    %c0_124 = arith.constant 0 : index
    %c0_125 = arith.constant 0 : index
    %153 = vector.load %arg6[%c3_123, %c0_124, %c0_125] : memref<4x512x128xf32, #tpu.memory_space<vmem>>, vector<1x512x128xf32>
    %154 = vector.shape_cast %153 : vector<1x512x128xf32> to vector<512x128xf32>
    %cst_126 = arith.constant dense<0.000000e+00> : vector<4x128xf32>
    %155 = tpu.matmul %141, %154, %cst_126 {dimension_numbers = #tpu.dot_dimension_numbers<[1], [0], [0], [1], [0, 0, 1, 1], [], []>} : vector<4x512xf32>, vector<512x128xf32>, vector<4x128xf32> -> vector<4x128xf32>
    %156 = arith.maximumf %152, %155 : vector<4x128xf32>
    %c0_127 = arith.constant 0 : index
    %c2_128 = arith.constant 2 : index
    %c0_129 = arith.constant 0 : index
    %c0_130 = arith.constant 0 : index
    %157 = vector.load %arg8[%c0_127, %c2_128, %c0_129, %c0_130] : memref<1x4x4x128xf32, #tpu.memory_space<vmem>>, vector<1x1x4x128xf32>
    %158 = vector.shape_cast %157 : vector<1x1x4x128xf32> to vector<4x128xf32>
    %159 = vector.shape_cast %156 : vector<4x128xf32> to vector<1x1x4x128xf32>
    tpu.vector_store %arg8[%c0_127, %c2_128, %c0_129, %c0_130], %159 {strides = array<i32>} : memref<1x4x4x128xf32, #tpu.memory_space<vmem>>, vector<1x1x4x128xf32>,
    %c3_131 = arith.constant 3 : index
    %c0_132 = arith.constant 0 : index
    %160 = memref.load %arg5[%c3_131, %c0_132] : memref<4x4xf32, #tpu.memory_space<smem>>
    %161 = vector.broadcast %160 : f32 to vector<8x512xf32>
    %162 = arith.mulf %9, %161 : vector<8x512xf32>
    %c3_133 = arith.constant 3 : index
    %c1_134 = arith.constant 1 : index
    %163 = memref.load %arg5[%c3_133, %c1_134] : memref<4x4xf32, #tpu.memory_space<smem>>
    %164 = vector.broadcast %163 : f32 to vector<8x512xf32>
    %165 = arith.mulf %19, %164 : vector<8x512xf32>
    %166 = arith.addf %162, %165 : vector<8x512xf32>
    %c3_135 = arith.constant 3 : index
    %c2_136 = arith.constant 2 : index
    %167 = memref.load %arg5[%c3_135, %c2_136] : memref<4x4xf32, #tpu.memory_space<smem>>
    %168 = vector.broadcast %167 : f32 to vector<8x512xf32>
    %169 = arith.mulf %29, %168 : vector<8x512xf32>
    %170 = arith.addf %166, %169 : vector<8x512xf32>
    %c3_137 = arith.constant 3 : index
    %c3_138 = arith.constant 3 : index
    %171 = memref.load %arg5[%c3_137, %c3_138] : memref<4x4xf32, #tpu.memory_space<smem>>
    %172 = vector.broadcast %171 : f32 to vector<8x512xf32>
    %173 = arith.mulf %39, %172 : vector<8x512xf32>
    %174 = arith.addf %170, %173 : vector<8x512xf32>
    %c0_139 = arith.constant 0 : index
    %c0_140 = arith.constant 0 : index
    %c0_141 = arith.constant 0 : index
    %175 = vector.load %arg7[%c0_139, %c0_140, %c0_141] : memref<2x4x8xf32, #tpu.memory_space<vmem>>, vector<1x4x8xf32>
    %176 = vector.shape_cast %175 : vector<1x4x8xf32> to vector<4x8xf32>
    %cst_142 = arith.constant dense<0.000000e+00> : vector<4x512xf32>
    %177 = tpu.matmul %176, %174, %cst_142 {dimension_numbers = #tpu.dot_dimension_numbers<[1], [0], [0], [1], [0, 0, 1, 1], [], []>} : vector<4x8xf32>, vector<8x512xf32>, vector<4x512xf32> -> vector<4x512xf32>
    %c1_143 = arith.constant 1 : index
    %c0_144 = arith.constant 0 : index
    %c0_145 = arith.constant 0 : index
    %178 = vector.load %arg7[%c1_143, %c0_144, %c0_145] : memref<2x4x8xf32, #tpu.memory_space<vmem>>, vector<1x4x8xf32>
    %179 = vector.shape_cast %178 : vector<1x4x8xf32> to vector<4x8xf32>
    %cst_146 = arith.constant dense<0.000000e+00> : vector<4x512xf32>
    %180 = tpu.matmul %179, %174, %cst_146 {dimension_numbers = #tpu.dot_dimension_numbers<[1], [0], [0], [1], [0, 0, 1, 1], [], []>} : vector<4x8xf32>, vector<8x512xf32>, vector<4x512xf32> -> vector<4x512xf32>
    %181 = arith.maximumf %177, %180 : vector<4x512xf32>
    %c0_147 = arith.constant 0 : index
    %c0_148 = arith.constant 0 : index
    %c0_149 = arith.constant 0 : index
    %182 = vector.load %arg6[%c0_147, %c0_148, %c0_149] : memref<4x512x128xf32, #tpu.memory_space<vmem>>, vector<1x512x128xf32>
    %183 = vector.shape_cast %182 : vector<1x512x128xf32> to vector<512x128xf32>
    %cst_150 = arith.constant dense<0.000000e+00> : vector<4x128xf32>
    %184 = tpu.matmul %181, %183, %cst_150 {dimension_numbers = #tpu.dot_dimension_numbers<[1], [0], [0], [1], [0, 0, 1, 1], [], []>} : vector<4x512xf32>, vector<512x128xf32>, vector<4x128xf32> -> vector<4x128xf32>
    %c1_151 = arith.constant 1 : index
    %c0_152 = arith.constant 0 : index
    %c0_153 = arith.constant 0 : index
    %185 = vector.load %arg6[%c1_151, %c0_152, %c0_153] : memref<4x512x128xf32, #tpu.memory_space<vmem>>, vector<1x512x128xf32>
    %186 = vector.shape_cast %185 : vector<1x512x128xf32> to vector<512x128xf32>
    %cst_154 = arith.constant dense<0.000000e+00> : vector<4x128xf32>
    %187 = tpu.matmul %181, %186, %cst_154 {dimension_numbers = #tpu.dot_dimension_numbers<[1], [0], [0], [1], [0, 0, 1, 1], [], []>} : vector<4x512xf32>, vector<512x128xf32>, vector<4x128xf32> -> vector<4x128xf32>
    %188 = arith.maximumf %184, %187 : vector<4x128xf32>
    %c2_155 = arith.constant 2 : index
    %c0_156 = arith.constant 0 : index
    %c0_157 = arith.constant 0 : index
    %189 = vector.load %arg6[%c2_155, %c0_156, %c0_157] : memref<4x512x128xf32, #tpu.memory_space<vmem>>, vector<1x512x128xf32>
    %190 = vector.shape_cast %189 : vector<1x512x128xf32> to vector<512x128xf32>
    %cst_158 = arith.constant dense<0.000000e+00> : vector<4x128xf32>
    %191 = tpu.matmul %181, %190, %cst_158 {dimension_numbers = #tpu.dot_dimension_numbers<[1], [0], [0], [1], [0, 0, 1, 1], [], []>} : vector<4x512xf32>, vector<512x128xf32>, vector<4x128xf32> -> vector<4x128xf32>
    %192 = arith.maximumf %188, %191 : vector<4x128xf32>
    %c3_159 = arith.constant 3 : index
    %c0_160 = arith.constant 0 : index
    %c0_161 = arith.constant 0 : index
    %193 = vector.load %arg6[%c3_159, %c0_160, %c0_161] : memref<4x512x128xf32, #tpu.memory_space<vmem>>, vector<1x512x128xf32>
    %194 = vector.shape_cast %193 : vector<1x512x128xf32> to vector<512x128xf32>
    %cst_162 = arith.constant dense<0.000000e+00> : vector<4x128xf32>
    %195 = tpu.matmul %181, %194, %cst_162 {dimension_numbers = #tpu.dot_dimension_numbers<[1], [0], [0], [1], [0, 0, 1, 1], [], []>} : vector<4x512xf32>, vector<512x128xf32>, vector<4x128xf32> -> vector<4x128xf32>
    %196 = arith.maximumf %192, %195 : vector<4x128xf32>
    %c0_163 = arith.constant 0 : index
    %c3_164 = arith.constant 3 : index
    %c0_165 = arith.constant 0 : index
    %c0_166 = arith.constant 0 : index
    %197 = vector.load %arg8[%c0_163, %c3_164, %c0_165, %c0_166] : memref<1x4x4x128xf32, #tpu.memory_space<vmem>>, vector<1x1x4x128xf32>
    %198 = vector.shape_cast %197 : vector<1x1x4x128xf32> to vector<4x128xf32>
    %199 = vector.shape_cast %196 : vector<4x128xf32> to vector<1x1x4x128xf32>
    tpu.vector_store %arg8[%c0_163, %c3_164, %c0_165, %c0_166], %199 {strides = array<i32>} : memref<1x4x4x128xf32, #tpu.memory_space<vmem>>, vector<1x1x4x128xf32>,
    return
  }
  func.func @transform_0(%arg0: i32, %arg1: i32) -> (i32, i32, i32, i32) {
    %c0_i32 = arith.constant 0 : i32
    %c0_i32_0 = arith.constant 0 : i32
    %c0_i32_1 = arith.constant 0 : i32
    return %arg0, %c0_i32, %arg1, %c0_i32_0 : i32, i32, i32, i32
  }
  func.func @transform_1(%arg0: i32, %arg1: i32) -> i32 {
    %c0_i32 = arith.constant 0 : i32
    %c0_i32_0 = arith.constant 0 : i32
    return %c0_i32 : i32
  }
  func.func @transform_2(%arg0: i32, %arg1: i32) -> i32 {
    %c0_i32 = arith.constant 0 : i32
    %c0_i32_0 = arith.constant 0 : i32
    return %c0_i32 : i32
  }
  func.func @transform_3(%arg0: i32, %arg1: i32) -> (i32, i32) {
    %c0_i32 = arith.constant 0 : i32
    %c0_i32_0 = arith.constant 0 : i32
    %c0_i32_1 = arith.constant 0 : i32
    return %c0_i32, %c0_i32_0 : i32, i32
  }
  func.func @transform_4(%arg0: i32, %arg1: i32) -> (i32, i32, i32) {
    %c0_i32 = arith.constant 0 : i32
    %c0_i32_0 = arith.constant 0 : i32
    %c0_i32_1 = arith.constant 0 : i32
    %c0_i32_2 = arith.constant 0 : i32
    return %c0_i32, %c0_i32_0, %c0_i32_1 : i32, i32, i32
  }
  func.func @transform_5(%arg0: i32, %arg1: i32) -> (i32, i32, i32) {
    %c0_i32 = arith.constant 0 : i32
    %c0_i32_0 = arith.constant 0 : i32
    %c0_i32_1 = arith.constant 0 : i32
    %c0_i32_2 = arith.constant 0 : i32
    return %c0_i32, %c0_i32_0, %c0_i32_1 : i32, i32, i32
  }
  func.func @transform_6(%arg0: i32, %arg1: i32) -> (i32, i32, i32, i32) {
    %c0_i32 = arith.constant 0 : i32
    %c0_i32_0 = arith.constant 0 : i32
    %c0_i32_1 = arith.constant 0 : i32
    return %arg0, %c0_i32, %arg1, %c0_i32_0 : i32, i32, i32, i32
  }
}

</mosaic_0001>

<bundles_post_ra>
// kernel: trans_down.1
= control target key start
LH: loop header
LB: loop body
LE: loop exit
PB: predicated region body
PF: predicated region fallthrough
CT: control target
= control target key end

     0   :  { %11 = vsyncpa [#allocation3], 0  ;;  %s8327_s0 = inlined_call_operand.vmem [shape: f32[2,4,8,512], index: 0, kind: input, shape index: {}]   ;;  %s8328_s1 = inlined_call_operand.vmem [shape: f32[4], index: 1, kind: input, shape index: {}]   ;;  %s8329_s2 = inlined_call_operand.vmem [shape: f32[4], index: 2, kind: input, shape index: {}]   ;;  %s8330_s3 = inlined_call_operand.vmem [shape: f32[4,4], index: 3, kind: input, shape index: {}]   ;;  %s8331_s4 = inlined_call_operand.vmem [shape: f32[4,512,128], index: 4, kind: input, shape index: {}]   ;;  %s8332_s5 = inlined_call_operand.vmem [shape: f32[2,4,8], index: 5, kind: input, shape index: {}]   ;;  %s8333_s6 = inlined_call_operand.vmem [shape: f32[2,4,4,128], index: 6, kind: output, shape index: {}]  }
   0x1   :  { %12 = vsyncpa [#allocation5], 0  ;;  %s4715_s21 = smov 0   ;;  %s4717_s22 = smov 0  }
   0x2   :  { %s4719_s23 = smov 0  }
   0x3 LB: > { %s218_s26 = sshll.u32 %s8329_s2, 4  ;;  %s3686_s27 = sadd.s32 4294967295, %s4675_s23   ;;  %s4675_s23 = sphi %s4719_s23, %s18_s23   ;;  %s4671_s22 = sphi %s4717_s22, %s8337_s22   ;;  %s4667_s21 = sphi %s4715_s21, %s8336_s21   ;;  %s219_s26 = int_to_ptr.vmem [resolvable:$true] %s218_s26 }
   0x4   : > { %p3688_p0 = scmp.ge.s32.totalorder %s4675_s23, 1  ;;  %p196_p1 = scmp.lt.s32.totalorder %s4675_s23, 3 }
   0x5   : > { %p4736_p2 = scmp.eq.s32.totalorder %s3686_s27, 0  ;;  %s30_s30 = sadd.s32 1, %s4671_s22 }
   0x6   : > { %p4740_p3 = pnand %p3688_p0, %p196_p1  ;;  %s208_s9 = sshll.u32 %s8328_s1, 4  ;;  %s209_s9 = int_to_ptr.vmem [resolvable:$true] %s208_s9 }
   0x7   : > { %p32_p6 = scmp.ge.s32.totalorder %s30_s30, 2  ;;  %s228_s12 = sshll.u32 %s8330_s3, 4  ;;  %s229_s12 = int_to_ptr.vmem [resolvable:$true] %s228_s12 }
   0x8   : > { %p4557_p4 = pneg %p4740_p3  ;;  %s4677_s13 = smov [#allocation4]  }
   0x9   : > { %s8339_s30 = smov (%p32_p6, %s30_s30), 0  ;;  %s4678_s14 = smov [#allocation2]  }
   0xa   : > { %p4558_p5 = pnand %p4736_p2, %p4557_p4  ;;  %s4679_s15 = smov [#allocation6]  }
   0xb   : > { %259 = sbr.rel (%p4740_p3) target bundleno = 1054 (0x41e), region = 44 }
   0xc   : > { %4563 = dma.vmem_to_smem (!%p4558_p5), %s219_s26, 16, %s4677_s13, [#allocation5]  }
   0xd   : > { %4560 = dma.vmem_to_smem (!%p4558_p5), %s209_s9, 16, %s4678_s14, [#allocation3]  }
   0xe   : > { %4566 = dma.vmem_to_smem (!%p4558_p5), %s229_s12, 64, %s4679_s15, [#allocation5]  }
  0x10   : > { %4658 = dma.done.wait (%p4736_p2), [#allocation3], 16  }
  0x11   : > { %4660 = vsyncadd (%p4736_p2), [#allocation3], 4294967280 }
  0x12   : > { %4662 = dma.done.wait (%p4736_p2), [#allocation5], 80  }
  0x13   : > { %4664 = vsyncadd (%p4736_p2), [#allocation5], 4294967216 }
  0x14   : > { %276 = sfence }
  0x15   : > { %p308_p7 = scmp.lt.s32.totalorder %s4667_s21, 1  ;;  %s329_s16 = sld [smem:[#allocation2]]  ;;  %vm445_vm0 = vcmask 64512  }
  0x16   : > { %s335_s17 = sld [smem:[#allocation4]] }
  0x17   : > { %s8341_s21 = smov (!%p308_p7, %s4667_s21), 1  ;;  %s3705_s18 = sld [smem:[#allocation2 + $0x1]] }
  0x18   : > { %s4543_s19 = sshll.u32 %s8341_s21, 7  ;;  %s3706_s20 = sld [smem:[#allocation4 + $0x1]] }
  0x19   : > { %s4775_s26 = scalar_lea.vmem %s8327_s0, %s4543_s19  ;;  %s3711_s27 = sld [smem:[#allocation2 + $0x2]] }
  0x1a   : > { %v325_v0 = vld [vmem:[%s4775_s26] sm:$0xff]  ;;  %s3712_s28 = sld [smem:[#allocation4 + $0x2]]  ;;  %v326_v5 = vld [vmem:[%s4775_s26 + $0x8] sm:$0xff]  ;;  %v327_v8 = vld [vmem:[%s4775_s26 + $0x10] sm:$0xff] }
  0x1b   : > { %v4778_v1 = vstv %s329_s16  ;;  %v3701_v4 = vld [vmem:[%s4775_s26 + $0x20] sm:$0xff]  ;;  %s4784_s29 = sld [smem:[#allocation2 + $0x3]]  ;;  %v3702_v6 = vld [vmem:[%s4775_s26 + $0x28] sm:$0xff]  ;;  %v3703_v13 = vld [vmem:[%s4775_s26 + $0x30] sm:$0xff]  ;;  %s4544_s16 = sshll.u32 %s8341_s21, 4 }
  0x1c   : > { %v331_v2 = vmul.f32 %v4778_v1, %v325_v0  ;;  %v4781_v3 = vstv %s335_s17  ;;  %s4788_s7 = sld [smem:[#allocation4 + $0x3]]  ;;  %v332_v7 = vmul.f32 %v4778_v1, %v326_v5  ;;  %v3707_v11 = vld [vmem:[%s4775_s26 + $0x40] sm:$0xff]  ;;  %v333_v12 = vmul.f32 %v4778_v1, %v327_v8  ;;  %v3708_v18 = vld [vmem:[%s4775_s26 + $0x48] sm:$0xff]  ;;  %v3709_v49 = vld [vmem:[%s4775_s26 + $0x50] sm:$0xff]  ;;  %s6172_s24 = scalar_lea.vmem %s8333_s6, %s4544_s16 }
  0x1d   : > { %v4793_v10 = vstv %s3705_s18  ;;  %s408_s8 = sld [smem:[#allocation6]]  ;;  %v3713_v21 = vld [vmem:[%s4775_s26 + $0x60] sm:$0xff]  ;;  %v3714_v28 = vld [vmem:[%s4775_s26 + $0x68] sm:$0xff]  ;;  %v3715_v50 = vld [vmem:[%s4775_s26 + $0x70] sm:$0xff] }
  0x1e   : > { %v337_v9 = vadd.f32 %v4781_v3, %v331_v2  ;;  %v352_v14 = vmul.f32 %v3701_v4, %v4793_v10  ;;  %v4799_v15 = vstv %s3706_s20  ;;  %s4801_s9 = sld [smem:[#allocation6 + $0x1]]  ;;  %v338_v16 = vadd.f32 %v4781_v3, %v332_v7  ;;  %v328_v59 = vld [vmem:[%s4775_s26 + $0x18] sm:$0xff] }
  0x1f   : > { %v353_v17 = vmul.f32 %v3702_v6, %v4793_v10  ;;  %v372_v20 = vstv %s3711_s27  ;;  %s3720_s10 = sld [smem:[#allocation6 + $0x2]]  ;;  %v339_v22 = vadd.f32 %v4781_v3, %v333_v12  ;;  %v354_v23 = vmul.f32 %v3703_v13, %v4793_v10  ;;  %v3704_v0 = vld [vmem:[%s4775_s26 + $0x38] sm:$0xff] }
  0x20   : > { %v4806_v19 = vmax.f32 %v337_v9, 0.0  ;;  %v358_v24 = vadd.f32 %v4799_v15, %v352_v14  ;;  %v373_v25 = vmul.f32 %v3707_v11, %v372_v20  ;;  %v4812_v26 = vstv %s3712_s28  ;;  %s3721_s11 = sld [smem:[#allocation6 + $0x3]]  ;;  %v3710_v2 = vld [vmem:[%s4775_s26 + $0x58] sm:$0xff] }
  0x21   : > { %v4814_v27 = vmax.f32 %v338_v16, 0.0  ;;  %v393_v29 = vstv %s4784_s29  ;;  %v359_v30 = vadd.f32 %v4799_v15, %v353_v17  ;;  %v374_v31 = vmul.f32 %v3708_v18, %v372_v20  ;;  %v3716_v13 = vld [vmem:[%s4775_s26 + $0x78] sm:$0xff]  ;;  %s5549_s27 = sld [smem:[#allocation6 + $0x80]] }
  0x22   : > { %v4819_v32 = vmax.f32 %v339_v22, 0.0  ;;  %v4821_v33 = vmax.f32 %v358_v24, 0.0  ;;  %v379_v34 = vadd.f32 %v4812_v26, %v373_v25  ;;  %v394_v35 = vmul.f32 %v3713_v21, %v393_v29  ;;  %v444_v21 = vld [vmem:[%s8332_s5] sm:$0xf]  ;;  %s5581_s28 = sld [smem:[#allocation6 + $0x82]] }
  0x23   : > { %v4825_v36 = vstv %s4788_s7  ;;  %v4827_v37 = vstv %s408_s8  ;;  %v4829_v38 = vmax.f32 %v359_v30, 0.0  ;;  %v380_v39 = vadd.f32 %v4812_v26, %v374_v31  ;;  %v633_v30 = vld [vmem:[%s8331_s4 + $0x78] sm:$0xff]  ;;  %s5554_s7 = sld [smem:[#allocation6 + $0x81]] }
  0x24   : > { %v395_v40 = vmul.f32 %v3714_v28, %v393_v29  ;;  %v4832_v41 = vmax.f32 %v379_v34, 0.0  ;;  %v400_v42 = vadd.f32 %v4825_v36, %v394_v35  ;;  %v410_v43 = vmul.f32 %v4827_v37, %v4806_v19  ;;  %s5613_s26 = sld [smem:[#allocation6 + $0x83]] }
  0x25   : > { %v4838_v44 = vstv %s4801_s9  ;;  %v425_v46 = vstv %s3720_s10  ;;  %v4842_v47 = vmax.f32 %v380_v39, 0.0  ;;  %v411_v54 = vmul.f32 %v4827_v37, %v4814_v27  ;;  %s6407_s8 = sld [smem:[#allocation6 + $0x100]] }
  0x26   : > { %v416_v45 = vmul.f32 %v4838_v44, %v4821_v33  ;;  %v401_v48 = vadd.f32 %v4825_v36, %v395_v40  ;;  %v4847_v51 = vmax.f32 %v400_v42, 0.0  ;;  %v426_v52 = vmul.f32 %v425_v46, %v4832_v41  ;;  %v632_v40 = vld [vmem:[%s8331_s4 + $0x70] sm:$0xff]  ;;  %s6436_s25 = sld [smem:[#allocation6 + $0x102]] }
  0x27   : > { %v4850_v53 = vstv %s3721_s11  ;;  %v417_v57 = vmul.f32 %v4838_v44, %v4829_v38  ;;  %v427_v58 = vmul.f32 %v425_v46, %v4842_v47  ;;  %v360_v61 = vadd.f32 %v4799_v15, %v354_v23  ;;  %s7257_s17 = sld [smem:[#allocation6 + $0x180]] }
  0x28   : > { %v420_v55 = vadd.f32 %v416_v45, %v410_v43  ;;  %v4854_v56 = vmax.f32 %v401_v48, 0.0  ;;  %v436_v60 = vmul.f32 %v4850_v53, %v4847_v51  ;;  %v375_v62 = vmul.f32 %v3709_v49, %v372_v20  ;;  %v648_v49 = vld [vmem:[%s8331_s4 + $0xf0] sm:$0xff]  ;;  %s7265_s29 = sld [smem:[#allocation6 + $0x181]] }
  0x29   : > { %v396_v63 = vmul.f32 %v3715_v50, %v393_v29  ;;  %v421_v5 = vadd.f32 %v417_v57, %v411_v54  ;;  %v412_v7 = vmul.f32 %v4827_v37, %v4819_v32  ;;  %v4869_v8 = vmax.f32 %v360_v61, 0.0  ;;  %v645_v61 = vld [vmem:[%s8331_s4 + $0xd8] sm:$0xff]  ;;  %s7291_s20 = sld [smem:[#allocation6 + $0x182]] }
  0x2a   : > { %v430_v4 = vadd.f32 %v426_v52, %v420_v55  ;;  %v437_v6 = vmul.f32 %v4850_v53, %v4854_v56  ;;  %v381_v9 = vadd.f32 %v4812_v26, %v375_v62  ;;  %v334_v12 = vmul.f32 %v4778_v1, %v328_v59  ;;  %v630_v55 = vld [vmem:[%s8331_s4 + $0x60] sm:$0xff]  ;;  %v681_v62 = vld [vmem:[%s8331_s4 + $0x1f8] sm:$0xff]  ;;  %s7317_s14 = sld [smem:[#allocation6 + $0x183]] }
  0x2b   : > { %v402_v11 = vadd.f32 %v4825_v36, %v396_v63  ;;  %v431_v16 = vadd.f32 %v427_v58, %v421_v5  ;;  %v355_v17 = vmul.f32 %v3704_v0, %v4793_v10  ;;  %v376_v18 = vmul.f32 %v3710_v2, %v372_v20  ;;  %v646_v58 = vld [vmem:[%s8331_s4 + $0xe0] sm:$0xff]  ;;  %v664_v63 = vld [vmem:[%s8331_s4 + $0x170] sm:$0xff]  ;;  %v663_v5 = vld [vmem:[%s8331_s4 + $0x168] sm:$0xff] }
  0x2c   : > { %v440_v14 = vadd.f32 %v436_v60, %v430_v4  ;;  %v4879_v22 = vmax.f32 %v381_v9, 0.0  ;;  %v418_v24 = vmul.f32 %v4838_v44, %v4869_v8  ;;  %v340_v25 = vadd.f32 %v4781_v3, %v334_v12  ;;  %v629_v60 = vld [vmem:[%s8331_s4 + $0x58] sm:$0xff]  ;;  %v628_v0 = vld [vmem:[%s8331_s4 + $0x50] sm:$0xff]  ;;  %v643_v9 = vld [vmem:[%s8331_s4 + $0xc8] sm:$0xff] }
  0x2d   : > { %v4881_v23 = vmax.f32 %v402_v11, 0.0  ;;  %v441_v1 = vadd.f32 %v437_v6, %v431_v16  ;;  %v361_v28 = vadd.f32 %v4799_v15, %v355_v17  ;;  %v382_v10 = vadd.f32 %v4812_v26, %v376_v18  ;;  %v680_v2 = vld [vmem:[%s8331_s4 + $0x1f0] sm:$0xff]  ;;  %v627_v6 = vld [vmem:[%s8331_s4 + $0x48] sm:$0xff]  ;;  %v662_v11 = vld [vmem:[%s8331_s4 + $0x160] sm:$0xff] }
  0x2e   : > { %464 = vmatpush.msra.mxu0 %v440_v14  ;;  %v397_v20 = vmul.f32 %v3716_v13, %v393_v29  ;;  %v422_v31 = vadd.f32 %v418_v24, %v412_v7  ;;  %v428_v34 = vmul.f32 %v425_v46, %v4879_v22  ;;  %v4894_v39 = vmax.f32 %v340_v25, 0.0  ;;  %v649_v29 = vld [vmem:[%s8331_s4 + $0xf8] sm:$0xff]  ;;  %v644_v4 = vld [vmem:[%s8331_s4 + $0xd0] sm:$0xff]  ;;  %v679_v7 = vld [vmem:[%s8331_s4 + $0x1e8] sm:$0xff] }
  0x2f   : > { %v438_v35 = vmul.f32 %v4850_v53, %v4881_v23  ;;  %3722 = vmatmul.msk.f32.vlgmr.msra.gmra.mxu0 %vm445_vm0, %v444_v21  ;;  %484 = vmatpush.msra.mxu1 %v441_v1  ;;  %v4897_v3 = vmax.f32 %v361_v28, 0.0  ;;  %v4899_v15 = vmax.f32 %v382_v10, 0.0  ;;  %v626_v12 = vld [vmem:[%s8331_s4 + $0x40] sm:$0xff]  ;;  %v661_v16 = vld [vmem:[%s8331_s4 + $0x158] sm:$0xff]  ;;  %v660_v24 = vld [vmem:[%s8331_s4 + $0x150] sm:$0xff] }
  0x30   : > { %v403_v26 = vadd.f32 %v4825_v36, %v397_v20  ;;  %549 = vmatpush.msrb.mxu0 %v440_v14  ;;  %v432_v42 = vadd.f32 %v428_v34, %v422_v31  ;;  %v413_v43 = vmul.f32 %v4827_v37, %v4894_v39  ;;  %3723 = vmatmul.msk.f32.vlgmr.msra.gmra.mxu1 %vm445_vm0, %v444_v21  ;;  %v631_v37 = vld [vmem:[%s8331_s4 + $0x68] sm:$0xff]  ;;  %v642_v13 = vld [vmem:[%s8331_s4 + $0xc0] sm:$0xff]  ;;  %v625_v17 = vld [vmem:[%s8331_s4 + $0x38] sm:$0xff] }
  0x31   : > { %v419_v36 = vmul.f32 %v4838_v44, %v4897_v3  ;;  %v429_v48 = vmul.f32 %v425_v46, %v4899_v15  ;;  %569 = vmatpush.msrb.mxu1 %v441_v1  ;;  %v3726_v44 = vld [vmem:[%s8332_s5 + $0x4] sm:$0xf]  ;;  %v647_v46 = vld [vmem:[%s8331_s4 + $0xe8] sm:$0xff]  ;;  %v641_v18 = vld [vmem:[%s8331_s4 + $0xb8] sm:$0xff] }
  0x32   : > { %682 = vmatpush.msra.mxu0 %v633_v30  ;;  %v4911_v45 = vmax.f32 %v403_v26, 0.0  ;;  %v442_v50 = vadd.f32 %v438_v35, %v432_v42  ;;  %v678_v14 = vld [vmem:[%s8331_s4 + $0x1e0] sm:$0xff]  ;;  %v624_v25 = vld [vmem:[%s8331_s4 + $0x30] sm:$0xff]  ;;  %v659_v10 = vld [vmem:[%s8331_s4 + $0x148] sm:$0xff] }
  0x33   : > { %702 = vmatpush.msra.mxu1 %v649_v29  ;;  %v423_v52 = vadd.f32 %v419_v36, %v413_v43  ;;  %v640_v1 = vld [vmem:[%s8331_s4 + $0xb0] sm:$0xff]  ;;  %v623_v20 = vld [vmem:[%s8331_s4 + $0x28] sm:$0xff]  ;;  %v658_v34 = vld [vmem:[%s8331_s4 + $0x140] sm:$0xff] }
  0x34   : > { %683 = vmatpush.msra.mxu0 %v632_v40  ;;  %v439_v54 = vmul.f32 %v4850_v53, %v4911_v45  ;;  %504 = vmatpush.msra.mxu2 %v442_v50  ;;  %v665_v53 = vld [vmem:[%s8331_s4 + $0x178] sm:$0xff]  ;;  %v676_v28 = vld [vmem:[%s8331_s4 + $0x1d0] sm:$0xff]  ;;  %v639_v30 = vld [vmem:[%s8331_s4 + $0xa8] sm:$0xff] }
  0x35   : > { %703 = vmatpush.msra.mxu1 %v648_v49  ;;  %v433_v57 = vadd.f32 %v429_v48, %v423_v52  ;;  %3724 = vmatmul.msk.f32.vlgmr.msra.gmra.mxu2 %vm445_vm0, %v444_v21  ;;  %v675_v31 = vld [vmem:[%s8331_s4 + $0x1c8] sm:$0xff]  ;;  %v622_v35 = vld [vmem:[%s8331_s4 + $0x20] sm:$0xff]  ;;  %v657_v40 = vld [vmem:[%s8331_s4 + $0x138] sm:$0xff] }
  0x36   : > { %684 = vmatpush.msra.mxu0 %v631_v37  ;;  %589 = vmatpush.msrb.mxu2 %v442_v50  ;;  %v638_v26 = vld [vmem:[%s8331_s4 + $0xa0] sm:$0xff]  ;;  %v621_v42 = vld [vmem:[%s8331_s4 + $0x18] sm:$0xff]  ;;  %v656_v48 = vld [vmem:[%s8331_s4 + $0x130] sm:$0xff] }
  0x37   : > { %3727 = vmatmul.msk.f32.vlgmr.msrb.gmra.mxu0 %vm445_vm0, %v3726_v44  ;;  %v443_v59 = vadd.f32 %v439_v54, %v433_v57  ;;  %704 = vmatpush.msra.mxu1 %v647_v46  ;;  %v674_v29 = vld [vmem:[%s8331_s4 + $0x1c0] sm:$0xff]  ;;  %v637_v43 = vld [vmem:[%s8331_s4 + $0x98] sm:$0xff]  ;;  %v620_v49 = vld [vmem:[%s8331_s4 + $0x10] sm:$0xff] }
  0x38   : > { %685 = vmatpush.msra.mxu0 %v630_v55  ;;  %3728 = vmatmul.msk.f32.vlgmr.msrb.gmra.mxu1 %vm445_vm0, %v3726_v44  ;;  %v673_v36 = vld [vmem:[%s8331_s4 + $0x1b8] sm:$0xff]  ;;  %v636_v50 = vld [vmem:[%s8331_s4 + $0x90] sm:$0xff]  ;;  %v655_v52 = vld [vmem:[%s8331_s4 + $0x128] sm:$0xff] }
  0x39   : > { %722 = vmatpush.msra.mxu2 %v665_v53  ;;  %524 = vmatpush.msra.mxu3 %v443_v59  ;;  %v672_v37 = vld [vmem:[%s8331_s4 + $0x1b0] sm:$0xff]  ;;  %v619_v54 = vld [vmem:[%s8331_s4 + $0x8] sm:$0xff]  ;;  %v654_v55 = vld [vmem:[%s8331_s4 + $0x120] sm:$0xff] }
  0x3a   : > { %705 = vmatpush.msra.mxu1 %v646_v58  ;;  %3725 = vmatmul.msk.f32.vlgmr.msra.gmra.mxu3 %vm445_vm0, %v444_v21  ;;  %v677_v21 = vld [vmem:[%s8331_s4 + $0x1d8] sm:$0xff]  ;;  %v671_v46 = vld [vmem:[%s8331_s4 + $0x1a8] sm:$0xff]  ;;  %v618_v57 = vld [vmem:[%s8331_s4] sm:$0xff] }
  0x3b   : > { %686 = vmatpush.msra.mxu0 %v629_v60  ;;  %609 = vmatpush.msrb.mxu3 %v443_v59  ;;  %v634_v53 = vld [vmem:[%s8331_s4 + $0x80] sm:$0xff]  ;;  %v653_v59 = vld [vmem:[%s8331_s4 + $0x118] sm:$0xff] }
  0x3c   : > { %706 = vmatpush.msra.mxu1 %v645_v61  ;;  %723 = vmatpush.msra.mxu2 %v664_v63  ;;  %v670_v58 = vld [vmem:[%s8331_s4 + $0x1a0] sm:$0xff]  ;;  %v3746_v60 = vld [vmem:[%s8331_s4 + $0x278] sm:$0xff]  ;;  %v652_v63 = vld [vmem:[%s8331_s4 + $0x110] sm:$0xff] }
  0x3d   : > { %742 = vmatpush.msra.mxu3 %v681_v62  ;;  %3729 = vmatmul.msk.f32.vlgmr.msrb.gmra.mxu2 %vm445_vm0, %v3726_v44  ;;  %v3762_v61 = vld [vmem:[%s8331_s4 + $0x2f8] sm:$0xff] }
  0x3e   : > { %687 = vmatpush.msra.mxu0 %v628_v0  ;;  %707 = vmatpush.msra.mxu1 %v644_v4  ;;  %v669_v62 = vld [vmem:[%s8331_s4 + $0x198] sm:$0xff]  ;;  %v3745_v0 = vld [vmem:[%s8331_s4 + $0x270] sm:$0xff] }
  0x3f   : > { %743 = vmatpush.msra.mxu3 %v680_v2  ;;  %724 = vmatpush.msra.mxu2 %v663_v5  ;;  %v3761_v2 = vld [vmem:[%s8331_s4 + $0x2f0] sm:$0xff]  ;;  %v651_v5 = vld [vmem:[%s8331_s4 + $0x108] sm:$0xff] }
  0x40   : > { %688 = vmatpush.msra.mxu0 %v627_v6  ;;  %708 = vmatpush.msra.mxu1 %v643_v9  ;;  %v668_v4 = vld [vmem:[%s8331_s4 + $0x190] sm:$0xff]  ;;  %v3744_v6 = vld [vmem:[%s8331_s4 + $0x268] sm:$0xff] }
  0x41   : > { %744 = vmatpush.msra.mxu3 %v679_v7  ;;  %725 = vmatpush.msra.mxu2 %v662_v11  ;;  %v3760_v7 = vld [vmem:[%s8331_s4 + $0x2e8] sm:$0xff]  ;;  %v650_v11 = vld [vmem:[%s8331_s4 + $0x100] sm:$0xff] }
  0x42   : > { %689 = vmatpush.msra.mxu0 %v626_v12  ;;  %3730 = vmatmul.msk.f32.vlgmr.msrb.gmra.mxu3 %vm445_vm0, %v3726_v44  ;;  %v635_v44 = vld [vmem:[%s8331_s4 + $0x88] sm:$0xff]  ;;  %v3743_v12 = vld [vmem:[%s8331_s4 + $0x260] sm:$0xff] }
  0x43   : > { %709 = vmatpush.msra.mxu1 %v642_v13  ;;  %745 = vmatpush.msra.mxu3 %v678_v14  ;;  %v667_v9 = vld [vmem:[%s8331_s4 + $0x188] sm:$0xff]  ;;  %v3759_v13 = vld [vmem:[%s8331_s4 + $0x2e0] sm:$0xff] }
  0x44   : > { %726 = vmatpush.msra.mxu2 %v661_v16  ;;  %690 = vmatpush.msra.mxu0 %v625_v17  ;;  %v666_v14 = vld [vmem:[%s8331_s4 + $0x180] sm:$0xff]  ;;  %v3778_v16 = vld [vmem:[%s8331_s4 + $0x378] sm:$0xff] }
  0x45   : > { %710 = vmatpush.msra.mxu1 %v641_v18  ;;  %746 = vmatpush.msra.mxu3 %v677_v21  ;;  %v3794_v17 = vld [vmem:[%s8331_s4 + $0x3f8] sm:$0xff] }
  0x46   : > { %727 = vmatpush.msra.mxu2 %v660_v24  ;;  %691 = vmatpush.msra.mxu0 %v624_v25  ;;  %v3742_v18 = vld [vmem:[%s8331_s4 + $0x258] sm:$0xff]  ;;  %v3777_v24 = vld [vmem:[%s8331_s4 + $0x370] sm:$0xff] }
  0x47   : > { %711 = vmatpush.msra.mxu1 %v640_v1  ;;  %747 = vmatpush.msra.mxu3 %v676_v28  ;;  %v3758_v21 = vld [vmem:[%s8331_s4 + $0x2d8] sm:$0xff]  ;;  %v3793_v25 = vld [vmem:[%s8331_s4 + $0x3f0] sm:$0xff] }
  0x48   : > { %728 = vmatpush.msra.mxu2 %v659_v10  ;;  %692 = vmatpush.msra.mxu0 %v623_v20  ;;  %v3741_v1 = vld [vmem:[%s8331_s4 + $0x250] sm:$0xff]  ;;  %v3776_v10 = vld [vmem:[%s8331_s4 + $0x368] sm:$0xff] }
  0x49   : > { %712 = vmatpush.msra.mxu1 %v639_v30  ;;  %748 = vmatpush.msra.mxu3 %v675_v31  ;;  %v3757_v28 = vld [vmem:[%s8331_s4 + $0x2d0] sm:$0xff]  ;;  %v3792_v20 = vld [vmem:[%s8331_s4 + $0x3e8] sm:$0xff] }
  0x4a   : > { %729 = vmatpush.msra.mxu2 %v658_v34  ;;  %693 = vmatpush.msra.mxu0 %v622_v35  ;;  %v3740_v30 = vld [vmem:[%s8331_s4 + $0x248] sm:$0xff]  ;;  %v3775_v34 = vld [vmem:[%s8331_s4 + $0x360] sm:$0xff] }
  0x4b   : > { %713 = vmatpush.msra.mxu1 %v638_v26  ;;  %749 = vmatpush.msra.mxu3 %v674_v29  ;;  %v3756_v31 = vld [vmem:[%s8331_s4 + $0x2c8] sm:$0xff]  ;;  %v3791_v35 = vld [vmem:[%s8331_s4 + $0x3e0] sm:$0xff] }
  0x4c   : > { %730 = vmatpush.msra.mxu2 %v657_v40  ;;  %694 = vmatpush.msra.mxu0 %v621_v42  ;;  %v3739_v26 = vld [vmem:[%s8331_s4 + $0x240] sm:$0xff]  ;;  %v3774_v40 = vld [vmem:[%s8331_s4 + $0x358] sm:$0xff] }
  0x4d   : > { %714 = vmatpush.msra.mxu1 %v637_v43  ;;  %750 = vmatpush.msra.mxu3 %v673_v36  ;;  %v3755_v29 = vld [vmem:[%s8331_s4 + $0x2c0] sm:$0xff]  ;;  %v3790_v42 = vld [vmem:[%s8331_s4 + $0x3d8] sm:$0xff] }
  0x4e   : > { %731 = vmatpush.msra.mxu2 %v656_v48  ;;  %695 = vmatpush.msra.mxu0 %v620_v49  ;;  %v3738_v43 = vld [vmem:[%s8331_s4 + $0x238] sm:$0xff]  ;;  %v3773_v48 = vld [vmem:[%s8331_s4 + $0x350] sm:$0xff] }
  0x4f   : > { %715 = vmatpush.msra.mxu1 %v636_v50  ;;  %751 = vmatpush.msra.mxu3 %v672_v37  ;;  %v3754_v36 = vld [vmem:[%s8331_s4 + $0x2b8] sm:$0xff]  ;;  %v3789_v49 = vld [vmem:[%s8331_s4 + $0x3d0] sm:$0xff] }
  0x50   : > { %732 = vmatpush.msra.mxu2 %v655_v52  ;;  %696 = vmatpush.msra.mxu0 %v619_v54  ;;  %v3737_v50 = vld [vmem:[%s8331_s4 + $0x230] sm:$0xff]  ;;  %v3772_v52 = vld [vmem:[%s8331_s4 + $0x348] sm:$0xff] }
  0x51   : > { %716 = vmatpush.msra.mxu1 %v635_v44  ;;  %752 = vmatpush.msra.mxu3 %v671_v46  ;;  %v3753_v37 = vld [vmem:[%s8331_s4 + $0x2b0] sm:$0xff]  ;;  %v3788_v54 = vld [vmem:[%s8331_s4 + $0x3c8] sm:$0xff] }
  0x52   : > { %733 = vmatpush.msra.mxu2 %v654_v55  ;;  %697 = vmatpush.msra.mxu0 %v618_v57  ;;  %v3736_v44 = vld [vmem:[%s8331_s4 + $0x228] sm:$0xff]  ;;  %v3771_v55 = vld [vmem:[%s8331_s4 + $0x340] sm:$0xff] }
  0x53   : > { %717 = vmatpush.msra.mxu1 %v634_v53  ;;  %753 = vmatpush.msra.mxu3 %v670_v58  ;;  %v3752_v46 = vld [vmem:[%s8331_s4 + $0x2a8] sm:$0xff]  ;;  %v3787_v57 = vld [vmem:[%s8331_s4 + $0x3c0] sm:$0xff] }
  0x54   : > { %734 = vmatpush.msra.mxu2 %v653_v59  ;;  %827 = vmatpush.msrb.mxu0 %v3746_v60  ;;  %v3735_v53 = vld [vmem:[%s8331_s4 + $0x220] sm:$0xff]  ;;  %v3770_v59 = vld [vmem:[%s8331_s4 + $0x338] sm:$0xff] }
  0x55   : > { %847 = vmatpush.msrb.mxu1 %v3762_v61  ;;  %754 = vmatpush.msra.mxu3 %v669_v62  ;;  %v3751_v58 = vld [vmem:[%s8331_s4 + $0x2a0] sm:$0xff]  ;;  %v3786_v60 = vld [vmem:[%s8331_s4 + $0x3b8] sm:$0xff] }
  0x56   : > { %735 = vmatpush.msra.mxu2 %v652_v63  ;;  %828 = vmatpush.msrb.mxu0 %v3745_v0  ;;  %v3734_v61 = vld [vmem:[%s8331_s4 + $0x218] sm:$0xff]  ;;  %v3769_v63 = vld [vmem:[%s8331_s4 + $0x330] sm:$0xff] }
  0x57   : > { %848 = vmatpush.msrb.mxu1 %v3761_v2  ;;  %755 = vmatpush.msra.mxu3 %v668_v4  ;;  %v3750_v62 = vld [vmem:[%s8331_s4 + $0x298] sm:$0xff]  ;;  %v3785_v0 = vld [vmem:[%s8331_s4 + $0x3b0] sm:$0xff] }
  0x58   : > { %736 = vmatpush.msra.mxu2 %v651_v5  ;;  %829 = vmatpush.msrb.mxu0 %v3744_v6  ;;  %v3733_v2 = vld [vmem:[%s8331_s4 + $0x210] sm:$0xff]  ;;  %v3768_v5 = vld [vmem:[%s8331_s4 + $0x328] sm:$0xff] }
  0x59   : > { %849 = vmatpush.msrb.mxu1 %v3760_v7  ;;  %756 = vmatpush.msra.mxu3 %v667_v9  ;;  %v3749_v4 = vld [vmem:[%s8331_s4 + $0x290] sm:$0xff]  ;;  %v3784_v6 = vld [vmem:[%s8331_s4 + $0x3a8] sm:$0xff] }
  0x5a   : > { %737 = vmatpush.msra.mxu2 %v650_v11  ;;  %830 = vmatpush.msrb.mxu0 %v3743_v12  ;;  %v3732_v7 = vld [vmem:[%s8331_s4 + $0x208] sm:$0xff]  ;;  %v3767_v11 = vld [vmem:[%s8331_s4 + $0x320] sm:$0xff] }
  0x5b   : > { %850 = vmatpush.msrb.mxu1 %v3759_v13  ;;  %757 = vmatpush.msra.mxu3 %v666_v14  ;;  %v3748_v9 = vld [vmem:[%s8331_s4 + $0x288] sm:$0xff]  ;;  %v3783_v12 = vld [vmem:[%s8331_s4 + $0x3a0] sm:$0xff] }
  0x5c   : > { %867 = vmatpush.msrb.mxu2 %v3778_v16  ;;  %831 = vmatpush.msrb.mxu0 %v3742_v18  ;;  %v3731_v13 = vld [vmem:[%s8331_s4 + $0x200] sm:$0xff]  ;;  %v3766_v16 = vld [vmem:[%s8331_s4 + $0x318] sm:$0xff]  ;;  %v3765_v18 = vld [vmem:[%s8331_s4 + $0x310] sm:$0xff] }
  0x5d   : > { %887 = vmatpush.msrb.mxu3 %v3794_v17  ;;  %851 = vmatpush.msrb.mxu1 %v3758_v21  ;;  %v3747_v14 = vld [vmem:[%s8331_s4 + $0x280] sm:$0xff]  ;;  %v3782_v17 = vld [vmem:[%s8331_s4 + $0x398] sm:$0xff]  ;;  %v3781_v21 = vld [vmem:[%s8331_s4 + $0x390] sm:$0xff] }
  0x5e   : > { %868 = vmatpush.msrb.mxu2 %v3777_v24  ;;  %832 = vmatpush.msrb.mxu0 %v3741_v1  ;;  %v3764_v24 = vld [vmem:[%s8331_s4 + $0x308] sm:$0xff]  ;;  %v3763_v1 = vld [vmem:[%s8331_s4 + $0x300] sm:$0xff] }
  0x5f   : > { %888 = vmatpush.msrb.mxu3 %v3793_v25  ;;  %852 = vmatpush.msrb.mxu1 %v3757_v28  ;;  %v3780_v25 = vld [vmem:[%s8331_s4 + $0x388] sm:$0xff]  ;;  %v3779_v28 = vld [vmem:[%s8331_s4 + $0x380] sm:$0xff] }
  0x60   : > { %869 = vmatpush.msrb.mxu2 %v3776_v10  ;;  %833 = vmatpush.msrb.mxu0 %v3740_v30 }
  0x61   : > { %889 = vmatpush.msrb.mxu3 %v3792_v20  ;;  %853 = vmatpush.msrb.mxu1 %v3756_v31 }
  0x62   : > { %870 = vmatpush.msrb.mxu2 %v3775_v34  ;;  %834 = vmatpush.msrb.mxu0 %v3739_v26  ;;  %v3810_v34 = vld [vmem:[%s8331_s4 + $0x478] sm:$0xff] }
  0x63   : > { %890 = vmatpush.msrb.mxu3 %v3791_v35  ;;  %854 = vmatpush.msrb.mxu1 %v3755_v29  ;;  %v3826_v29 = vld [vmem:[%s8331_s4 + $0x4f8] sm:$0xff] }
  0x64   : > { %871 = vmatpush.msrb.mxu2 %v3774_v40  ;;  %835 = vmatpush.msrb.mxu0 %v3738_v43  ;;  %v3809_v40 = vld [vmem:[%s8331_s4 + $0x470] sm:$0xff] }
  0x65   : > { %891 = vmatpush.msrb.mxu3 %v3790_v42  ;;  %855 = vmatpush.msrb.mxu1 %v3754_v36  ;;  %v3825_v43 = vld [vmem:[%s8331_s4 + $0x4f0] sm:$0xff]  ;;  %v3808_v36 = vld [vmem:[%s8331_s4 + $0x468] sm:$0xff] }
  0x66   : > { %872 = vmatpush.msrb.mxu2 %v3773_v48  ;;  %836 = vmatpush.msrb.mxu0 %v3737_v50  ;;  %v3824_v48 = vld [vmem:[%s8331_s4 + $0x4e8] sm:$0xff]  ;;  %v3823_v50 = vld [vmem:[%s8331_s4 + $0x4e0] sm:$0xff] }
  0x67   : > { %892 = vmatpush.msrb.mxu3 %v3789_v49  ;;  %856 = vmatpush.msrb.mxu1 %v3753_v37  ;;  %v3807_v49 = vld [vmem:[%s8331_s4 + $0x460] sm:$0xff]  ;;  %v3806_v37 = vld [vmem:[%s8331_s4 + $0x458] sm:$0xff] }
  0x68   : > { %873 = vmatpush.msrb.mxu2 %v3772_v52  ;;  %837 = vmatpush.msrb.mxu0 %v3736_v44  ;;  %v3805_v44 = vld [vmem:[%s8331_s4 + $0x450] sm:$0xff] }
  0x69   : > { %893 = vmatpush.msrb.mxu3 %v3788_v54  ;;  %857 = vmatpush.msrb.mxu1 %v3752_v46  ;;  %v3822_v54 = vld [vmem:[%s8331_s4 + $0x4d8] sm:$0xff] }
  0x6a   : > { %874 = vmatpush.msrb.mxu2 %v3771_v55  ;;  %838 = vmatpush.msrb.mxu0 %v3735_v53  ;;  %v3821_v55 = vld [vmem:[%s8331_s4 + $0x4d0] sm:$0xff]  ;;  %v3842_v53 = vld [vmem:[%s8331_s4 + $0x578] sm:$0xff] }
  0x6b   : > { %894 = vmatpush.msrb.mxu3 %v3787_v57  ;;  %858 = vmatpush.msrb.mxu1 %v3751_v58  ;;  %v3804_v58 = vld [vmem:[%s8331_s4 + $0x448] sm:$0xff] }
  0x6c   : > { %875 = vmatpush.msrb.mxu2 %v3770_v59  ;;  %839 = vmatpush.msrb.mxu0 %v3734_v61  ;;  %v3820_v59 = vld [vmem:[%s8331_s4 + $0x4c8] sm:$0xff]  ;;  %v3803_v61 = vld [vmem:[%s8331_s4 + $0x440] sm:$0xff] }
  0x6d   : > { %895 = vmatpush.msrb.mxu3 %v3786_v60  ;;  %859 = vmatpush.msrb.mxu1 %v3750_v62  ;;  %v3841_v60 = vld [vmem:[%s8331_s4 + $0x570] sm:$0xff]  ;;  %v3819_v62 = vld [vmem:[%s8331_s4 + $0x4c0] sm:$0xff] }
  0x6e   : > { %876 = vmatpush.msrb.mxu2 %v3769_v63  ;;  %840 = vmatpush.msrb.mxu0 %v3733_v2 }
  0x6f   : > { %896 = vmatpush.msrb.mxu3 %v3785_v0  ;;  %860 = vmatpush.msrb.mxu1 %v3749_v4  ;;  %v3840_v0 = vld [vmem:[%s8331_s4 + $0x568] sm:$0xff]  ;;  %v3858_v4 = vld [vmem:[%s8331_s4 + $0x5f8] sm:$0xff] }
  0x70   : > { %877 = vmatpush.msrb.mxu2 %v3768_v5  ;;  %841 = vmatpush.msrb.mxu0 %v3732_v7  ;;  %v3802_v5 = vld [vmem:[%s8331_s4 + $0x438] sm:$0xff] }
  0x71   : > { %897 = vmatpush.msrb.mxu3 %v3784_v6  ;;  %861 = vmatpush.msrb.mxu1 %v3748_v9  ;;  %v3839_v6 = vld [vmem:[%s8331_s4 + $0x560] sm:$0xff]  ;;  %v3818_v7 = vld [vmem:[%s8331_s4 + $0x4b8] sm:$0xff]  ;;  %v3857_v9 = vld [vmem:[%s8331_s4 + $0x5f0] sm:$0xff] }
  0x72   : > { %878 = vmatpush.msrb.mxu2 %v3767_v11  ;;  %842 = vmatpush.msrb.mxu0 %v3731_v13  ;;  %v3838_v11 = vld [vmem:[%s8331_s4 + $0x558] sm:$0xff]  ;;  %v3856_v13 = vld [vmem:[%s8331_s4 + $0x5e8] sm:$0xff] }
  0x73   : > { %898 = vmatpush.msrb.mxu3 %v3783_v12  ;;  %862 = vmatpush.msrb.mxu1 %v3747_v14  ;;  %v3801_v12 = vld [vmem:[%s8331_s4 + $0x430] sm:$0xff] }
  0x74   : > { %879 = vmatpush.msrb.mxu2 %v3766_v16  ;;  %v3817_v14 = vld [vmem:[%s8331_s4 + $0x4b0] sm:$0xff] }
  0x75   : > { %899 = vmatpush.msrb.mxu3 %v3782_v17  ;;  %v3837_v16 = vld [vmem:[%s8331_s4 + $0x550] sm:$0xff]  ;;  %v3800_v17 = vld [vmem:[%s8331_s4 + $0x428] sm:$0xff] }
  0x76   : > { %880 = vmatpush.msrb.mxu2 %v3765_v18  ;;  %v3855_v18 = vld [vmem:[%s8331_s4 + $0x5e0] sm:$0xff] }
  0x77   : > { %900 = vmatpush.msrb.mxu3 %v3781_v21  ;;  %v3816_v21 = vld [vmem:[%s8331_s4 + $0x4a8] sm:$0xff] }
  0x78   : > { %881 = vmatpush.msrb.mxu2 %v3764_v24  ;;  %v3836_v24 = vld [vmem:[%s8331_s4 + $0x548] sm:$0xff] }
  0x79   : > { %901 = vmatpush.msrb.mxu3 %v3780_v25  ;;  %v3854_v25 = vld [vmem:[%s8331_s4 + $0x5d8] sm:$0xff] }
  0x7a   : > { %882 = vmatpush.msrb.mxu2 %v3763_v1  ;;  %v3799_v1 = vld [vmem:[%s8331_s4 + $0x420] sm:$0xff] }
  0x7b   : > { %902 = vmatpush.msrb.mxu3 %v3779_v28  ;;  %v3835_v28 = vld [vmem:[%s8331_s4 + $0x540] sm:$0xff] }
  0xac   : > { %v466_v10 = vpop.f32.mrf.mxu0 }
  0xad   : > { %v486_v20 = vpop.f32.mrf.mxu1 }
  0xb4   : > { %v551_v30 = vpop.f32.mrf.mxu0 }
  0xb5   : > { %v5302_v31 = vmax.f32 %v466_v10, %v551_v30  ;;  %v571_v35 = vpop.f32.mrf.mxu1  ;;  %v3815_v10 = vld [vmem:[%s8331_s4 + $0x4a0] sm:$0xff]  ;;  %v3798_v30 = vld [vmem:[%s8331_s4 + $0x418] sm:$0xff] }
  0xb6   : > { %v5307_v26 = vmax.f32 %v486_v20, %v571_v35  ;;  %v3853_v20 = vld [vmem:[%s8331_s4 + $0x5d0] sm:$0xff]  ;;  %v3814_v35 = vld [vmem:[%s8331_s4 + $0x498] sm:$0xff] }
  0xb7   : > { %698 = vmatmul.f32.vlgmr.msra.gmra.mxu0 %v5302_v31 }
  0xb8   : > { %973 = vmatpush.msra.mxu0 %v3810_v34  ;;  %v506_v42 = vpop.f32.mrf.mxu2  ;;  %718 = vmatmul.f32.vlgmr.msra.gmra.mxu1 %v5307_v26  ;;  %v3834_v34 = vld [vmem:[%s8331_s4 + $0x538] sm:$0xff] }
  0xb9   : > { %993 = vmatpush.msra.mxu1 %v3826_v29  ;;  %v3852_v29 = vld [vmem:[%s8331_s4 + $0x5c8] sm:$0xff] }
  0xba   : > { %974 = vmatpush.msra.mxu0 %v3809_v40  ;;  %v3797_v40 = vld [vmem:[%s8331_s4 + $0x410] sm:$0xff] }
  0xbb   : > { %994 = vmatpush.msra.mxu1 %v3825_v43  ;;  %v3813_v43 = vld [vmem:[%s8331_s4 + $0x490] sm:$0xff] }
  0xbc   : > { %975 = vmatpush.msra.mxu0 %v3808_v36  ;;  %v3851_v36 = vld [vmem:[%s8331_s4 + $0x5c0] sm:$0xff] }
  0xbd   : > { %v526_v52 = vpop.f32.mrf.mxu3  ;;  %995 = vmatpush.msra.mxu1 %v3824_v48  ;;  %v3796_v48 = vld [vmem:[%s8331_s4 + $0x408] sm:$0xff] }
  0xbe   : > { %976 = vmatpush.msra.mxu0 %v3807_v49  ;;  %v3832_v49 = vld [vmem:[%s8331_s4 + $0x528] sm:$0xff] }
  0xbf   : > { %843 = vmatmul.f32.vlgmr.msrb.gmra.mxu0 %v5302_v31  ;;  %996 = vmatpush.msra.mxu1 %v3823_v50  ;;  %v3812_v50 = vld [vmem:[%s8331_s4 + $0x488] sm:$0xff] }
  0xc0   : > { %977 = vmatpush.msra.mxu0 %v3806_v37  ;;  %v591_v46 = vpop.f32.mrf.mxu2  ;;  %863 = vmatmul.f32.vlgmr.msrb.gmra.mxu1 %v5307_v26  ;;  %v3850_v37 = vld [vmem:[%s8331_s4 + $0x5b8] sm:$0xff] }
  0xc1   : > { %v5346_v57 = vmax.f32 %v506_v42, %v591_v46  ;;  %997 = vmatpush.msra.mxu1 %v3822_v54  ;;  %v3833_v42 = vld [vmem:[%s8331_s4 + $0x530] sm:$0xff]  ;;  %v3831_v54 = vld [vmem:[%s8331_s4 + $0x520] sm:$0xff] }
  0xc2   : > { %978 = vmatpush.msra.mxu0 %v3805_v44  ;;  %v3811_v44 = vld [vmem:[%s8331_s4 + $0x480] sm:$0xff]  ;;  %v3849_v46 = vld [vmem:[%s8331_s4 + $0x5b0] sm:$0xff] }
  0xc3   : > { %738 = vmatmul.f32.vlgmr.msra.gmra.mxu2 %v5346_v57  ;;  %998 = vmatpush.msra.mxu1 %v3821_v55  ;;  %v3830_v55 = vld [vmem:[%s8331_s4 + $0x518] sm:$0xff] }
  0xc4   : > { %1013 = vmatpush.msra.mxu2 %v3842_v53  ;;  %979 = vmatpush.msra.mxu0 %v3804_v58  ;;  %v3848_v53 = vld [vmem:[%s8331_s4 + $0x5a8] sm:$0xff]  ;;  %v3874_v58 = vld [vmem:[%s8331_s4 + $0x678] sm:$0xff] }
  0xc5   : > { %v611_v63 = vpop.f32.mrf.mxu3  ;;  %999 = vmatpush.msra.mxu1 %v3820_v59  ;;  %v3890_v59 = vld [vmem:[%s8331_s4 + $0x6f8] sm:$0xff] }
  0xc6   : > { %v5370_v2 = vmax.f32 %v526_v52, %v611_v63  ;;  %1014 = vmatpush.msra.mxu2 %v3841_v60  ;;  %980 = vmatpush.msra.mxu0 %v3803_v61  ;;  %v3795_v52 = vld [vmem:[%s8331_s4 + $0x400] sm:$0xff]  ;;  %v3829_v60 = vld [vmem:[%s8331_s4 + $0x510] sm:$0xff] }
  0xc7   : > { %1000 = vmatpush.msra.mxu1 %v3819_v62  ;;  %v3847_v61 = vld [vmem:[%s8331_s4 + $0x5a0] sm:$0xff]  ;;  %v3873_v62 = vld [vmem:[%s8331_s4 + $0x670] sm:$0xff] }
  0xc8   : > { %758 = vmatmul.f32.vlgmr.msra.gmra.mxu3 %v5370_v2  ;;  %1015 = vmatpush.msra.mxu2 %v3840_v0  ;;  %v3889_v63 = vld [vmem:[%s8331_s4 + $0x6f0] sm:$0xff]  ;;  %v3828_v0 = vld [vmem:[%s8331_s4 + $0x508] sm:$0xff] }
  0xc9   : > { %1033 = vmatpush.msra.mxu3 %v3858_v4  ;;  %981 = vmatpush.msra.mxu0 %v3802_v5  ;;  %v3846_v4 = vld [vmem:[%s8331_s4 + $0x598] sm:$0xff]  ;;  %v3872_v5 = vld [vmem:[%s8331_s4 + $0x668] sm:$0xff] }
  0xca   : > { %1016 = vmatpush.msra.mxu2 %v3839_v6  ;;  %1001 = vmatpush.msra.mxu1 %v3818_v7  ;;  %v3888_v6 = vld [vmem:[%s8331_s4 + $0x6e8] sm:$0xff]  ;;  %v3827_v7 = vld [vmem:[%s8331_s4 + $0x500] sm:$0xff] }
  0xcb   : > { %1034 = vmatpush.msra.mxu3 %v3857_v9  ;;  %883 = vmatmul.f32.vlgmr.msrb.gmra.mxu2 %v5346_v57  ;;  %v3845_v9 = vld [vmem:[%s8331_s4 + $0x590] sm:$0xff] }
  0xcc   : > { %1017 = vmatpush.msra.mxu2 %v3838_v11  ;;  %982 = vmatpush.msra.mxu0 %v3801_v12  ;;  %v3871_v11 = vld [vmem:[%s8331_s4 + $0x660] sm:$0xff] }
  0xcd   : > { %1035 = vmatpush.msra.mxu3 %v3856_v13  ;;  %1002 = vmatpush.msra.mxu1 %v3817_v14  ;;  %v3887_v12 = vld [vmem:[%s8331_s4 + $0x6e0] sm:$0xff]  ;;  %v3844_v13 = vld [vmem:[%s8331_s4 + $0x588] sm:$0xff]  ;;  %v3906_v14 = vld [vmem:[%s8331_s4 + $0x778] sm:$0xff] }
  0xce   : > { %1018 = vmatpush.msra.mxu2 %v3837_v16  ;;  %983 = vmatpush.msra.mxu0 %v3800_v17  ;;  %v3870_v16 = vld [vmem:[%s8331_s4 + $0x658] sm:$0xff] }
  0xcf   : > { %1036 = vmatpush.msra.mxu3 %v3855_v18  ;;  %1003 = vmatpush.msra.mxu1 %v3816_v21  ;;  %v3886_v17 = vld [vmem:[%s8331_s4 + $0x6d8] sm:$0xff]  ;;  %v3843_v18 = vld [vmem:[%s8331_s4 + $0x580] sm:$0xff]  ;;  %v3905_v21 = vld [vmem:[%s8331_s4 + $0x770] sm:$0xff] }
  0xd0   : > { %903 = vmatmul.f32.vlgmr.msrb.gmra.mxu3 %v5370_v2  ;;  %1019 = vmatpush.msra.mxu2 %v3836_v24  ;;  %v3869_v24 = vld [vmem:[%s8331_s4 + $0x650] sm:$0xff] }
  0xd1   : > { %1037 = vmatpush.msra.mxu3 %v3854_v25  ;;  %984 = vmatpush.msra.mxu0 %v3799_v1  ;;  %v3922_v25 = vld [vmem:[%s8331_s4 + $0x7f8] sm:$0xff]  ;;  %v3885_v1 = vld [vmem:[%s8331_s4 + $0x6d0] sm:$0xff] }
  0xd2   : > { %1020 = vmatpush.msra.mxu2 %v3835_v28  ;;  %1004 = vmatpush.msra.mxu1 %v3815_v10  ;;  %v3904_v28 = vld [vmem:[%s8331_s4 + $0x768] sm:$0xff] }
  0xd3   : > { %1038 = vmatpush.msra.mxu3 %v3853_v20  ;;  %985 = vmatpush.msra.mxu0 %v3798_v30  ;;  %v3868_v10 = vld [vmem:[%s8331_s4 + $0x648] sm:$0xff]  ;;  %v3921_v20 = vld [vmem:[%s8331_s4 + $0x7f0] sm:$0xff] }
  0xd4   : > { %1021 = vmatpush.msra.mxu2 %v3834_v34  ;;  %1005 = vmatpush.msra.mxu1 %v3814_v35  ;;  %v3884_v30 = vld [vmem:[%s8331_s4 + $0x6c8] sm:$0xff]  ;;  %v3903_v34 = vld [vmem:[%s8331_s4 + $0x760] sm:$0xff] }
  0xd5   : > { %1039 = vmatpush.msra.mxu3 %v3852_v29  ;;  %986 = vmatpush.msra.mxu0 %v3797_v40  ;;  %v3867_v35 = vld [vmem:[%s8331_s4 + $0x640] sm:$0xff]  ;;  %v3920_v29 = vld [vmem:[%s8331_s4 + $0x7e8] sm:$0xff] }
  0xd6   : > { %1022 = vmatpush.msra.mxu2 %v3833_v42  ;;  %1006 = vmatpush.msra.mxu1 %v3813_v43  ;;  %v3883_v40 = vld [vmem:[%s8331_s4 + $0x6c0] sm:$0xff]  ;;  %v3902_v42 = vld [vmem:[%s8331_s4 + $0x758] sm:$0xff] }
  0xd7   : > { %1040 = vmatpush.msra.mxu3 %v3851_v36  ;;  %987 = vmatpush.msra.mxu0 %v3796_v48  ;;  %v3866_v43 = vld [vmem:[%s8331_s4 + $0x638] sm:$0xff]  ;;  %v3919_v36 = vld [vmem:[%s8331_s4 + $0x7e0] sm:$0xff] }
  0xd8   : > { %1023 = vmatpush.msra.mxu2 %v3832_v49  ;;  %1007 = vmatpush.msra.mxu1 %v3812_v50  ;;  %v3882_v48 = vld [vmem:[%s8331_s4 + $0x6b8] sm:$0xff]  ;;  %v3901_v49 = vld [vmem:[%s8331_s4 + $0x750] sm:$0xff] }
  0xd9   : > { %1041 = vmatpush.msra.mxu3 %v3850_v37  ;;  %988 = vmatpush.msra.mxu0 %v3795_v52  ;;  %v3865_v50 = vld [vmem:[%s8331_s4 + $0x630] sm:$0xff]  ;;  %v5608_v37 = vstv %s5549_s27  ;;  %v5611_v52 = vstv %s5554_s7  ;;  %s6415_s27 = sld [smem:[#allocation6 + $0x101]] }
  0xda   : > { %1024 = vmatpush.msra.mxu2 %v3831_v54  ;;  %1008 = vmatpush.msra.mxu1 %v3811_v44  ;;  %v3918_v54 = vld [vmem:[%s8331_s4 + $0x7d8] sm:$0xff]  ;;  %v3881_v44 = vld [vmem:[%s8331_s4 + $0x6b0] sm:$0xff] }
  0xdb   : > { %1042 = vmatpush.msra.mxu3 %v3849_v46  ;;  %989 = vmatmul.f32.vlgmr.msra.gmra.mxu0 %v5302_v31  ;;  %v3900_v46 = vld [vmem:[%s8331_s4 + $0x748] sm:$0xff] }
  0xdc   : > { %1025 = vmatpush.msra.mxu2 %v3830_v55  ;;  %1009 = vmatmul.f32.vlgmr.msra.gmra.mxu1 %v5307_v26  ;;  %v3864_v55 = vld [vmem:[%s8331_s4 + $0x628] sm:$0xff] }
  0xdd   : > { %1043 = vmatpush.msra.mxu3 %v3848_v53  ;;  %1119 = vmatpush.msrb.mxu0 %v3874_v58  ;;  %v3917_v53 = vld [vmem:[%s8331_s4 + $0x7d0] sm:$0xff]  ;;  %v3880_v58 = vld [vmem:[%s8331_s4 + $0x6a8] sm:$0xff] }
  0xde   : > { %1139 = vmatpush.msrb.mxu1 %v3890_v59  ;;  %1026 = vmatpush.msra.mxu2 %v3829_v60  ;;  %v1203_v59 = vmul.f32 %v5608_v37, %v4806_v19  ;;  %v1209_v60 = vmul.f32 %v5611_v52, %v4821_v33 }
  0xdf   : > { %1044 = vmatpush.msra.mxu3 %v3847_v61  ;;  %1120 = vmatpush.msrb.mxu0 %v3873_v62  ;;  %v3899_v61 = vld [vmem:[%s8331_s4 + $0x740] sm:$0xff] }
  0xe0   : > { %1140 = vmatpush.msrb.mxu1 %v3889_v63  ;;  %1027 = vmatpush.msra.mxu2 %v3828_v0  ;;  %v3863_v62 = vld [vmem:[%s8331_s4 + $0x620] sm:$0xff]  ;;  %v5644_v63 = vstv %s5581_s28  ;;  %v1204_v0 = vmul.f32 %v5608_v37, %v4814_v27 }
  0xe1   : > { %1045 = vmatpush.msra.mxu3 %v3846_v4  ;;  %1121 = vmatpush.msrb.mxu0 %v3872_v5  ;;  %v1210_v4 = vmul.f32 %v5611_v52, %v4829_v38  ;;  %v3916_v5 = vld [vmem:[%s8331_s4 + $0x7c8] sm:$0xff] }
  0xe2   : > { %1141 = vmatpush.msrb.mxu1 %v3888_v6  ;;  %1028 = vmatpush.msra.mxu2 %v3827_v7  ;;  %v3879_v6 = vld [vmem:[%s8331_s4 + $0x6a0] sm:$0xff]  ;;  %v3898_v7 = vld [vmem:[%s8331_s4 + $0x738] sm:$0xff] }
  0xe3   : > { %1046 = vmatpush.msra.mxu3 %v3845_v9  ;;  %1029 = vmatmul.f32.vlgmr.msra.gmra.mxu2 %v5346_v57  ;;  %v3862_v9 = vld [vmem:[%s8331_s4 + $0x618] sm:$0xff] }
  0xe4   : > { %1122 = vmatpush.msrb.mxu0 %v3871_v11  ;;  %1142 = vmatpush.msrb.mxu1 %v3887_v12  ;;  %v3915_v11 = vld [vmem:[%s8331_s4 + $0x7c0] sm:$0xff]  ;;  %v3878_v12 = vld [vmem:[%s8331_s4 + $0x698] sm:$0xff] }
  0xe5   : > { %1047 = vmatpush.msra.mxu3 %v3844_v13  ;;  %1159 = vmatpush.msrb.mxu2 %v3906_v14  ;;  %v1213_v13 = vadd.f32 %v1209_v60, %v1203_v59  ;;  %v1219_v14 = vmul.f32 %v5644_v63, %v4832_v41 }
  0xe6   : > { %1123 = vmatpush.msrb.mxu0 %v3870_v16  ;;  %1143 = vmatpush.msrb.mxu1 %v3886_v17  ;;  %v3897_v16 = vld [vmem:[%s8331_s4 + $0x730] sm:$0xff] }
  0xe7   : > { %1048 = vmatpush.msra.mxu3 %v3843_v18  ;;  %1160 = vmatpush.msrb.mxu2 %v3905_v21  ;;  %v3861_v17 = vld [vmem:[%s8331_s4 + $0x610] sm:$0xff]  ;;  %v1228_v18 = vstv %s5613_s26  ;;  %v1214_v21 = vadd.f32 %v1210_v4, %v1204_v0  ;;  %s6469_s26 = sld [smem:[#allocation6 + $0x103]] }
  0xe8   : > { %1049 = vmatmul.f32.vlgmr.msra.gmra.mxu3 %v5370_v2  ;;  %1124 = vmatpush.msrb.mxu0 %v3869_v24  ;;  %v1220_v24 = vmul.f32 %v5644_v63, %v4842_v47  ;;  %v1231_v4 = vmul.f32 %v1228_v18, %v4881_v23 }
  0xe9   : > { %1179 = vmatpush.msrb.mxu3 %v3922_v25  ;;  %1144 = vmatpush.msrb.mxu1 %v3885_v1  ;;  %v3914_v25 = vld [vmem:[%s8331_s4 + $0x7b8] sm:$0xff]  ;;  %v3877_v1 = vld [vmem:[%s8331_s4 + $0x690] sm:$0xff] }
  0xea   : > { %1161 = vmatpush.msrb.mxu2 %v3904_v28  ;;  %1125 = vmatpush.msrb.mxu0 %v3868_v10  ;;  %v1205_v28 = vmul.f32 %v5608_v37, %v4819_v32  ;;  %v1211_v10 = vmul.f32 %v5611_v52, %v4869_v8 }
  0xeb   : > { %1180 = vmatpush.msrb.mxu3 %v3921_v20  ;;  %1145 = vmatpush.msrb.mxu1 %v3884_v30  ;;  %v3896_v20 = vld [vmem:[%s8331_s4 + $0x728] sm:$0xff] }
  0xec   : > { %1162 = vmatpush.msrb.mxu2 %v3903_v34  ;;  %1126 = vmatpush.msrb.mxu0 %v3867_v35  ;;  %v3860_v30 = vld [vmem:[%s8331_s4 + $0x608] sm:$0xff]  ;;  %v3913_v34 = vld [vmem:[%s8331_s4 + $0x7b0] sm:$0xff] }
  0xed   : > { %1181 = vmatpush.msrb.mxu3 %v3920_v29  ;;  %1146 = vmatpush.msrb.mxu1 %v3883_v40  ;;  %v3876_v35 = vld [vmem:[%s8331_s4 + $0x688] sm:$0xff]  ;;  %v1223_v29 = vadd.f32 %v1219_v14, %v1213_v13  ;;  %v1229_v40 = vmul.f32 %v1228_v18, %v4847_v51  ;;  %v3931_v14 = vld [vmem:[%s8332_s5 + $0x4] sm:$0xf] }
  0xee   : > { %1163 = vmatpush.msrb.mxu2 %v3902_v42  ;;  %1127 = vmatpush.msrb.mxu0 %v3866_v43  ;;  %v1230_v42 = vmul.f32 %v1228_v18, %v4854_v56  ;;  %v3895_v43 = vld [vmem:[%s8331_s4 + $0x720] sm:$0xff] }
  0xef   : > { %1182 = vmatpush.msrb.mxu3 %v3919_v36  ;;  %1147 = vmatpush.msrb.mxu1 %v3882_v48  ;;  %v3859_v36 = vld [vmem:[%s8331_s4 + $0x600] sm:$0xff]  ;;  %v1224_v48 = vadd.f32 %v1220_v24, %v1214_v21  ;;  %v1438_v21 = vld [vmem:[%s8331_s4 + $0xe8] sm:$0xff] }
  0xf0   : > { %1164 = vmatpush.msrb.mxu2 %v3901_v49  ;;  %1128 = vmatpush.msrb.mxu0 %v3865_v50  ;;  %v1206_v49 = vmul.f32 %v5608_v37, %v4894_v39  ;;  %v1212_v50 = vmul.f32 %v5611_v52, %v4897_v3  ;;  %v3894_v37 = vld [vmem:[%s8331_s4 + $0x718] sm:$0xff]  ;;  %v3911_v52 = vld [vmem:[%s8331_s4 + $0x7a0] sm:$0xff] }
  0xf1   : > { %1183 = vmatpush.msrb.mxu3 %v3918_v54  ;;  %1148 = vmatpush.msrb.mxu1 %v3881_v44  ;;  %v3912_v54 = vld [vmem:[%s8331_s4 + $0x7a8] sm:$0xff]  ;;  %v3875_v44 = vld [vmem:[%s8331_s4 + $0x680] sm:$0xff]  ;;  %v1234_v59 = vadd.f32 %v1230_v42, %v1224_v48 }
  0xf2   : > { %1165 = vmatpush.msrb.mxu2 %v3900_v46  ;;  %1129 = vmatpush.msrb.mxu0 %v3864_v55  ;;  %v1215_v46 = vadd.f32 %v1211_v10, %v1205_v28  ;;  %v1221_v55 = vmul.f32 %v5644_v63, %v4879_v22  ;;  %v1216_v60 = vadd.f32 %v1212_v50, %v1206_v49  ;;  %v1421_v24 = vld [vmem:[%s8331_s4 + $0x60] sm:$0xff]  ;;  %v1436_v28 = vld [vmem:[%s8331_s4 + $0xd8] sm:$0xff]  ;;  %v1434_v42 = vld [vmem:[%s8331_s4 + $0xc8] sm:$0xff] }
  0xf3   : > { %1184 = vmatpush.msrb.mxu3 %v3917_v53  ;;  %1149 = vmatpush.msrb.mxu1 %v3880_v58  ;;  %v1233_v53 = vadd.f32 %v1229_v40, %v1223_v29  ;;  %v3893_v58 = vld [vmem:[%s8331_s4 + $0x710] sm:$0xff]  ;;  %v1456_v10 = vld [vmem:[%s8331_s4 + $0x178] sm:$0xff]  ;;  %v1418_v40 = vld [vmem:[%s8331_s4 + $0x48] sm:$0xff] }
  0xf4   : > { %1166 = vmatpush.msrb.mxu2 %v3899_v61  ;;  %1130 = vmatpush.msrb.mxu0 %v3863_v62  ;;  %v1222_v61 = vmul.f32 %v5644_v63, %v4899_v15  ;;  %v3910_v62 = vld [vmem:[%s8331_s4 + $0x798] sm:$0xff]  ;;  %v1225_v0 = vadd.f32 %v1221_v55, %v1215_v46  ;;  %v3909_v63 = vld [vmem:[%s8331_s4 + $0x790] sm:$0xff]  ;;  %v1453_v48 = vld [vmem:[%s8331_s4 + $0x160] sm:$0xff] }
  0xf5   : > { %1185 = vmatpush.msrb.mxu3 %v3916_v5  ;;  %1150 = vmatpush.msrb.mxu1 %v3879_v6  ;;  %v3892_v5 = vld [vmem:[%s8331_s4 + $0x708] sm:$0xff]  ;;  %v1471_v29 = vld [vmem:[%s8331_s4 + $0x1f0] sm:$0xff]  ;;  %v1417_v49 = vld [vmem:[%s8331_s4 + $0x40] sm:$0xff] }
  0xf6   : > { %1167 = vmatpush.msrb.mxu2 %v3898_v7  ;;  %1131 = vmatpush.msrb.mxu0 %v3862_v9  ;;  %v1226_v6 = vadd.f32 %v1222_v61, %v1216_v60  ;;  %v1232_v7 = vmul.f32 %v1228_v18, %v4911_v45  ;;  %v1235_v9 = vadd.f32 %v1231_v4, %v1225_v0  ;;  %v1422_v18 = vld [vmem:[%s8331_s4 + $0x68] sm:$0xff]  ;;  %v1433_v50 = vld [vmem:[%s8331_s4 + $0xc0] sm:$0xff]  ;;  %v1416_v46 = vld [vmem:[%s8331_s4 + $0x38] sm:$0xff] }
  0xf7   : > { %1186 = vmatpush.msrb.mxu3 %v3915_v11  ;;  %1151 = vmatpush.msrb.mxu1 %v3878_v12  ;;  %v1237_v11 = vld [vmem:[%s8332_s5] sm:$0xf]  ;;  %v1432_v55 = vld [vmem:[%s8331_s4 + $0xb8] sm:$0xff]  ;;  %v1414_v60 = vld [vmem:[%s8331_s4 + $0x28] sm:$0xff] }
  0xf8   : > { %1168 = vmatpush.msrb.mxu2 %v3897_v16  ;;  %1132 = vmatpush.msrb.mxu0 %v3861_v17  ;;  %v3907_v12 = vld [vmem:[%s8331_s4 + $0x780] sm:$0xff]  ;;  %v1236_v13 = vadd.f32 %v1232_v7, %v1226_v6  ;;  %v1423_v16 = vld [vmem:[%s8331_s4 + $0x70] sm:$0xff]  ;;  %v1430_v61 = vld [vmem:[%s8331_s4 + $0xa8] sm:$0xff] }
  0xf9   : > { %1187 = vmatpush.msrb.mxu3 %v3914_v25  ;;  %1152 = vmatpush.msrb.mxu1 %v3877_v1  ;;  %v1439_v17 = vld [vmem:[%s8331_s4 + $0xf0] sm:$0xff]  ;;  %v1437_v25 = vld [vmem:[%s8331_s4 + $0xe0] sm:$0xff]  ;;  %v1420_v1 = vld [vmem:[%s8331_s4 + $0x58] sm:$0xff] }
  0xfa   : > { %1169 = vmatpush.msrb.mxu2 %v3896_v20  ;;  %1133 = vmatpush.msrb.mxu0 %v3860_v30  ;;  %v1419_v20 = vld [vmem:[%s8331_s4 + $0x50] sm:$0xff]  ;;  %v1429_v0 = vld [vmem:[%s8331_s4 + $0xa0] sm:$0xff]  ;;  %v1412_v4 = vld [vmem:[%s8331_s4 + $0x18] sm:$0xff] }
  0xfb   : > { %1188 = vmatpush.msrb.mxu3 %v3913_v34  ;;  %1153 = vmatpush.msrb.mxu1 %v3876_v35  ;;  %v1435_v30 = vld [vmem:[%s8331_s4 + $0xd0] sm:$0xff]  ;;  %v1472_v34 = vld [vmem:[%s8331_s4 + $0x1f8] sm:$0xff] }
  0xfc   : > { %1170 = vmatpush.msrb.mxu2 %v3895_v43  ;;  %1134 = vmatpush.msrb.mxu0 %v3859_v36  ;;  %v1455_v35 = vld [vmem:[%s8331_s4 + $0x170] sm:$0xff]  ;;  %v1454_v43 = vld [vmem:[%s8331_s4 + $0x168] sm:$0xff] }
  0xfd   : > { %1189 = vmatpush.msrb.mxu3 %v3912_v54  ;;  %1154 = vmatpush.msrb.mxu1 %v3875_v44  ;;  %v1470_v36 = vld [vmem:[%s8331_s4 + $0x1e8] sm:$0xff]  ;;  %v1469_v54 = vld [vmem:[%s8331_s4 + $0x1e0] sm:$0xff]  ;;  %v1452_v44 = vld [vmem:[%s8331_s4 + $0x158] sm:$0xff] }
  0xfe   : > { %1171 = vmatpush.msrb.mxu2 %v3894_v37  ;;  %1135 = vmatmul.f32.vlgmr.msrb.gmra.mxu0 %v5302_v31  ;;  %v3891_v31 = vld [vmem:[%s8331_s4 + $0x700] sm:$0xff]  ;;  %v1468_v37 = vld [vmem:[%s8331_s4 + $0x1d8] sm:$0xff]  ;;  %v1411_v6 = vld [vmem:[%s8331_s4 + $0x10] sm:$0xff] }
  0xff   : > { %1190 = vmatpush.msrb.mxu3 %v3911_v52  ;;  %1155 = vmatmul.f32.vlgmr.msrb.gmra.mxu1 %v5307_v26  ;;  %v3908_v26 = vld [vmem:[%s8331_s4 + $0x788] sm:$0xff]  ;;  %v1451_v52 = vld [vmem:[%s8331_s4 + $0x150] sm:$0xff] }
 0x100   : > { %1172 = vmatpush.msrb.mxu2 %v3893_v58  ;;  %1256 = vmatpush.msra.mxu0 %v1233_v53  ;;  %v1431_v58 = vld [vmem:[%s8331_s4 + $0xb0] sm:$0xff] }
 0x101   : > { %1191 = vmatpush.msrb.mxu3 %v3910_v62  ;;  %1276 = vmatpush.msra.mxu1 %v1234_v59  ;;  %v1413_v62 = vld [vmem:[%s8331_s4 + $0x20] sm:$0xff]  ;;  %v1427_v7 = vld [vmem:[%s8331_s4 + $0x90] sm:$0xff] }
 0x102   : > { %1173 = vmatpush.msrb.mxu2 %v3892_v5  ;;  %1340 = vmatpush.msrb.mxu0 %v1233_v53  ;;  %v1415_v53 = vld [vmem:[%s8331_s4 + $0x30] sm:$0xff]  ;;  %v1428_v5 = vld [vmem:[%s8331_s4 + $0x98] sm:$0xff] }
 0x103   : > { %1192 = vmatpush.msrb.mxu3 %v3909_v63  ;;  %1360 = vmatpush.msrb.mxu1 %v1234_v59  ;;  %v1467_v59 = vld [vmem:[%s8331_s4 + $0x1d0] sm:$0xff]  ;;  %v1450_v63 = vld [vmem:[%s8331_s4 + $0x148] sm:$0xff] }
 0x104   : > { %1174 = vmatpush.msrb.mxu2 %v3891_v31  ;;  %v1466_v31 = vld [vmem:[%s8331_s4 + $0x1c8] sm:$0xff] }
 0x105   : > { %1193 = vmatpush.msrb.mxu3 %v3908_v26  ;;  %1175 = vmatmul.f32.vlgmr.msrb.gmra.mxu2 %v5346_v57  ;;  %v1424_v57 = vld [vmem:[%s8331_s4 + $0x78] sm:$0xff]  ;;  %v1449_v26 = vld [vmem:[%s8331_s4 + $0x140] sm:$0xff] }
 0x106   : > { %3927 = vmatmul.msk.f32.vlgmr.msra.gmra.mxu0 %vm445_vm0, %v1237_v11  ;;  %1296 = vmatpush.msra.mxu2 %v1235_v9 }
 0x107   : > { %1194 = vmatpush.msrb.mxu3 %v3907_v12  ;;  %3928 = vmatmul.msk.f32.vlgmr.msra.gmra.mxu1 %vm445_vm0, %v1237_v11  ;;  %v1426_v12 = vld [vmem:[%s8331_s4 + $0x88] sm:$0xff] }
 0x108   : > { %1195 = vmatmul.f32.vlgmr.msrb.gmra.mxu3 %v5370_v2  ;;  %1380 = vmatpush.msrb.mxu2 %v1235_v9  ;;  %v1440_v2 = vld [vmem:[%s8331_s4 + $0xf8] sm:$0xff]  ;;  %v1465_v9 = vld [vmem:[%s8331_s4 + $0x1c0] sm:$0xff] }
 0x109   : > { %1316 = vmatpush.msra.mxu3 %v1236_v13  ;;  %1473 = vmatpush.msra.mxu0 %v1424_v57  ;;  %v1409_v57 = vld [vmem:[%s8331_s4] sm:$0xff] }
 0x10a   : > { %1493 = vmatpush.msra.mxu1 %v1440_v2  ;;  %v1425_v2 = vld [vmem:[%s8331_s4 + $0x80] sm:$0xff] }
 0x10b   : > { %1400 = vmatpush.msrb.mxu3 %v1236_v13  ;;  %1474 = vmatpush.msra.mxu0 %v1423_v16  ;;  %v1448_v13 = vld [vmem:[%s8331_s4 + $0x138] sm:$0xff]  ;;  %v1447_v16 = vld [vmem:[%s8331_s4 + $0x130] sm:$0xff] }
 0x10c   : > { %1494 = vmatpush.msra.mxu1 %v1439_v17  ;;  %v1463_v17 = vld [vmem:[%s8331_s4 + $0x1b0] sm:$0xff] }
 0x10d   : > { %3929 = vmatmul.msk.f32.vlgmr.msra.gmra.mxu2 %vm445_vm0, %v1237_v11  ;;  %1475 = vmatpush.msra.mxu0 %v1422_v18  ;;  %v3951_v18 = vld [vmem:[%s8331_s4 + $0x278] sm:$0xff] }
 0x10e   : > { %3932 = vmatmul.msk.f32.vlgmr.msrb.gmra.mxu0 %vm445_vm0, %v3931_v14  ;;  %1495 = vmatpush.msra.mxu1 %v1438_v21  ;;  %v3967_v21 = vld [vmem:[%s8331_s4 + $0x2f8] sm:$0xff] }
 0x10f   : > { %3933 = vmatmul.msk.f32.vlgmr.msrb.gmra.mxu1 %vm445_vm0, %v3931_v14  ;;  %1476 = vmatpush.msra.mxu0 %v1421_v24  ;;  %v1446_v24 = vld [vmem:[%s8331_s4 + $0x128] sm:$0xff] }
 0x110   : > { %3930 = vmatmul.msk.f32.vlgmr.msra.gmra.mxu3 %vm445_vm0, %v1237_v11  ;;  %1496 = vmatpush.msra.mxu1 %v1437_v25  ;;  %v1410_v11 = vld [vmem:[%s8331_s4 + $0x8] sm:$0xff] }
 0x111   : > { %1513 = vmatpush.msra.mxu2 %v1456_v10  ;;  %1477 = vmatpush.msra.mxu0 %v1420_v1  ;;  %v1462_v25 = vld [vmem:[%s8331_s4 + $0x1a8] sm:$0xff]  ;;  %v3950_v1 = vld [vmem:[%s8331_s4 + $0x270] sm:$0xff]  ;;  %v1445_v10 = vld [vmem:[%s8331_s4 + $0x120] sm:$0xff] }
 0x112   : > { %1497 = vmatpush.msra.mxu1 %v1436_v28  ;;  %1533 = vmatpush.msra.mxu3 %v1472_v34  ;;  %v3966_v28 = vld [vmem:[%s8331_s4 + $0x2f0] sm:$0xff]  ;;  %v3965_v34 = vld [vmem:[%s8331_s4 + $0x2e8] sm:$0xff] }
 0x113   : > { %1514 = vmatpush.msra.mxu2 %v1455_v35  ;;  %1478 = vmatpush.msra.mxu0 %v1419_v20  ;;  %v1461_v20 = vld [vmem:[%s8331_s4 + $0x1a0] sm:$0xff]  ;;  %v1444_v35 = vld [vmem:[%s8331_s4 + $0x118] sm:$0xff] }
 0x114   : > { %1498 = vmatpush.msra.mxu1 %v1435_v30  ;;  %1534 = vmatpush.msra.mxu3 %v1471_v29  ;;  %v3949_v30 = vld [vmem:[%s8331_s4 + $0x268] sm:$0xff]  ;;  %v1460_v29 = vld [vmem:[%s8331_s4 + $0x198] sm:$0xff] }
 0x115   : > { %3934 = vmatmul.msk.f32.vlgmr.msrb.gmra.mxu2 %vm445_vm0, %v3931_v14  ;;  %1479 = vmatpush.msra.mxu0 %v1418_v40  ;;  %v3948_v40 = vld [vmem:[%s8331_s4 + $0x260] sm:$0xff] }
 0x116   : > { %1515 = vmatpush.msra.mxu2 %v1454_v43  ;;  %1499 = vmatpush.msra.mxu1 %v1434_v42  ;;  %v3964_v42 = vld [vmem:[%s8331_s4 + $0x2e0] sm:$0xff]  ;;  %v1443_v43 = vld [vmem:[%s8331_s4 + $0x110] sm:$0xff] }
 0x117   : > { %1535 = vmatpush.msra.mxu3 %v1470_v36  ;;  %1480 = vmatpush.msra.mxu0 %v1417_v49  ;;  %v1459_v36 = vld [vmem:[%s8331_s4 + $0x190] sm:$0xff]  ;;  %v3963_v49 = vld [vmem:[%s8331_s4 + $0x2d8] sm:$0xff] }
 0x118   : > { %3935 = vmatmul.msk.f32.vlgmr.msrb.gmra.mxu3 %vm445_vm0, %v3931_v14  ;;  %1516 = vmatpush.msra.mxu2 %v1453_v48  ;;  %v1464_v14 = vld [vmem:[%s8331_s4 + $0x1b8] sm:$0xff] }
 0x119   : > { %1500 = vmatpush.msra.mxu1 %v1433_v50  ;;  %1536 = vmatpush.msra.mxu3 %v1469_v54  ;;  %v3947_v48 = vld [vmem:[%s8331_s4 + $0x258] sm:$0xff]  ;;  %v1442_v50 = vld [vmem:[%s8331_s4 + $0x108] sm:$0xff] }
 0x11a   : > { %1517 = vmatpush.msra.mxu2 %v1452_v44  ;;  %1481 = vmatpush.msra.mxu0 %v1416_v46  ;;  %v1458_v54 = vld [vmem:[%s8331_s4 + $0x188] sm:$0xff]  ;;  %v3946_v44 = vld [vmem:[%s8331_s4 + $0x250] sm:$0xff] }
 0x11b   : > { %1501 = vmatpush.msra.mxu1 %v1432_v55  ;;  %1537 = vmatpush.msra.mxu3 %v1468_v37  ;;  %v3962_v46 = vld [vmem:[%s8331_s4 + $0x2d0] sm:$0xff]  ;;  %v1441_v55 = vld [vmem:[%s8331_s4 + $0x100] sm:$0xff] }
 0x11c   : > { %1518 = vmatpush.msra.mxu2 %v1451_v52  ;;  %1482 = vmatpush.msra.mxu0 %v1415_v53  ;;  %v1457_v37 = vld [vmem:[%s8331_s4 + $0x180] sm:$0xff]  ;;  %v3945_v52 = vld [vmem:[%s8331_s4 + $0x248] sm:$0xff] }
 0x11d   : > { %1502 = vmatpush.msra.mxu1 %v1431_v58  ;;  %1538 = vmatpush.msra.mxu3 %v1467_v59  ;;  %v3961_v53 = vld [vmem:[%s8331_s4 + $0x2c8] sm:$0xff]  ;;  %v3983_v58 = vld [vmem:[%s8331_s4 + $0x378] sm:$0xff] }
 0x11e   : > { %1483 = vmatpush.msra.mxu0 %v1414_v60  ;;  %1519 = vmatpush.msra.mxu2 %v1450_v63  ;;  %v3999_v59 = vld [vmem:[%s8331_s4 + $0x3f8] sm:$0xff]  ;;  %v3944_v60 = vld [vmem:[%s8331_s4 + $0x240] sm:$0xff] }
 0x11f   : > { %1503 = vmatpush.msra.mxu1 %v1430_v61  ;;  %1539 = vmatpush.msra.mxu3 %v1466_v31  ;;  %v3960_v61 = vld [vmem:[%s8331_s4 + $0x2c0] sm:$0xff]  ;;  %v3959_v63 = vld [vmem:[%s8331_s4 + $0x2b8] sm:$0xff] }
 0x120   : > { %1484 = vmatpush.msra.mxu0 %v1413_v62  ;;  %1520 = vmatpush.msra.mxu2 %v1449_v26  ;;  %v3982_v62 = vld [vmem:[%s8331_s4 + $0x370] sm:$0xff] }
 0x121   : > { %1504 = vmatpush.msra.mxu1 %v1429_v0  ;;  %1540 = vmatpush.msra.mxu3 %v1465_v9  ;;  %v3998_v0 = vld [vmem:[%s8331_s4 + $0x3f0] sm:$0xff] }
 0x122   : > { %1485 = vmatpush.msra.mxu0 %v1412_v4  ;;  %1521 = vmatpush.msra.mxu2 %v1448_v13  ;;  %v3942_v26 = vld [vmem:[%s8331_s4 + $0x230] sm:$0xff]  ;;  %v3941_v13 = vld [vmem:[%s8331_s4 + $0x228] sm:$0xff] }
 0x123   : > { %1505 = vmatpush.msra.mxu1 %v1428_v5  ;;  %1541 = vmatpush.msra.mxu3 %v1464_v14  ;;  %v3943_v5 = vld [vmem:[%s8331_s4 + $0x238] sm:$0xff]  ;;  %v3958_v9 = vld [vmem:[%s8331_s4 + $0x2b0] sm:$0xff]  ;;  %v3957_v14 = vld [vmem:[%s8331_s4 + $0x2a8] sm:$0xff] }
 0x124   : > { %1486 = vmatpush.msra.mxu0 %v1411_v6  ;;  %1522 = vmatpush.msra.mxu2 %v1447_v16  ;;  %v3981_v6 = vld [vmem:[%s8331_s4 + $0x368] sm:$0xff]  ;;  %v3940_v16 = vld [vmem:[%s8331_s4 + $0x220] sm:$0xff] }
 0x125   : > { %1506 = vmatpush.msra.mxu1 %v1427_v7  ;;  %1542 = vmatpush.msra.mxu3 %v1463_v17  ;;  %v3997_v7 = vld [vmem:[%s8331_s4 + $0x3e8] sm:$0xff]  ;;  %v3956_v17 = vld [vmem:[%s8331_s4 + $0x2a0] sm:$0xff] }
 0x126   : > { %1487 = vmatpush.msra.mxu0 %v1410_v11  ;;  %1523 = vmatpush.msra.mxu2 %v1446_v24  ;;  %v3980_v11 = vld [vmem:[%s8331_s4 + $0x360] sm:$0xff]  ;;  %v3939_v24 = vld [vmem:[%s8331_s4 + $0x218] sm:$0xff] }
 0x127   : > { %1507 = vmatpush.msra.mxu1 %v1426_v12  ;;  %1543 = vmatpush.msra.mxu3 %v1462_v25  ;;  %v3996_v12 = vld [vmem:[%s8331_s4 + $0x3e0] sm:$0xff]  ;;  %v3955_v25 = vld [vmem:[%s8331_s4 + $0x298] sm:$0xff] }
 0x128   : > { %1488 = vmatpush.msra.mxu0 %v1409_v57  ;;  %1524 = vmatpush.msra.mxu2 %v1445_v10  ;;  %v3979_v57 = vld [vmem:[%s8331_s4 + $0x358] sm:$0xff]  ;;  %v3993_v10 = vld [vmem:[%s8331_s4 + $0x3c8] sm:$0xff] }
 0x129   : > { %1508 = vmatpush.msra.mxu1 %v1425_v2  ;;  %1544 = vmatpush.msra.mxu3 %v1461_v20  ;;  %v3995_v2 = vld [vmem:[%s8331_s4 + $0x3d8] sm:$0xff] }
 0x12a   : > { %1617 = vmatpush.msrb.mxu0 %v3951_v18  ;;  %1525 = vmatpush.msra.mxu2 %v1444_v35  ;;  %v3978_v18 = vld [vmem:[%s8331_s4 + $0x350] sm:$0xff]  ;;  %v3976_v35 = vld [vmem:[%s8331_s4 + $0x340] sm:$0xff] }
 0x12b   : > { %1637 = vmatpush.msrb.mxu1 %v3967_v21  ;;  %1545 = vmatpush.msra.mxu3 %v1460_v29  ;;  %v3994_v21 = vld [vmem:[%s8331_s4 + $0x3d0] sm:$0xff]  ;;  %v3992_v29 = vld [vmem:[%s8331_s4 + $0x3c0] sm:$0xff] }
 0x12c   : > { %1618 = vmatpush.msrb.mxu0 %v3950_v1  ;;  %1526 = vmatpush.msra.mxu2 %v1443_v43  ;;  %v3977_v1 = vld [vmem:[%s8331_s4 + $0x348] sm:$0xff] }
 0x12d   : > { %1638 = vmatpush.msrb.mxu1 %v3966_v28  ;;  %1546 = vmatpush.msra.mxu3 %v1459_v36  ;;  %v3953_v43 = vld [vmem:[%s8331_s4 + $0x288] sm:$0xff]  ;;  %v3975_v36 = vld [vmem:[%s8331_s4 + $0x338] sm:$0xff] }
 0x12e   : > { %1619 = vmatpush.msrb.mxu0 %v3949_v30  ;;  %1527 = vmatpush.msra.mxu2 %v1442_v50  ;;  %v3938_v30 = vld [vmem:[%s8331_s4 + $0x210] sm:$0xff]  ;;  %v3952_v50 = vld [vmem:[%s8331_s4 + $0x280] sm:$0xff] }
 0x12f   : > { %1639 = vmatpush.msrb.mxu1 %v3965_v34  ;;  %1547 = vmatpush.msra.mxu3 %v1458_v54  ;;  %v3954_v34 = vld [vmem:[%s8331_s4 + $0x290] sm:$0xff] }
 0x130   : > { %1620 = vmatpush.msrb.mxu0 %v3948_v40  ;;  %1528 = vmatpush.msra.mxu2 %v1441_v55  ;;  %v3974_v54 = vld [vmem:[%s8331_s4 + $0x330] sm:$0xff]  ;;  %v3973_v55 = vld [vmem:[%s8331_s4 + $0x328] sm:$0xff] }
 0x131   : > { %1640 = vmatpush.msrb.mxu1 %v3964_v42  ;;  %1548 = vmatpush.msra.mxu3 %v1457_v37  ;;  %v3937_v42 = vld [vmem:[%s8331_s4 + $0x208] sm:$0xff] }
 0x132   : > { %1621 = vmatpush.msrb.mxu0 %v3947_v48  ;;  %1657 = vmatpush.msrb.mxu2 %v3983_v58  ;;  %v3991_v48 = vld [vmem:[%s8331_s4 + $0x3b8] sm:$0xff]  ;;  %v3989_v37 = vld [vmem:[%s8331_s4 + $0x3a8] sm:$0xff]  ;;  %v3972_v58 = vld [vmem:[%s8331_s4 + $0x320] sm:$0xff] }
 0x133   : > { %1641 = vmatpush.msrb.mxu1 %v3963_v49  ;;  %1677 = vmatpush.msrb.mxu3 %v3999_v59  ;;  %v3936_v49 = vld [vmem:[%s8331_s4 + $0x200] sm:$0xff] }
 0x134   : > { %1622 = vmatpush.msrb.mxu0 %v3946_v44  ;;  %v6022_v4 = vpop.f32.mrf.mxu0  ;;  %1658 = vmatpush.msrb.mxu2 %v3982_v62  ;;  %v3988_v59 = vld [vmem:[%s8331_s4 + $0x3a0] sm:$0xff] }
 0x135   : > { %1642 = vmatpush.msrb.mxu1 %v3962_v46  ;;  %v6030_v31 = vpop.f32.mrf.mxu1  ;;  %1678 = vmatpush.msrb.mxu3 %v3998_v0  ;;  %v3990_v46 = vld [vmem:[%s8331_s4 + $0x3b0] sm:$0xff] }
 0x136   : > { %1623 = vmatpush.msrb.mxu0 %v3945_v52  ;;  %1659 = vmatpush.msrb.mxu2 %v3981_v6  ;;  %v3970_v0 = vld [vmem:[%s8331_s4 + $0x310] sm:$0xff]  ;;  %v3985_v6 = vld [vmem:[%s8331_s4 + $0x388] sm:$0xff] }
 0x137   : > { %1643 = vmatpush.msrb.mxu1 %v3961_v53  ;;  %1679 = vmatpush.msrb.mxu3 %v3997_v7 }
 0x138   : > { %1624 = vmatpush.msrb.mxu0 %v3944_v60  ;;  %1660 = vmatpush.msrb.mxu2 %v3980_v11  ;;  %v3971_v60 = vld [vmem:[%s8331_s4 + $0x318] sm:$0xff]  ;;  %v3968_v11 = vld [vmem:[%s8331_s4 + $0x300] sm:$0xff] }
 0x139   : > { %1644 = vmatpush.msrb.mxu1 %v3960_v61  ;;  %1680 = vmatpush.msrb.mxu3 %v3996_v12  ;;  %v3987_v61 = vld [vmem:[%s8331_s4 + $0x398] sm:$0xff]  ;;  %v3984_v12 = vld [vmem:[%s8331_s4 + $0x380] sm:$0xff] }
 0x13a   : > { %1625 = vmatpush.msrb.mxu0 %v3943_v5  ;;  %1661 = vmatpush.msrb.mxu2 %v3979_v57  ;;  %v3986_v5 = vld [vmem:[%s8331_s4 + $0x390] sm:$0xff] }
 0x13b   : > { %1645 = vmatpush.msrb.mxu1 %v3959_v63  ;;  %1681 = vmatpush.msrb.mxu3 %v3995_v2  ;;  %v3969_v63 = vld [vmem:[%s8331_s4 + $0x308] sm:$0xff] }
 0x13c   : > { %1626 = vmatpush.msrb.mxu0 %v3942_v26  ;;  %v6083_v28 = vpop.f32.mrf.mxu0  ;;  %1662 = vmatpush.msrb.mxu2 %v3978_v18 }
 0x13d   : > { %1646 = vmatpush.msrb.mxu1 %v3958_v9  ;;  %1682 = vmatpush.msrb.mxu3 %v3994_v21  ;;  %v864_v20 = vpop.f32.mrf.mxu1 }
 0x13e   : > { %1627 = vmatpush.msrb.mxu0 %v3941_v13  ;;  %1663 = vmatpush.msrb.mxu2 %v3977_v1  ;;  %v865_v13 = vadd.f32 %v864_v20, %v6083_v28 }
 0x13f   : > { %1647 = vmatpush.msrb.mxu1 %v3957_v14  ;;  %1683 = vmatpush.msrb.mxu3 %v3993_v10  ;;  %v720_v14 = vadd.f32 %v6030_v31, %v6022_v4 }
 0x140   : > { %1628 = vmatpush.msrb.mxu0 %v3940_v16  ;;  %1664 = vmatpush.msrb.mxu2 %v3976_v35 }
 0x141   : > { %1648 = vmatpush.msrb.mxu1 %v3956_v17  ;;  %1684 = vmatpush.msrb.mxu3 %v3992_v29 }
 0x142   : > { %1629 = vmatpush.msrb.mxu0 %v3939_v24  ;;  %1665 = vmatpush.msrb.mxu2 %v3975_v36 }
 0x143   : > { %1649 = vmatpush.msrb.mxu1 %v3955_v25  ;;  %1685 = vmatpush.msrb.mxu3 %v3991_v48 }
 0x144   : > { %1630 = vmatpush.msrb.mxu0 %v3938_v30  ;;  %1666 = vmatpush.msrb.mxu2 %v3974_v54  ;;  %v4014_v54 = vld [vmem:[%s8331_s4 + $0x470] sm:$0xff] }
 0x145   : > { %1650 = vmatpush.msrb.mxu1 %v3954_v34  ;;  %1686 = vmatpush.msrb.mxu3 %v3990_v46 }
 0x146   : > { %v739_v40 = vpop.f32.mrf.mxu2  ;;  %1631 = vmatpush.msrb.mxu0 %v3937_v42  ;;  %1667 = vmatpush.msrb.mxu2 %v3973_v55  ;;  %v4013_v55 = vld [vmem:[%s8331_s4 + $0x468] sm:$0xff] }
 0x147   : > { %1651 = vmatpush.msrb.mxu1 %v3953_v43  ;;  %1687 = vmatpush.msrb.mxu3 %v3989_v37  ;;  %v740_v21 = vadd.f32 %v739_v40, %v720_v14  ;;  %v4015_v40 = vld [vmem:[%s8331_s4 + $0x478] sm:$0xff]  ;;  %v4029_v37 = vld [vmem:[%s8331_s4 + $0x4e8] sm:$0xff]  ;;  %v4046_v14 = vld [vmem:[%s8331_s4 + $0x570] sm:$0xff] }
 0x148   : > { %1632 = vmatpush.msrb.mxu0 %v3936_v49  ;;  %1668 = vmatpush.msrb.mxu2 %v3972_v58  ;;  %v4031_v49 = vld [vmem:[%s8331_s4 + $0x4f8] sm:$0xff]  ;;  %v4028_v58 = vld [vmem:[%s8331_s4 + $0x4e0] sm:$0xff] }
 0x149   : > { %1652 = vmatpush.msrb.mxu1 %v3952_v50  ;;  %1688 = vmatpush.msrb.mxu3 %v3988_v59  ;;  %v4011_v59 = vld [vmem:[%s8331_s4 + $0x458] sm:$0xff] }
 0x14a   : > { %1669 = vmatpush.msrb.mxu2 %v3971_v60  ;;  %v4027_v60 = vld [vmem:[%s8331_s4 + $0x4d8] sm:$0xff] }
 0x14b   : > { %v759_v44 = vpop.f32.mrf.mxu3  ;;  %1689 = vmatpush.msrb.mxu3 %v3987_v61  ;;  %v4010_v61 = vld [vmem:[%s8331_s4 + $0x450] sm:$0xff] }
 0x14c   : > { %1670 = vmatpush.msrb.mxu2 %v3970_v0  ;;  %v760_v30 = vadd.f32 %v759_v44, %v740_v21  ;;  %v4030_v44 = vld [vmem:[%s8331_s4 + $0x4f0] sm:$0xff] }
 0x14d   : > { %1690 = vmatpush.msrb.mxu3 %v3986_v5  ;;  %v4009_v5 = vld [vmem:[%s8331_s4 + $0x448] sm:$0xff]  ;;  %v4022_v21 = vld [vmem:[%s8331_s4 + $0x4b0] sm:$0xff] }
 0x14e   : > { %v884_v62 = vpop.f32.mrf.mxu2  ;;  %1671 = vmatpush.msrb.mxu2 %v3969_v63 }
 0x14f   : > { %1691 = vmatpush.msrb.mxu3 %v3985_v6  ;;  %v885_v2 = vadd.f32 %v884_v62, %v865_v13  ;;  %v4026_v62 = vld [vmem:[%s8331_s4 + $0x4d0] sm:$0xff]  ;;  %v4025_v6 = vld [vmem:[%s8331_s4 + $0x4c8] sm:$0xff]  ;;  %v4063_v13 = vld [vmem:[%s8331_s4 + $0x5f8] sm:$0xff] }
 0x150   : > { %1672 = vmatpush.msrb.mxu2 %v3968_v11  ;;  %v4024_v11 = vld [vmem:[%s8331_s4 + $0x4c0] sm:$0xff] }
 0x151   : > { %1692 = vmatpush.msrb.mxu3 %v3984_v12 }
 0x153   : > { %v904_v7 = vpop.f32.mrf.mxu3 }
 0x154   : > { %v905_v1 = vadd.f32 %v904_v7, %v885_v2  ;;  %v4047_v7 = vld [vmem:[%s8331_s4 + $0x578] sm:$0xff] }
 0x155   : > { %v4023_v2 = vld [vmem:[%s8331_s4 + $0x4b8] sm:$0xff] }
 0x156   : > { %v907_v20 = vmax.f32 %v760_v30, %v905_v1  ;;  %v4005_v1 = vld [vmem:[%s8331_s4 + $0x428] sm:$0xff] }
 0x157   : > { %v4021_v30 = vld [vmem:[%s8331_s4 + $0x4a8] sm:$0xff] }
 0x158   : > { %v990_v52 = vpop.f32.mrf.mxu0 }
 0x159   : > { %v1010_v53 = vpop.f32.mrf.mxu1 }
 0x15a   : > { %v1011_v16 = vadd.f32 %v1010_v53, %v990_v52  ;;  %v4012_v52 = vld [vmem:[%s8331_s4 + $0x460] sm:$0xff] }
 0x166   : > { %v1030_v57 = vpop.f32.mrf.mxu2 }
 0x167   : > { %v1031_v24 = vadd.f32 %v1030_v57, %v1011_v16  ;;  %v4007_v57 = vld [vmem:[%s8331_s4 + $0x438] sm:$0xff]  ;;  %v4062_v16 = vld [vmem:[%s8331_s4 + $0x5f0] sm:$0xff] }
 0x16b   : > { %v1050_v17 = vpop.f32.mrf.mxu3 }
 0x16c   : > { %v1051_v34 = vadd.f32 %v1050_v17, %v1031_v24  ;;  %v4045_v17 = vld [vmem:[%s8331_s4 + $0x568] sm:$0xff] }
 0x16d   : > { %v4061_v24 = vld [vmem:[%s8331_s4 + $0x5e8] sm:$0xff] }
 0x16e   : > { %v1053_v4 = vmax.f32 %v907_v20, %v1051_v34  ;;  %v4043_v34 = vld [vmem:[%s8331_s4 + $0x558] sm:$0xff]  ;;  %v4020_v20 = vld [vmem:[%s8331_s4 + $0x4a0] sm:$0xff] }
 0x17b   : > { %v1136_v26 = vpop.f32.mrf.mxu0 }
 0x17c   : > { %v1156_v9 = vpop.f32.mrf.mxu1 }
 0x17d   : > { %v1157_v10 = vadd.f32 %v1156_v9, %v1136_v26  ;;  %v4008_v26 = vld [vmem:[%s8331_s4 + $0x440] sm:$0xff] }
 0x183   : > { %v1258_v18 = vpop.f32.mrf.mxu0 }
 0x184   : > { %v1278_v25 = vpop.f32.mrf.mxu1 }
 0x188   : > { %v1176_v35 = vpop.f32.mrf.mxu2 }
 0x189   : > { %v1177_v28 = vadd.f32 %v1176_v35, %v1157_v10  ;;  %v4060_v10 = vld [vmem:[%s8331_s4 + $0x5e0] sm:$0xff]  ;;  %v4059_v35 = vld [vmem:[%s8331_s4 + $0x5d8] sm:$0xff] }
 0x18b   : > { %v1196_v29 = vpop.f32.mrf.mxu3  ;;  %v1342_v42 = vpop.f32.mrf.mxu0 }
 0x18c   : > { %v1197_v31 = vadd.f32 %v1196_v29, %v1177_v28  ;;  %v6164_v43 = vmax.f32 %v1258_v18, %v1342_v42  ;;  %v1362_v36 = vpop.f32.mrf.mxu1  ;;  %v4006_v18 = vld [vmem:[%s8331_s4 + $0x430] sm:$0xff]  ;;  %v4004_v28 = vld [vmem:[%s8331_s4 + $0x420] sm:$0xff] }
 0x18d   : > { %v6174_v48 = vmax.f32 %v1278_v25, %v1362_v36  ;;  %v4044_v25 = vld [vmem:[%s8331_s4 + $0x560] sm:$0xff]  ;;  %v4042_v29 = vld [vmem:[%s8331_s4 + $0x550] sm:$0xff]  ;;  %v4041_v36 = vld [vmem:[%s8331_s4 + $0x548] sm:$0xff] }
 0x18e   : > { %v1199_v50 = vmax.f32 %v1053_v4, %v1197_v31  ;;  %1489 = vmatmul.f32.vlgmr.msra.gmra.mxu0 %v6164_v43  ;;  %v4058_v42 = vld [vmem:[%s8331_s4 + $0x5d0] sm:$0xff]  ;;  %v4003_v4 = vld [vmem:[%s8331_s4 + $0x418] sm:$0xff] }
 0x18f   : > { %1509 = vmatmul.f32.vlgmr.msra.gmra.mxu1 %v6174_v48  ;;  %1762 = vmatpush.msra.mxu0 %v4015_v40  ;;  %v4019_v31 = vld [vmem:[%s8331_s4 + $0x498] sm:$0xff]  ;;  %v4057_v40 = vld [vmem:[%s8331_s4 + $0x5c8] sm:$0xff] }
 0x190   : > { %1200 = vst [vmem:[%s6172_s24] sm:$0xf] %v1199_v50  ;;  %1782 = vmatpush.msra.mxu1 %v4031_v49  ;;  %v1298_v46 = vpop.f32.mrf.mxu2  ;;  %v4002_v49 = vld [vmem:[%s8331_s4 + $0x410] sm:$0xff] }
 0x191   : > { %1763 = vmatpush.msra.mxu0 %v4014_v54  ;;  %v4018_v50 = vld [vmem:[%s8331_s4 + $0x490] sm:$0xff]  ;;  %v4040_v54 = vld [vmem:[%s8331_s4 + $0x540] sm:$0xff] }
 0x192   : > { %1783 = vmatpush.msra.mxu1 %v4030_v44  ;;  %v4056_v44 = vld [vmem:[%s8331_s4 + $0x5c0] sm:$0xff] }
 0x193   : > { %v1318_v53 = vpop.f32.mrf.mxu3  ;;  %1764 = vmatpush.msra.mxu0 %v4013_v55  ;;  %v4017_v55 = vld [vmem:[%s8331_s4 + $0x488] sm:$0xff] }
 0x194   : > { %1784 = vmatpush.msra.mxu1 %v4029_v37  ;;  %v4039_v37 = vld [vmem:[%s8331_s4 + $0x538] sm:$0xff] }
 0x195   : > { %1765 = vmatpush.msra.mxu0 %v4012_v52  ;;  %v4055_v52 = vld [vmem:[%s8331_s4 + $0x5b8] sm:$0xff] }
 0x196   : > { %1785 = vmatpush.msra.mxu1 %v4028_v58  ;;  %1633 = vmatmul.f32.vlgmr.msrb.gmra.mxu0 %v6164_v43  ;;  %v4016_v58 = vld [vmem:[%s8331_s4 + $0x480] sm:$0xff] }
 0x197   : > { %1766 = vmatpush.msra.mxu0 %v4011_v59  ;;  %1653 = vmatmul.f32.vlgmr.msrb.gmra.mxu1 %v6174_v48  ;;  %v4038_v59 = vld [vmem:[%s8331_s4 + $0x530] sm:$0xff] }
 0x198   : > { %1786 = vmatpush.msra.mxu1 %v4027_v60  ;;  %v1382_v0 = vpop.f32.mrf.mxu2  ;;  %v4054_v60 = vld [vmem:[%s8331_s4 + $0x5b0] sm:$0xff] }
 0x199   : > { %v6217_v63 = vmax.f32 %v1298_v46, %v1382_v0  ;;  %1767 = vmatpush.msra.mxu0 %v4010_v61  ;;  %v4001_v46 = vld [vmem:[%s8331_s4 + $0x408] sm:$0xff]  ;;  %v4079_v61 = vld [vmem:[%s8331_s4 + $0x678] sm:$0xff] }
 0x19a   : > { %1787 = vmatpush.msra.mxu1 %v4026_v62  ;;  %v4095_v62 = vld [vmem:[%s8331_s4 + $0x6f8] sm:$0xff]  ;;  %v4037_v0 = vld [vmem:[%s8331_s4 + $0x528] sm:$0xff] }
 0x19b   : > { %v1402_v9 = vpop.f32.mrf.mxu3  ;;  %1529 = vmatmul.f32.vlgmr.msra.gmra.mxu2 %v6217_v63  ;;  %1768 = vmatpush.msra.mxu0 %v4009_v5  ;;  %v4053_v5 = vld [vmem:[%s8331_s4 + $0x5a8] sm:$0xff] }
 0x19c   : > { %v6232_v12 = vmax.f32 %v1318_v53, %v1402_v9  ;;  %1788 = vmatpush.msra.mxu1 %v4025_v6  ;;  %1802 = vmatpush.msra.mxu2 %v4047_v7  ;;  %v4000_v53 = vld [vmem:[%s8331_s4 + $0x400] sm:$0xff]  ;;  %v4078_v6 = vld [vmem:[%s8331_s4 + $0x670] sm:$0xff] }
 0x19d   : > { %1769 = vmatpush.msra.mxu0 %v4008_v26  ;;  %v4094_v7 = vld [vmem:[%s8331_s4 + $0x6f0] sm:$0xff]  ;;  %v4036_v26 = vld [vmem:[%s8331_s4 + $0x520] sm:$0xff] }
 0x19e   : > { %1549 = vmatmul.f32.vlgmr.msra.gmra.mxu3 %v6232_v12  ;;  %1789 = vmatpush.msra.mxu1 %v4024_v11  ;;  %v4052_v9 = vld [vmem:[%s8331_s4 + $0x5a0] sm:$0xff]  ;;  %v4077_v11 = vld [vmem:[%s8331_s4 + $0x668] sm:$0xff] }
 0x19f   : > { %1822 = vmatpush.msra.mxu3 %v4063_v13  ;;  %1803 = vmatpush.msra.mxu2 %v4046_v14  ;;  %v4093_v13 = vld [vmem:[%s8331_s4 + $0x6e8] sm:$0xff]  ;;  %v4035_v14 = vld [vmem:[%s8331_s4 + $0x518] sm:$0xff] }
 0x1a0   : > { %1770 = vmatpush.msra.mxu0 %v4007_v57  ;;  %1790 = vmatpush.msra.mxu1 %v4023_v2  ;;  %v4051_v57 = vld [vmem:[%s8331_s4 + $0x598] sm:$0xff]  ;;  %v4076_v2 = vld [vmem:[%s8331_s4 + $0x660] sm:$0xff] }
 0x1a1   : > { %1823 = vmatpush.msra.mxu3 %v4062_v16  ;;  %1804 = vmatpush.msra.mxu2 %v4045_v17  ;;  %v4092_v16 = vld [vmem:[%s8331_s4 + $0x6e0] sm:$0xff]  ;;  %v4034_v17 = vld [vmem:[%s8331_s4 + $0x510] sm:$0xff] }
 0x1a2   : > { %1771 = vmatpush.msra.mxu0 %v4006_v18  ;;  %1791 = vmatpush.msra.mxu1 %v4022_v21  ;;  %v4050_v18 = vld [vmem:[%s8331_s4 + $0x590] sm:$0xff]  ;;  %v4075_v21 = vld [vmem:[%s8331_s4 + $0x658] sm:$0xff] }
 0x1a3   : > { %1824 = vmatpush.msra.mxu3 %v4061_v24  ;;  %1805 = vmatpush.msra.mxu2 %v4044_v25  ;;  %v4091_v24 = vld [vmem:[%s8331_s4 + $0x6d8] sm:$0xff]  ;;  %v4033_v25 = vld [vmem:[%s8331_s4 + $0x508] sm:$0xff] }
 0x1a4   : > { %1673 = vmatmul.f32.vlgmr.msrb.gmra.mxu2 %v6217_v63  ;;  %1772 = vmatpush.msra.mxu0 %v4005_v1  ;;  %v4049_v1 = vld [vmem:[%s8331_s4 + $0x588] sm:$0xff] }
 0x1a5   : > { %1825 = vmatpush.msra.mxu3 %v4060_v10  ;;  %1792 = vmatpush.msra.mxu1 %v4021_v30  ;;  %v4074_v10 = vld [vmem:[%s8331_s4 + $0x650] sm:$0xff] }
 0x1a6   : > { %1693 = vmatmul.f32.vlgmr.msrb.gmra.mxu3 %v6232_v12  ;;  %1806 = vmatpush.msra.mxu2 %v4043_v34  ;;  %v4090_v30 = vld [vmem:[%s8331_s4 + $0x6d0] sm:$0xff]  ;;  %v4032_v34 = vld [vmem:[%s8331_s4 + $0x500] sm:$0xff] }
 0x1a7   : > { %1826 = vmatpush.msra.mxu3 %v4059_v35  ;;  %1773 = vmatpush.msra.mxu0 %v4004_v28  ;;  %v4048_v35 = vld [vmem:[%s8331_s4 + $0x580] sm:$0xff]  ;;  %v4073_v28 = vld [vmem:[%s8331_s4 + $0x648] sm:$0xff] }
 0x1a8   : > { %1793 = vmatpush.msra.mxu1 %v4020_v20  ;;  %1807 = vmatpush.msra.mxu2 %v4042_v29  ;;  %v4089_v20 = vld [vmem:[%s8331_s4 + $0x6c8] sm:$0xff]  ;;  %v4111_v29 = vld [vmem:[%s8331_s4 + $0x778] sm:$0xff] }
 0x1a9   : > { %1827 = vmatpush.msra.mxu3 %v4058_v42  ;;  %1774 = vmatpush.msra.mxu0 %v4003_v4  ;;  %v4127_v42 = vld [vmem:[%s8331_s4 + $0x7f8] sm:$0xff]  ;;  %v4072_v4 = vld [vmem:[%s8331_s4 + $0x640] sm:$0xff] }
 0x1aa   : > { %1794 = vmatpush.msra.mxu1 %v4019_v31  ;;  %1808 = vmatpush.msra.mxu2 %v4041_v36  ;;  %v4088_v31 = vld [vmem:[%s8331_s4 + $0x6c0] sm:$0xff]  ;;  %v4110_v36 = vld [vmem:[%s8331_s4 + $0x770] sm:$0xff] }
 0x1ab   : > { %1828 = vmatpush.msra.mxu3 %v4057_v40  ;;  %1775 = vmatpush.msra.mxu0 %v4002_v49  ;;  %v4126_v40 = vld [vmem:[%s8331_s4 + $0x7f0] sm:$0xff]  ;;  %v4071_v49 = vld [vmem:[%s8331_s4 + $0x638] sm:$0xff] }
 0x1ac   : > { %1795 = vmatpush.msra.mxu1 %v4018_v50  ;;  %1809 = vmatpush.msra.mxu2 %v4040_v54  ;;  %v4087_v50 = vld [vmem:[%s8331_s4 + $0x6b8] sm:$0xff]  ;;  %v4109_v54 = vld [vmem:[%s8331_s4 + $0x768] sm:$0xff] }
 0x1ad   : > { %1829 = vmatpush.msra.mxu3 %v4056_v44  ;;  %1776 = vmatpush.msra.mxu0 %v4001_v46  ;;  %v4125_v44 = vld [vmem:[%s8331_s4 + $0x7e8] sm:$0xff]  ;;  %v4070_v46 = vld [vmem:[%s8331_s4 + $0x630] sm:$0xff] }
 0x1ae   : > { %1796 = vmatpush.msra.mxu1 %v4017_v55  ;;  %1810 = vmatpush.msra.mxu2 %v4039_v37  ;;  %v6464_v55 = vstv %s6407_s8  ;;  %v6467_v37 = vstv %s6415_s27 }
 0x1af   : > { %1830 = vmatpush.msra.mxu3 %v4055_v52  ;;  %1777 = vmatpush.msra.mxu0 %v4000_v53  ;;  %v4086_v52 = vld [vmem:[%s8331_s4 + $0x6b0] sm:$0xff]  ;;  %v4108_v53 = vld [vmem:[%s8331_s4 + $0x760] sm:$0xff] }
 0x1b0   : > { %1797 = vmatpush.msra.mxu1 %v4016_v58  ;;  %1811 = vmatpush.msra.mxu2 %v4038_v59  ;;  %v4124_v58 = vld [vmem:[%s8331_s4 + $0x7e0] sm:$0xff]  ;;  %v4069_v59 = vld [vmem:[%s8331_s4 + $0x628] sm:$0xff] }
 0x1b1   : > { %1831 = vmatpush.msra.mxu3 %v4054_v60  ;;  %1778 = vmatmul.f32.vlgmr.msra.gmra.mxu0 %v6164_v43  ;;  %v4085_v60 = vld [vmem:[%s8331_s4 + $0x6a8] sm:$0xff] }
 0x1b2   : > { %1798 = vmatmul.f32.vlgmr.msra.gmra.mxu1 %v6174_v48  ;;  %1907 = vmatpush.msrb.mxu0 %v4079_v61  ;;  %v4107_v61 = vld [vmem:[%s8331_s4 + $0x758] sm:$0xff] }
 0x1b3   : > { %1927 = vmatpush.msrb.mxu1 %v4095_v62  ;;  %1812 = vmatpush.msra.mxu2 %v4037_v0  ;;  %v1992_v62 = vmul.f32 %v6464_v55, %v4806_v19  ;;  %v1998_v0 = vmul.f32 %v6467_v37, %v4821_v33 }
 0x1b4   : > { %1832 = vmatpush.msra.mxu3 %v4053_v5  ;;  %1908 = vmatpush.msrb.mxu0 %v4078_v6  ;;  %v4123_v5 = vld [vmem:[%s8331_s4 + $0x7d8] sm:$0xff]  ;;  %v4068_v6 = vld [vmem:[%s8331_s4 + $0x620] sm:$0xff] }
 0x1b5   : > { %1928 = vmatpush.msrb.mxu1 %v4094_v7  ;;  %1813 = vmatpush.msra.mxu2 %v4036_v26  ;;  %v6500_v7 = vstv %s6436_s25  ;;  %v1993_v26 = vmul.f32 %v6464_v55, %v4814_v27 }
 0x1b6   : > { %1833 = vmatpush.msra.mxu3 %v4052_v9  ;;  %1909 = vmatpush.msrb.mxu0 %v4077_v11  ;;  %v1999_v9 = vmul.f32 %v6467_v37, %v4829_v38  ;;  %v4084_v11 = vld [vmem:[%s8331_s4 + $0x6a0] sm:$0xff] }
 0x1b7   : > { %1929 = vmatpush.msrb.mxu1 %v4093_v13  ;;  %1814 = vmatpush.msra.mxu2 %v4035_v14  ;;  %v4106_v13 = vld [vmem:[%s8331_s4 + $0x750] sm:$0xff] }
 0x1b8   : > { %1834 = vmatpush.msra.mxu3 %v4051_v57  ;;  %1910 = vmatpush.msrb.mxu0 %v4076_v2  ;;  %v4122_v14 = vld [vmem:[%s8331_s4 + $0x7d0] sm:$0xff]  ;;  %v4067_v57 = vld [vmem:[%s8331_s4 + $0x618] sm:$0xff] }
 0x1b9   : > { %1930 = vmatpush.msrb.mxu1 %v4092_v16  ;;  %1815 = vmatpush.msra.mxu2 %v4034_v17  ;;  %v4083_v2 = vld [vmem:[%s8331_s4 + $0x698] sm:$0xff]  ;;  %v4105_v16 = vld [vmem:[%s8331_s4 + $0x748] sm:$0xff]  ;;  %v2002_v17 = vadd.f32 %v1998_v0, %v1992_v62  ;;  %v4100_v0 = vld [vmem:[%s8331_s4 + $0x720] sm:$0xff] }
 0x1ba   : > { %1835 = vmatpush.msra.mxu3 %v4050_v18  ;;  %1911 = vmatpush.msrb.mxu0 %v4075_v21  ;;  %v2008_v18 = vmul.f32 %v6500_v7, %v4832_v41  ;;  %v4121_v21 = vld [vmem:[%s8331_s4 + $0x7c8] sm:$0xff] }
 0x1bb   : > { %1931 = vmatpush.msrb.mxu1 %v4091_v24  ;;  %1816 = vmatpush.msra.mxu2 %v4033_v25  ;;  %v4066_v24 = vld [vmem:[%s8331_s4 + $0x610] sm:$0xff]  ;;  %v6533_v25 = vstv %s6469_s26 }
 0x1bc   : > { %1836 = vmatpush.msra.mxu3 %v4049_v1  ;;  %1912 = vmatpush.msrb.mxu0 %v4074_v10  ;;  %v2003_v1 = vadd.f32 %v1999_v9, %v1993_v26  ;;  %v2009_v10 = vmul.f32 %v6500_v7, %v4842_v47  ;;  %v2011_v26 = vmul.f32 %v6500_v7, %v4899_v15  ;;  %v4098_v9 = vld [vmem:[%s8331_s4 + $0x710] sm:$0xff] }
 0x1bd   : > { %1932 = vmatpush.msrb.mxu1 %v4090_v30  ;;  %1817 = vmatpush.msra.mxu2 %v4032_v34  ;;  %v4082_v30 = vld [vmem:[%s8331_s4 + $0x690] sm:$0xff]  ;;  %v4104_v34 = vld [vmem:[%s8331_s4 + $0x740] sm:$0xff] }
 0x1be   : > { %1837 = vmatpush.msra.mxu3 %v4048_v35  ;;  %1818 = vmatmul.f32.vlgmr.msra.gmra.mxu2 %v6217_v63  ;;  %v4120_v35 = vld [vmem:[%s8331_s4 + $0x7c0] sm:$0xff] }
 0x1bf   : > { %1838 = vmatmul.f32.vlgmr.msra.gmra.mxu3 %v6232_v12  ;;  %1913 = vmatpush.msrb.mxu0 %v4073_v28  ;;  %v4065_v28 = vld [vmem:[%s8331_s4 + $0x608] sm:$0xff] }
 0x1c0   : > { %1933 = vmatpush.msrb.mxu1 %v4089_v20  ;;  %1947 = vmatpush.msrb.mxu2 %v4111_v29  ;;  %v4081_v20 = vld [vmem:[%s8331_s4 + $0x688] sm:$0xff]  ;;  %v4103_v29 = vld [vmem:[%s8331_s4 + $0x738] sm:$0xff] }
 0x1c1   : > { %1967 = vmatpush.msrb.mxu3 %v4127_v42  ;;  %1914 = vmatpush.msrb.mxu0 %v4072_v4  ;;  %v2012_v42 = vadd.f32 %v2008_v18, %v2002_v17  ;;  %v2018_v4 = vmul.f32 %v6533_v25, %v4847_v51  ;;  %v4113_v17 = vld [vmem:[%s8331_s4 + $0x788] sm:$0xff]  ;;  %v4096_v18 = vld [vmem:[%s8331_s4 + $0x700] sm:$0xff] }
 0x1c2   : > { %1934 = vmatpush.msrb.mxu1 %v4088_v31  ;;  %1948 = vmatpush.msrb.mxu2 %v4110_v36  ;;  %v4119_v31 = vld [vmem:[%s8331_s4 + $0x7b8] sm:$0xff]  ;;  %v4064_v36 = vld [vmem:[%s8331_s4 + $0x600] sm:$0xff] }
 0x1c3   : > { %1968 = vmatpush.msrb.mxu3 %v4126_v40  ;;  %1915 = vmatpush.msrb.mxu0 %v4071_v49  ;;  %v2013_v40 = vadd.f32 %v2009_v10, %v2003_v1  ;;  %v2019_v49 = vmul.f32 %v6533_v25, %v4854_v56  ;;  %v4137_v1 = vld [vmem:[%s8332_s5 + $0x4] sm:$0xf]  ;;  %v2212_v10 = vld [vmem:[%s8331_s4 + $0x70] sm:$0xff] }
 0x1c4   : > { %1935 = vmatpush.msrb.mxu1 %v4087_v50  ;;  %1949 = vmatpush.msrb.mxu2 %v4109_v54  ;;  %v4080_v50 = vld [vmem:[%s8331_s4 + $0x680] sm:$0xff]  ;;  %v4102_v54 = vld [vmem:[%s8331_s4 + $0x730] sm:$0xff] }
 0x1c5   : > { %1969 = vmatpush.msrb.mxu3 %v4125_v44  ;;  %1916 = vmatpush.msrb.mxu0 %v4070_v46  ;;  %v4118_v44 = vld [vmem:[%s8331_s4 + $0x7b0] sm:$0xff]  ;;  %v1994_v46 = vmul.f32 %v6464_v55, %v4819_v32  ;;  %v2023_v62 = vadd.f32 %v2019_v49, %v2013_v40  ;;  %v2223_v40 = vld [vmem:[%s8331_s4 + $0xc8] sm:$0xff]  ;;  %v2206_v49 = vld [vmem:[%s8331_s4 + $0x40] sm:$0xff] }
 0x1c6   : > { %1936 = vmatpush.msrb.mxu1 %v4086_v52  ;;  %1950 = vmatpush.msrb.mxu2 %v4108_v53  ;;  %v2000_v52 = vmul.f32 %v6467_v37, %v4869_v8  ;;  %v4101_v53 = vld [vmem:[%s8331_s4 + $0x728] sm:$0xff] }
 0x1c7   : > { %1970 = vmatpush.msrb.mxu3 %v4124_v58  ;;  %1917 = vmatpush.msrb.mxu0 %v4069_v59  ;;  %v2022_v58 = vadd.f32 %v2018_v4, %v2012_v42  ;;  %v1995_v59 = vmul.f32 %v6464_v55, %v4894_v39  ;;  %v4116_v55 = vld [vmem:[%s8331_s4 + $0x7a0] sm:$0xff]  ;;  %v2225_v42 = vld [vmem:[%s8331_s4 + $0xd8] sm:$0xff]  ;;  %v2208_v4 = vld [vmem:[%s8331_s4 + $0x50] sm:$0xff] }
 0x1c8   : > { %1937 = vmatpush.msrb.mxu1 %v4085_v60  ;;  %1951 = vmatpush.msrb.mxu2 %v4107_v61  ;;  %v2001_v60 = vmul.f32 %v6467_v37, %v4897_v3  ;;  %v4117_v61 = vld [vmem:[%s8331_s4 + $0x7a8] sm:$0xff]  ;;  %v2004_v37 = vadd.f32 %v2000_v52, %v1994_v46  ;;  %v2245_v46 = vld [vmem:[%s8331_s4 + $0x178] sm:$0xff]  ;;  %v2204_v52 = vld [vmem:[%s8331_s4 + $0x30] sm:$0xff] }
 0x1c9   : > { %1971 = vmatpush.msrb.mxu3 %v4123_v5  ;;  %1918 = vmatpush.msrb.mxu0 %v4068_v6  ;;  %v2010_v5 = vmul.f32 %v6500_v7, %v4879_v22  ;;  %v2026_v7 = vld [vmem:[%s8332_s5] sm:$0xf] }
 0x1ca   : > { %1938 = vmatpush.msrb.mxu1 %v4084_v11  ;;  %1952 = vmatpush.msrb.mxu2 %v4106_v13  ;;  %v2005_v6 = vadd.f32 %v2001_v60, %v1995_v59  ;;  %v4114_v11 = vld [vmem:[%s8331_s4 + $0x790] sm:$0xff] }
 0x1cb   : > { %1972 = vmatpush.msrb.mxu3 %v4122_v14  ;;  %1919 = vmatpush.msrb.mxu0 %v4067_v57  ;;  %v2014_v13 = vadd.f32 %v2010_v5, %v2004_v37  ;;  %v2020_v14 = vmul.f32 %v6533_v25, %v4881_v23  ;;  %v4097_v57 = vld [vmem:[%s8331_s4 + $0x708] sm:$0xff]  ;;  %v2244_v59 = vld [vmem:[%s8331_s4 + $0x170] sm:$0xff]  ;;  %v2242_v37 = vld [vmem:[%s8331_s4 + $0x160] sm:$0xff] }
 0x1cc   : > { %1939 = vmatpush.msrb.mxu1 %v4083_v2  ;;  %1953 = vmatpush.msrb.mxu2 %v4105_v16  ;;  %v2015_v2 = vadd.f32 %v2011_v26, %v2005_v6  ;;  %v2021_v16 = vmul.f32 %v6533_v25, %v4911_v45  ;;  %v2260_v60 = vld [vmem:[%s8331_s4 + $0x1f0] sm:$0xff]  ;;  %v2258_v5 = vld [vmem:[%s8331_s4 + $0x1e0] sm:$0xff]  ;;  %v2241_v26 = vld [vmem:[%s8331_s4 + $0x158] sm:$0xff] }
 0x1cd   : > { %1973 = vmatpush.msrb.mxu3 %v4121_v21  ;;  %1920 = vmatpush.msrb.mxu0 %v4066_v24  ;;  %v4112_v21 = vld [vmem:[%s8331_s4 + $0x780] sm:$0xff]  ;;  %v2024_v24 = vadd.f32 %v2020_v14, %v2014_v13  ;;  %v2256_v13 = vld [vmem:[%s8331_s4 + $0x1d0] sm:$0xff] }
 0x1ce   : > { %1940 = vmatpush.msrb.mxu1 %v4082_v30  ;;  %1954 = vmatpush.msrb.mxu2 %v4104_v34  ;;  %v2025_v25 = vadd.f32 %v2021_v16, %v2015_v2  ;;  %v2228_v30 = vld [vmem:[%s8331_s4 + $0xf0] sm:$0xff]  ;;  %v2211_v34 = vld [vmem:[%s8331_s4 + $0x68] sm:$0xff]  ;;  %v2218_v6 = vld [vmem:[%s8331_s4 + $0xa0] sm:$0xff] }
 0x1cf   : > { %1974 = vmatpush.msrb.mxu3 %v4120_v35  ;;  %1921 = vmatpush.msrb.mxu0 %v4065_v28  ;;  %v2227_v35 = vld [vmem:[%s8331_s4 + $0xe8] sm:$0xff]  ;;  %v2210_v28 = vld [vmem:[%s8331_s4 + $0x60] sm:$0xff]  ;;  %v2200_v14 = vld [vmem:[%s8331_s4 + $0x10] sm:$0xff] }
 0x1d0   : > { %1941 = vmatpush.msrb.mxu1 %v4081_v20  ;;  %1955 = vmatpush.msrb.mxu2 %v4103_v29  ;;  %v2226_v20 = vld [vmem:[%s8331_s4 + $0xe0] sm:$0xff]  ;;  %v2209_v29 = vld [vmem:[%s8331_s4 + $0x58] sm:$0xff]  ;;  %v2199_v2 = vld [vmem:[%s8331_s4 + $0x8] sm:$0xff] }
 0x1d1   : > { %1975 = vmatpush.msrb.mxu3 %v4119_v31  ;;  %1922 = vmatpush.msrb.mxu0 %v4064_v36  ;;  %v2224_v31 = vld [vmem:[%s8331_s4 + $0xd0] sm:$0xff]  ;;  %v2207_v36 = vld [vmem:[%s8331_s4 + $0x48] sm:$0xff] }
 0x1d2   : > { %1942 = vmatpush.msrb.mxu1 %v4080_v50  ;;  %1956 = vmatpush.msrb.mxu2 %v4102_v54  ;;  %v2222_v50 = vld [vmem:[%s8331_s4 + $0xc0] sm:$0xff]  ;;  %v2205_v54 = vld [vmem:[%s8331_s4 + $0x38] sm:$0xff]  ;;  %v2215_v16 = vld [vmem:[%s8331_s4 + $0x88] sm:$0xff] }
 0x1d3   : > { %1976 = vmatpush.msrb.mxu3 %v4118_v44  ;;  %1923 = vmatmul.f32.vlgmr.msrb.gmra.mxu0 %v6164_v43  ;;  %v4099_v43 = vld [vmem:[%s8331_s4 + $0x718] sm:$0xff] }
 0x1d4   : > { %1943 = vmatmul.f32.vlgmr.msrb.gmra.mxu1 %v6174_v48  ;;  %1957 = vmatpush.msrb.mxu2 %v4101_v53  ;;  %v4115_v48 = vld [vmem:[%s8331_s4 + $0x798] sm:$0xff] }
 0x1d5   : > { %1977 = vmatpush.msrb.mxu3 %v4117_v61  ;;  %2045 = vmatpush.msra.mxu0 %v2022_v58  ;;  %v2221_v44 = vld [vmem:[%s8331_s4 + $0xb8] sm:$0xff]  ;;  %v2243_v61 = vld [vmem:[%s8331_s4 + $0x168] sm:$0xff] }
 0x1d6   : > { %1958 = vmatpush.msrb.mxu2 %v4100_v0  ;;  %2065 = vmatpush.msra.mxu1 %v2023_v62  ;;  %v2261_v53 = vld [vmem:[%s8331_s4 + $0x1f8] sm:$0xff]  ;;  %v2203_v0 = vld [vmem:[%s8331_s4 + $0x28] sm:$0xff] }
 0x1d7   : > { %1978 = vmatpush.msrb.mxu3 %v4116_v55  ;;  %2129 = vmatpush.msrb.mxu0 %v2022_v58  ;;  %v2220_v58 = vld [vmem:[%s8331_s4 + $0xb0] sm:$0xff]  ;;  %v2219_v55 = vld [vmem:[%s8331_s4 + $0xa8] sm:$0xff] }
 0x1d8   : > { %1959 = vmatpush.msrb.mxu2 %v4099_v43  ;;  %2149 = vmatpush.msrb.mxu1 %v2023_v62  ;;  %v2259_v62 = vld [vmem:[%s8331_s4 + $0x1e8] sm:$0xff]  ;;  %v2202_v43 = vld [vmem:[%s8331_s4 + $0x20] sm:$0xff] }
 0x1d9   : > { %1979 = vmatpush.msrb.mxu3 %v4115_v48  ;;  %v2257_v48 = vld [vmem:[%s8331_s4 + $0x1d8] sm:$0xff] }
 0x1da   : > { %1960 = vmatpush.msrb.mxu2 %v4098_v9  ;;  %v2201_v9 = vld [vmem:[%s8331_s4 + $0x18] sm:$0xff] }
 0x1db   : > { %1980 = vmatpush.msrb.mxu3 %v4114_v11  ;;  %4133 = vmatmul.msk.f32.vlgmr.msra.gmra.mxu0 %vm445_vm0, %v2026_v7  ;;  %v2217_v11 = vld [vmem:[%s8331_s4 + $0x98] sm:$0xff] }
 0x1dc   : > { %4134 = vmatmul.msk.f32.vlgmr.msra.gmra.mxu1 %vm445_vm0, %v2026_v7  ;;  %1961 = vmatpush.msrb.mxu2 %v4097_v57  ;;  %v2216_v57 = vld [vmem:[%s8331_s4 + $0x90] sm:$0xff] }
 0x1dd   : > { %1981 = vmatpush.msrb.mxu3 %v4113_v17  ;;  %v2198_v17 = vld [vmem:[%s8331_s4] sm:$0xff] }
 0x1de   : > { %1962 = vmatpush.msrb.mxu2 %v4096_v18  ;;  %v2214_v18 = vld [vmem:[%s8331_s4 + $0x80] sm:$0xff] }
 0x1df   : > { %1982 = vmatpush.msrb.mxu3 %v4112_v21  ;;  %1963 = vmatmul.f32.vlgmr.msrb.gmra.mxu2 %v6217_v63  ;;  %v2213_v63 = vld [vmem:[%s8331_s4 + $0x78] sm:$0xff]  ;;  %v2239_v21 = vld [vmem:[%s8331_s4 + $0x148] sm:$0xff] }
 0x1e0   : > { %1983 = vmatmul.f32.vlgmr.msrb.gmra.mxu3 %v6232_v12  ;;  %2085 = vmatpush.msra.mxu2 %v2024_v24  ;;  %v2229_v12 = vld [vmem:[%s8331_s4 + $0xf8] sm:$0xff] }
 0x1e1   : > { %2105 = vmatpush.msra.mxu3 %v2025_v25  ;;  %2262 = vmatpush.msra.mxu0 %v2213_v63  ;;  %v2238_v63 = vld [vmem:[%s8331_s4 + $0x140] sm:$0xff] }
 0x1e2   : > { %2169 = vmatpush.msrb.mxu2 %v2024_v24  ;;  %2282 = vmatpush.msra.mxu1 %v2229_v12  ;;  %v2255_v24 = vld [vmem:[%s8331_s4 + $0x1c8] sm:$0xff]  ;;  %v2254_v12 = vld [vmem:[%s8331_s4 + $0x1c0] sm:$0xff] }
 0x1e3   : > { %2189 = vmatpush.msrb.mxu3 %v2025_v25  ;;  %4138 = vmatmul.msk.f32.vlgmr.msrb.gmra.mxu0 %vm445_vm0, %v4137_v1  ;;  %v4157_v25 = vld [vmem:[%s8331_s4 + $0x278] sm:$0xff] }
 0x1e4   : > { %4139 = vmatmul.msk.f32.vlgmr.msrb.gmra.mxu1 %vm445_vm0, %v4137_v1  ;;  %2263 = vmatpush.msra.mxu0 %v2212_v10  ;;  %v4156_v10 = vld [vmem:[%s8331_s4 + $0x270] sm:$0xff] }
 0x1e5   : > { %2283 = vmatpush.msra.mxu1 %v2228_v30  ;;  %v4172_v30 = vld [vmem:[%s8331_s4 + $0x2f0] sm:$0xff] }
 0x1e6   : > { %2264 = vmatpush.msra.mxu0 %v2211_v34  ;;  %v2237_v34 = vld [vmem:[%s8331_s4 + $0x138] sm:$0xff] }
 0x1e7   : > { %4135 = vmatmul.msk.f32.vlgmr.msra.gmra.mxu2 %vm445_vm0, %v2026_v7  ;;  %2284 = vmatpush.msra.mxu1 %v2227_v35  ;;  %v2253_v35 = vld [vmem:[%s8331_s4 + $0x1b8] sm:$0xff] }
 0x1e8   : > { %4136 = vmatmul.msk.f32.vlgmr.msra.gmra.mxu3 %vm445_vm0, %v2026_v7  ;;  %2265 = vmatpush.msra.mxu0 %v2210_v28  ;;  %v2240_v7 = vld [vmem:[%s8331_s4 + $0x150] sm:$0xff]  ;;  %v4155_v28 = vld [vmem:[%s8331_s4 + $0x268] sm:$0xff] }
 0x1e9   : > { %2285 = vmatpush.msra.mxu1 %v2226_v20  ;;  %2302 = vmatpush.msra.mxu2 %v2245_v46  ;;  %v4171_v20 = vld [vmem:[%s8331_s4 + $0x2e8] sm:$0xff]  ;;  %v4152_v46 = vld [vmem:[%s8331_s4 + $0x250] sm:$0xff] }
 0x1ea   : > { %2266 = vmatpush.msra.mxu0 %v2209_v29  ;;  %2322 = vmatpush.msra.mxu3 %v2261_v53  ;;  %v2236_v29 = vld [vmem:[%s8331_s4 + $0x130] sm:$0xff]  ;;  %v2233_v53 = vld [vmem:[%s8331_s4 + $0x118] sm:$0xff] }
 0x1eb   : > { %2286 = vmatpush.msra.mxu1 %v2225_v42  ;;  %2303 = vmatpush.msra.mxu2 %v2244_v59  ;;  %v2252_v42 = vld [vmem:[%s8331_s4 + $0x1b0] sm:$0xff]  ;;  %v4151_v59 = vld [vmem:[%s8331_s4 + $0x248] sm:$0xff] }
 0x1ec   : > { %2267 = vmatpush.msra.mxu0 %v2208_v4  ;;  %2323 = vmatpush.msra.mxu3 %v2260_v60  ;;  %v4154_v4 = vld [vmem:[%s8331_s4 + $0x260] sm:$0xff]  ;;  %v4167_v60 = vld [vmem:[%s8331_s4 + $0x2c8] sm:$0xff] }
 0x1ed   : > { %2287 = vmatpush.msra.mxu1 %v2224_v31  ;;  %2304 = vmatpush.msra.mxu2 %v2243_v61  ;;  %v4170_v31 = vld [vmem:[%s8331_s4 + $0x2e0] sm:$0xff]  ;;  %v2232_v61 = vld [vmem:[%s8331_s4 + $0x110] sm:$0xff] }
 0x1ee   : > { %2268 = vmatpush.msra.mxu0 %v2207_v36  ;;  %2324 = vmatpush.msra.mxu3 %v2259_v62  ;;  %v2235_v36 = vld [vmem:[%s8331_s4 + $0x128] sm:$0xff]  ;;  %v2248_v62 = vld [vmem:[%s8331_s4 + $0x190] sm:$0xff] }
 0x1ef   : > { %4140 = vmatmul.msk.f32.vlgmr.msrb.gmra.mxu2 %vm445_vm0, %v4137_v1  ;;  %2288 = vmatpush.msra.mxu1 %v2223_v40  ;;  %v2251_v40 = vld [vmem:[%s8331_s4 + $0x1a8] sm:$0xff] }
 0x1f0   : > { %4141 = vmatmul.msk.f32.vlgmr.msrb.gmra.mxu3 %vm445_vm0, %v4137_v1  ;;  %2269 = vmatpush.msra.mxu0 %v2206_v49  ;;  %v4173_v1 = vld [vmem:[%s8331_s4 + $0x2f8] sm:$0xff] }
 0x1f1   : > { %2289 = vmatpush.msra.mxu1 %v2222_v50  ;;  %2305 = vmatpush.msra.mxu2 %v2242_v37  ;;  %v4153_v49 = vld [vmem:[%s8331_s4 + $0x258] sm:$0xff]  ;;  %v2231_v37 = vld [vmem:[%s8331_s4 + $0x108] sm:$0xff] }
 0x1f2   : > { %2270 = vmatpush.msra.mxu0 %v2205_v54  ;;  %2325 = vmatpush.msra.mxu3 %v2258_v5  ;;  %v4169_v50 = vld [vmem:[%s8331_s4 + $0x2d8] sm:$0xff]  ;;  %v2234_v54 = vld [vmem:[%s8331_s4 + $0x120] sm:$0xff]  ;;  %v2247_v5 = vld [vmem:[%s8331_s4 + $0x188] sm:$0xff] }
 0x1f3   : > { %2290 = vmatpush.msra.mxu1 %v2221_v44  ;;  %2306 = vmatpush.msra.mxu2 %v2241_v26  ;;  %v2250_v44 = vld [vmem:[%s8331_s4 + $0x1a0] sm:$0xff] }
 0x1f4   : > { %2271 = vmatpush.msra.mxu0 %v2204_v52  ;;  %2326 = vmatpush.msra.mxu3 %v2257_v48  ;;  %v4168_v52 = vld [vmem:[%s8331_s4 + $0x2d0] sm:$0xff]  ;;  %v2230_v26 = vld [vmem:[%s8331_s4 + $0x100] sm:$0xff] }
 0x1f5   : > { %2291 = vmatpush.msra.mxu1 %v2220_v58  ;;  %2307 = vmatpush.msra.mxu2 %v2240_v7  ;;  %v2249_v58 = vld [vmem:[%s8331_s4 + $0x198] sm:$0xff]  ;;  %v2246_v48 = vld [vmem:[%s8331_s4 + $0x180] sm:$0xff] }
 0x1f6   : > { %2272 = vmatpush.msra.mxu0 %v2203_v0  ;;  %2327 = vmatpush.msra.mxu3 %v2256_v13  ;;  %v4150_v0 = vld [vmem:[%s8331_s4 + $0x240] sm:$0xff]  ;;  %v4189_v13 = vld [vmem:[%s8331_s4 + $0x378] sm:$0xff] }
 0x1f7   : > { %2292 = vmatpush.msra.mxu1 %v2219_v55  ;;  %2308 = vmatpush.msra.mxu2 %v2239_v21  ;;  %v4166_v55 = vld [vmem:[%s8331_s4 + $0x2c0] sm:$0xff] }
 0x1f8   : > { %2273 = vmatpush.msra.mxu0 %v2202_v43  ;;  %2328 = vmatpush.msra.mxu3 %v2255_v24  ;;  %v4149_v43 = vld [vmem:[%s8331_s4 + $0x238] sm:$0xff]  ;;  %v4146_v21 = vld [vmem:[%s8331_s4 + $0x220] sm:$0xff] }
 0x1f9   : > { %2293 = vmatpush.msra.mxu1 %v2218_v6  ;;  %2309 = vmatpush.msra.mxu2 %v2238_v63  ;;  %v4165_v6 = vld [vmem:[%s8331_s4 + $0x2b8] sm:$0xff]  ;;  %v4162_v24 = vld [vmem:[%s8331_s4 + $0x2a0] sm:$0xff] }
 0x1fa   : > { %2274 = vmatpush.msra.mxu0 %v2201_v9  ;;  %2329 = vmatpush.msra.mxu3 %v2254_v12  ;;  %v4148_v9 = vld [vmem:[%s8331_s4 + $0x230] sm:$0xff]  ;;  %v4145_v63 = vld [vmem:[%s8331_s4 + $0x218] sm:$0xff] }
 0x1fb   : > { %2294 = vmatpush.msra.mxu1 %v2217_v11  ;;  %2310 = vmatpush.msra.mxu2 %v2237_v34  ;;  %v4164_v11 = vld [vmem:[%s8331_s4 + $0x2b0] sm:$0xff]  ;;  %v4161_v12 = vld [vmem:[%s8331_s4 + $0x298] sm:$0xff] }
 0x1fc   : > { %2275 = vmatpush.msra.mxu0 %v2200_v14  ;;  %2330 = vmatpush.msra.mxu3 %v2253_v35  ;;  %v4205_v14 = vld [vmem:[%s8331_s4 + $0x3f8] sm:$0xff]  ;;  %v4144_v34 = vld [vmem:[%s8331_s4 + $0x210] sm:$0xff] }
 0x1fd   : > { %2295 = vmatpush.msra.mxu1 %v2216_v57  ;;  %2311 = vmatpush.msra.mxu2 %v2236_v29  ;;  %v4160_v35 = vld [vmem:[%s8331_s4 + $0x290] sm:$0xff] }
 0x1fe   : > { %2276 = vmatpush.msra.mxu0 %v2199_v2  ;;  %2331 = vmatpush.msra.mxu3 %v2252_v42  ;;  %v4147_v2 = vld [vmem:[%s8331_s4 + $0x228] sm:$0xff] }
 0x1ff   : > { %2296 = vmatpush.msra.mxu1 %v2215_v16  ;;  %2312 = vmatpush.msra.mxu2 %v2235_v36  ;;  %v4163_v16 = vld [vmem:[%s8331_s4 + $0x2a8] sm:$0xff] }
 0x200   : > { %2277 = vmatpush.msra.mxu0 %v2198_v17  ;;  %2332 = vmatpush.msra.mxu3 %v2251_v40  ;;  %v4188_v17 = vld [vmem:[%s8331_s4 + $0x370] sm:$0xff]  ;;  %v4143_v42 = vld [vmem:[%s8331_s4 + $0x208] sm:$0xff] }
 0x201   : > { %2297 = vmatpush.msra.mxu1 %v2214_v18  ;;  %2313 = vmatpush.msra.mxu2 %v2234_v54  ;;  %v4204_v18 = vld [vmem:[%s8331_s4 + $0x3f0] sm:$0xff]  ;;  %v4183_v54 = vld [vmem:[%s8331_s4 + $0x348] sm:$0xff] }
 0x202   : > { %2406 = vmatpush.msrb.mxu0 %v4157_v25  ;;  %2333 = vmatpush.msra.mxu3 %v2250_v44  ;;  %v4187_v25 = vld [vmem:[%s8331_s4 + $0x368] sm:$0xff]  ;;  %v4200_v40 = vld [vmem:[%s8331_s4 + $0x3d0] sm:$0xff] }
 0x203   : > { %2426 = vmatpush.msrb.mxu1 %v4173_v1  ;;  %2314 = vmatpush.msra.mxu2 %v2233_v53  ;;  %v4203_v1 = vld [vmem:[%s8331_s4 + $0x3e8] sm:$0xff]  ;;  %v4181_v53 = vld [vmem:[%s8331_s4 + $0x338] sm:$0xff] }
 0x204   : > { %2407 = vmatpush.msrb.mxu0 %v4156_v10  ;;  %2334 = vmatpush.msra.mxu3 %v2249_v58  ;;  %v4186_v10 = vld [vmem:[%s8331_s4 + $0x360] sm:$0xff]  ;;  %v4199_v44 = vld [vmem:[%s8331_s4 + $0x3c8] sm:$0xff]  ;;  %v4197_v58 = vld [vmem:[%s8331_s4 + $0x3b8] sm:$0xff] }
 0x205   : > { %2427 = vmatpush.msrb.mxu1 %v4172_v30  ;;  %2315 = vmatpush.msra.mxu2 %v2232_v61  ;;  %v4202_v30 = vld [vmem:[%s8331_s4 + $0x3e0] sm:$0xff] }
 0x206   : > { %2408 = vmatpush.msrb.mxu0 %v4155_v28  ;;  %2335 = vmatpush.msra.mxu3 %v2248_v62  ;;  %v4185_v28 = vld [vmem:[%s8331_s4 + $0x358] sm:$0xff] }
 0x207   : > { %2428 = vmatpush.msrb.mxu1 %v4171_v20  ;;  %2316 = vmatpush.msra.mxu2 %v2231_v37  ;;  %v4201_v20 = vld [vmem:[%s8331_s4 + $0x3d8] sm:$0xff]  ;;  %v4179_v37 = vld [vmem:[%s8331_s4 + $0x328] sm:$0xff] }
 0x208   : > { %2409 = vmatpush.msrb.mxu0 %v4154_v4  ;;  %2336 = vmatpush.msra.mxu3 %v2247_v5  ;;  %v4159_v4 = vld [vmem:[%s8331_s4 + $0x288] sm:$0xff] }
 0x209   : > { %2429 = vmatpush.msrb.mxu1 %v4170_v31  ;;  %2317 = vmatpush.msra.mxu2 %v2230_v26  ;;  %v4184_v31 = vld [vmem:[%s8331_s4 + $0x350] sm:$0xff]  ;;  %v4195_v5 = vld [vmem:[%s8331_s4 + $0x3a8] sm:$0xff]  ;;  %v4177_v26 = vld [vmem:[%s8331_s4 + $0x318] sm:$0xff] }
 0x20a   : > { %2410 = vmatpush.msrb.mxu0 %v4153_v49  ;;  %2337 = vmatpush.msra.mxu3 %v2246_v48  ;;  %v4142_v49 = vld [vmem:[%s8331_s4 + $0x200] sm:$0xff]  ;;  %v4193_v48 = vld [vmem:[%s8331_s4 + $0x398] sm:$0xff] }
 0x20b   : > { %2430 = vmatpush.msrb.mxu1 %v4169_v50  ;;  %v6896_v7 = vpop.f32.mrf.mxu0  ;;  %2446 = vmatpush.msrb.mxu2 %v4189_v13  ;;  %v4158_v50 = vld [vmem:[%s8331_s4 + $0x280] sm:$0xff]  ;;  %v4176_v13 = vld [vmem:[%s8331_s4 + $0x310] sm:$0xff] }
 0x20c   : > { %2411 = vmatpush.msrb.mxu0 %v4152_v46  ;;  %v6904_v57 = vpop.f32.mrf.mxu1  ;;  %2466 = vmatpush.msrb.mxu3 %v4205_v14  ;;  %v4182_v46 = vld [vmem:[%s8331_s4 + $0x340] sm:$0xff]  ;;  %v4192_v14 = vld [vmem:[%s8331_s4 + $0x390] sm:$0xff] }
 0x20d   : > { %2431 = vmatpush.msrb.mxu1 %v4168_v52  ;;  %2447 = vmatpush.msrb.mxu2 %v4188_v17  ;;  %v4198_v52 = vld [vmem:[%s8331_s4 + $0x3c0] sm:$0xff]  ;;  %v4175_v17 = vld [vmem:[%s8331_s4 + $0x308] sm:$0xff] }
 0x20e   : > { %2412 = vmatpush.msrb.mxu0 %v4151_v59  ;;  %2467 = vmatpush.msrb.mxu3 %v4204_v18  ;;  %v4191_v18 = vld [vmem:[%s8331_s4 + $0x388] sm:$0xff] }
 0x20f   : > { %2432 = vmatpush.msrb.mxu1 %v4167_v60  ;;  %2448 = vmatpush.msrb.mxu2 %v4187_v25 }
 0x210   : > { %2413 = vmatpush.msrb.mxu0 %v4150_v0  ;;  %2468 = vmatpush.msrb.mxu3 %v4203_v1  ;;  %v4180_v0 = vld [vmem:[%s8331_s4 + $0x330] sm:$0xff]  ;;  %v1511_v1 = vadd.f32 %v6904_v57, %v6896_v7  ;;  %v4221_v7 = vld [vmem:[%s8331_s4 + $0x478] sm:$0xff] }
 0x211   : > { %2433 = vmatpush.msrb.mxu1 %v4166_v55  ;;  %2449 = vmatpush.msrb.mxu2 %v4186_v10  ;;  %v4196_v55 = vld [vmem:[%s8331_s4 + $0x3b0] sm:$0xff] }
 0x212   : > { %2414 = vmatpush.msrb.mxu0 %v4149_v43  ;;  %2469 = vmatpush.msrb.mxu3 %v4202_v30  ;;  %v4178_v43 = vld [vmem:[%s8331_s4 + $0x320] sm:$0xff] }
 0x213   : > { %2434 = vmatpush.msrb.mxu1 %v4165_v6  ;;  %v6954_v29 = vpop.f32.mrf.mxu0  ;;  %2450 = vmatpush.msrb.mxu2 %v4185_v28  ;;  %v4194_v6 = vld [vmem:[%s8331_s4 + $0x3a0] sm:$0xff] }
 0x214   : > { %2415 = vmatpush.msrb.mxu0 %v4148_v9  ;;  %v1654_v36 = vpop.f32.mrf.mxu1  ;;  %2470 = vmatpush.msrb.mxu3 %v4201_v20 }
 0x215   : > { %2435 = vmatpush.msrb.mxu1 %v4164_v11  ;;  %2451 = vmatpush.msrb.mxu2 %v4184_v31 }
 0x216   : > { %2416 = vmatpush.msrb.mxu0 %v4147_v2  ;;  %2471 = vmatpush.msrb.mxu3 %v4200_v40 }
 0x217   : > { %2436 = vmatpush.msrb.mxu1 %v4163_v16  ;;  %2452 = vmatpush.msrb.mxu2 %v4183_v54 }
 0x218   : > { %2417 = vmatpush.msrb.mxu0 %v4146_v21  ;;  %2472 = vmatpush.msrb.mxu3 %v4199_v44  ;;  %v4174_v21 = vld [vmem:[%s8331_s4 + $0x300] sm:$0xff] }
 0x219   : > { %2437 = vmatpush.msrb.mxu1 %v4162_v24  ;;  %2453 = vmatpush.msrb.mxu2 %v4182_v46  ;;  %v4190_v24 = vld [vmem:[%s8331_s4 + $0x380] sm:$0xff] }
 0x21a   : > { %2418 = vmatpush.msrb.mxu0 %v4145_v63  ;;  %2473 = vmatpush.msrb.mxu3 %v4198_v52  ;;  %v1655_v63 = vadd.f32 %v1654_v36, %v6954_v29  ;;  %v4237_v36 = vld [vmem:[%s8331_s4 + $0x4f8] sm:$0xff] }
 0x21b   : > { %2438 = vmatpush.msrb.mxu1 %v4161_v12  ;;  %2454 = vmatpush.msrb.mxu2 %v4181_v53  ;;  %v4220_v53 = vld [vmem:[%s8331_s4 + $0x470] sm:$0xff] }
 0x21c   : > { %2419 = vmatpush.msrb.mxu0 %v4144_v34  ;;  %2474 = vmatpush.msrb.mxu3 %v4197_v58  ;;  %v4236_v58 = vld [vmem:[%s8331_s4 + $0x4f0] sm:$0xff] }
 0x21d   : > { %2439 = vmatpush.msrb.mxu1 %v4160_v35  ;;  %2455 = vmatpush.msrb.mxu2 %v4180_v0 }
 0x21e   : > { %2420 = vmatpush.msrb.mxu0 %v4143_v42  ;;  %v1530_v59 = vpop.f32.mrf.mxu2  ;;  %2475 = vmatpush.msrb.mxu3 %v4196_v55  ;;  %v4218_v55 = vld [vmem:[%s8331_s4 + $0x460] sm:$0xff] }
 0x21f   : > { %2440 = vmatpush.msrb.mxu1 %v4159_v4  ;;  %2456 = vmatpush.msrb.mxu2 %v4179_v37  ;;  %v1531_v28 = vadd.f32 %v1530_v59, %v1511_v1  ;;  %v4234_v37 = vld [vmem:[%s8331_s4 + $0x4e0] sm:$0xff] }
 0x220   : > { %2421 = vmatpush.msrb.mxu0 %v4142_v49  ;;  %2476 = vmatpush.msrb.mxu3 %v4195_v5  ;;  %v4217_v5 = vld [vmem:[%s8331_s4 + $0x458] sm:$0xff] }
 0x221   : > { %2441 = vmatpush.msrb.mxu1 %v4158_v50  ;;  %v1550_v61 = vpop.f32.mrf.mxu3  ;;  %2457 = vmatpush.msrb.mxu2 %v4178_v43 }
 0x222   : > { %2477 = vmatpush.msrb.mxu3 %v4194_v6  ;;  %v1551_v31 = vadd.f32 %v1550_v61, %v1531_v28  ;;  %v4219_v61 = vld [vmem:[%s8331_s4 + $0x468] sm:$0xff]  ;;  %v4233_v6 = vld [vmem:[%s8331_s4 + $0x4d8] sm:$0xff]  ;;  %v4268_v28 = vld [vmem:[%s8331_s4 + $0x5f0] sm:$0xff] }
 0x223   : > { %2458 = vmatpush.msrb.mxu2 %v4177_v26 }
 0x224   : > { %2478 = vmatpush.msrb.mxu3 %v4193_v48  ;;  %v4216_v48 = vld [vmem:[%s8331_s4 + $0x450] sm:$0xff] }
 0x225   : > { %2459 = vmatpush.msrb.mxu2 %v4176_v13  ;;  %v4231_v13 = vld [vmem:[%s8331_s4 + $0x4c8] sm:$0xff] }
 0x226   : > { %2479 = vmatpush.msrb.mxu3 %v4192_v14  ;;  %v4214_v14 = vld [vmem:[%s8331_s4 + $0x440] sm:$0xff] }
 0x227   : > { %v1674_v2 = vpop.f32.mrf.mxu2  ;;  %2460 = vmatpush.msrb.mxu2 %v4175_v17 }
 0x228   : > { %2480 = vmatpush.msrb.mxu3 %v4191_v18  ;;  %v1675_v30 = vadd.f32 %v1674_v2, %v1655_v63  ;;  %v4230_v2 = vld [vmem:[%s8331_s4 + $0x4c0] sm:$0xff]  ;;  %v4229_v18 = vld [vmem:[%s8331_s4 + $0x4b8] sm:$0xff]  ;;  %v4228_v63 = vld [vmem:[%s8331_s4 + $0x4b0] sm:$0xff] }
 0x229   : > { %v1694_v16 = vpop.f32.mrf.mxu3  ;;  %2461 = vmatpush.msrb.mxu2 %v4174_v21 }
 0x22a   : > { %2481 = vmatpush.msrb.mxu3 %v4190_v24  ;;  %v1695_v42 = vadd.f32 %v1694_v16, %v1675_v30  ;;  %v4213_v16 = vld [vmem:[%s8331_s4 + $0x438] sm:$0xff]  ;;  %v4211_v30 = vld [vmem:[%s8331_s4 + $0x428] sm:$0xff] }
 0x22c   : > { %v1697_v44 = vmax.f32 %v1551_v31, %v1695_v42  ;;  %v4226_v42 = vld [vmem:[%s8331_s4 + $0x4a0] sm:$0xff]  ;;  %v4267_v31 = vld [vmem:[%s8331_s4 + $0x5e8] sm:$0xff] }
 0x22e   : > { %v1779_v60 = vpop.f32.mrf.mxu0 }
 0x22f   : > { %v1799_v62 = vpop.f32.mrf.mxu1 }
 0x230   : > { %v1800_v34 = vadd.f32 %v1799_v62, %v1779_v60  ;;  %v4235_v62 = vld [vmem:[%s8331_s4 + $0x4e8] sm:$0xff] }
 0x241   : > { %v1819_v10 = vpop.f32.mrf.mxu2 }
 0x242   : > { %v1839_v35 = vpop.f32.mrf.mxu3  ;;  %v1820_v20 = vadd.f32 %v1819_v10, %v1800_v34  ;;  %v4269_v10 = vld [vmem:[%s8331_s4 + $0x5f8] sm:$0xff]  ;;  %v4227_v34 = vld [vmem:[%s8331_s4 + $0x4a8] sm:$0xff] }
 0x244   : > { %v1840_v40 = vadd.f32 %v1839_v35, %v1820_v20  ;;  %v4252_v35 = vld [vmem:[%s8331_s4 + $0x570] sm:$0xff]  ;;  %v4210_v20 = vld [vmem:[%s8331_s4 + $0x420] sm:$0xff] }
 0x246   : > { %v1842_v59 = vmax.f32 %v1697_v44, %v1840_v40  ;;  %v4209_v40 = vld [vmem:[%s8331_s4 + $0x418] sm:$0xff] }
 0x247   : > { %v4249_v44 = vld [vmem:[%s8331_s4 + $0x558] sm:$0xff] }
 0x250   : > { %v1924_v9 = vpop.f32.mrf.mxu0 }
 0x251   : > { %v1944_v11 = vpop.f32.mrf.mxu1 }
 0x252   : > { %v1945_v49 = vadd.f32 %v1944_v11, %v1924_v9  ;;  %v4232_v9 = vld [vmem:[%s8331_s4 + $0x4d0] sm:$0xff]  ;;  %v4215_v11 = vld [vmem:[%s8331_s4 + $0x448] sm:$0xff] }
 0x258   : > { %v2047_v25 = vpop.f32.mrf.mxu0 }
 0x259   : > { %v2067_v12 = vpop.f32.mrf.mxu1 }
 0x260   : > { %v2131_v4 = vpop.f32.mrf.mxu0 }
 0x261   : > { %v7037_v50 = vmax.f32 %v2047_v25, %v2131_v4  ;;  %v2151_v54 = vpop.f32.mrf.mxu1  ;;  %v4212_v25 = vld [vmem:[%s8331_s4 + $0x430] sm:$0xff]  ;;  %v4251_v4 = vld [vmem:[%s8331_s4 + $0x568] sm:$0xff] }
 0x262   : > { %v7042_v57 = vmax.f32 %v2067_v12, %v2151_v54  ;;  %v1964_v29 = vpop.f32.mrf.mxu2  ;;  %v4253_v12 = vld [vmem:[%s8331_s4 + $0x578] sm:$0xff]  ;;  %v4250_v54 = vld [vmem:[%s8331_s4 + $0x560] sm:$0xff] }
 0x263   : > { %v1965_v46 = vadd.f32 %v1964_v29, %v1945_v49  ;;  %v1984_v52 = vpop.f32.mrf.mxu3  ;;  %2278 = vmatmul.f32.vlgmr.msra.gmra.mxu0 %v7037_v50  ;;  %v4225_v49 = vld [vmem:[%s8331_s4 + $0x498] sm:$0xff]  ;;  %v4208_v29 = vld [vmem:[%s8331_s4 + $0x410] sm:$0xff] }
 0x264   : > { %2298 = vmatmul.f32.vlgmr.msra.gmra.mxu1 %v7042_v57  ;;  %2551 = vmatpush.msra.mxu0 %v4221_v7  ;;  %v4266_v7 = vld [vmem:[%s8331_s4 + $0x5e0] sm:$0xff] }
 0x265   : > { %v1985_v60 = vadd.f32 %v1984_v52, %v1965_v46  ;;  %2571 = vmatpush.msra.mxu1 %v4237_v36  ;;  %v4224_v36 = vld [vmem:[%s8331_s4 + $0x490] sm:$0xff]  ;;  %v4265_v46 = vld [vmem:[%s8331_s4 + $0x5d8] sm:$0xff]  ;;  %v4207_v52 = vld [vmem:[%s8331_s4 + $0x408] sm:$0xff] }
 0x266   : > { %2552 = vmatpush.msra.mxu0 %v4220_v53  ;;  %v4223_v53 = vld [vmem:[%s8331_s4 + $0x488] sm:$0xff] }
 0x267   : > { %v1987_v0 = vmax.f32 %v1842_v59, %v1985_v60  ;;  %2572 = vmatpush.msra.mxu1 %v4236_v58  ;;  %v4248_v58 = vld [vmem:[%s8331_s4 + $0x550] sm:$0xff]  ;;  %v4206_v60 = vld [vmem:[%s8331_s4 + $0x400] sm:$0xff] }
 0x268   : > { %2553 = vmatpush.msra.mxu0 %v4219_v61  ;;  %v4264_v59 = vld [vmem:[%s8331_s4 + $0x5d0] sm:$0xff]  ;;  %v4222_v61 = vld [vmem:[%s8331_s4 + $0x480] sm:$0xff] }
 0x269   : > { %4128 = vst [vmem:[%s6172_s24 + $0x4] sm:$0xf] %v1987_v0  ;;  %2573 = vmatpush.msra.mxu1 %v4235_v62  ;;  %v4247_v62 = vld [vmem:[%s8331_s4 + $0x548] sm:$0xff] }
 0x26a   : > { %2554 = vmatpush.msra.mxu0 %v4218_v55  ;;  %v2087_v43 = vpop.f32.mrf.mxu2  ;;  %v4263_v0 = vld [vmem:[%s8331_s4 + $0x5c8] sm:$0xff]  ;;  %v4285_v55 = vld [vmem:[%s8331_s4 + $0x678] sm:$0xff] }
 0x26b   : > { %2574 = vmatpush.msra.mxu1 %v4234_v37  ;;  %v2107_v26 = vpop.f32.mrf.mxu3  ;;  %2422 = vmatmul.f32.vlgmr.msrb.gmra.mxu0 %v7037_v50  ;;  %v4301_v37 = vld [vmem:[%s8331_s4 + $0x6f8] sm:$0xff] }
 0x26c   : > { %2555 = vmatpush.msra.mxu0 %v4217_v5  ;;  %2442 = vmatmul.f32.vlgmr.msrb.gmra.mxu1 %v7042_v57  ;;  %v4246_v5 = vld [vmem:[%s8331_s4 + $0x540] sm:$0xff] }
 0x26d   : > { %2575 = vmatpush.msra.mxu1 %v4233_v6  ;;  %v4284_v6 = vld [vmem:[%s8331_s4 + $0x670] sm:$0xff] }
 0x26e   : > { %2556 = vmatpush.msra.mxu0 %v4216_v48  ;;  %v4245_v48 = vld [vmem:[%s8331_s4 + $0x538] sm:$0xff] }
 0x26f   : > { %2576 = vmatpush.msra.mxu1 %v4232_v9  ;;  %v4261_v9 = vld [vmem:[%s8331_s4 + $0x5b8] sm:$0xff] }
 0x270   : > { %2557 = vmatpush.msra.mxu0 %v4215_v11  ;;  %v4283_v11 = vld [vmem:[%s8331_s4 + $0x668] sm:$0xff] }
 0x271   : > { %2577 = vmatpush.msra.mxu1 %v4231_v13  ;;  %v4299_v13 = vld [vmem:[%s8331_s4 + $0x6e8] sm:$0xff] }
 0x272   : > { %2558 = vmatpush.msra.mxu0 %v4214_v14  ;;  %v2171_v17 = vpop.f32.mrf.mxu2  ;;  %v4244_v14 = vld [vmem:[%s8331_s4 + $0x530] sm:$0xff] }
 0x273   : > { %2578 = vmatpush.msra.mxu1 %v4230_v2  ;;  %v7100_v21 = vmax.f32 %v2087_v43, %v2171_v17  ;;  %v2191_v24 = vpop.f32.mrf.mxu3  ;;  %v4262_v43 = vld [vmem:[%s8331_s4 + $0x5c0] sm:$0xff]  ;;  %v4260_v2 = vld [vmem:[%s8331_s4 + $0x5b0] sm:$0xff] }
 0x274   : > { %v7105_v1 = vmax.f32 %v2107_v26, %v2191_v24  ;;  %2559 = vmatpush.msra.mxu0 %v4213_v16  ;;  %v4300_v26 = vld [vmem:[%s8331_s4 + $0x6f0] sm:$0xff]  ;;  %v4282_v16 = vld [vmem:[%s8331_s4 + $0x660] sm:$0xff]  ;;  %v4259_v24 = vld [vmem:[%s8331_s4 + $0x5a8] sm:$0xff] }
 0x275   : > { %2579 = vmatpush.msra.mxu1 %v4229_v18  ;;  %2318 = vmatmul.f32.vlgmr.msra.gmra.mxu2 %v7100_v21  ;;  %v4298_v17 = vld [vmem:[%s8331_s4 + $0x6e0] sm:$0xff]  ;;  %v4243_v18 = vld [vmem:[%s8331_s4 + $0x528] sm:$0xff] }
 0x276   : > { %2338 = vmatmul.f32.vlgmr.msra.gmra.mxu3 %v7105_v1  ;;  %2560 = vmatpush.msra.mxu0 %v4212_v25  ;;  %v4281_v25 = vld [vmem:[%s8331_s4 + $0x658] sm:$0xff] }
 0x277   : > { %2580 = vmatpush.msra.mxu1 %v4228_v63  ;;  %2591 = vmatpush.msra.mxu2 %v4253_v12  ;;  %v4297_v63 = vld [vmem:[%s8331_s4 + $0x6d8] sm:$0xff]  ;;  %v4242_v12 = vld [vmem:[%s8331_s4 + $0x520] sm:$0xff] }
 0x278   : > { %2611 = vmatpush.msra.mxu3 %v4269_v10  ;;  %2561 = vmatpush.msra.mxu0 %v4211_v30  ;;  %v4258_v10 = vld [vmem:[%s8331_s4 + $0x5a0] sm:$0xff]  ;;  %v4280_v30 = vld [vmem:[%s8331_s4 + $0x650] sm:$0xff] }
 0x279   : > { %2581 = vmatpush.msra.mxu1 %v4227_v34  ;;  %2592 = vmatpush.msra.mxu2 %v4252_v35  ;;  %v4296_v34 = vld [vmem:[%s8331_s4 + $0x6d0] sm:$0xff]  ;;  %v4241_v35 = vld [vmem:[%s8331_s4 + $0x518] sm:$0xff] }
 0x27a   : > { %2612 = vmatpush.msra.mxu3 %v4268_v28  ;;  %2562 = vmatpush.msra.mxu0 %v4210_v20  ;;  %v4257_v28 = vld [vmem:[%s8331_s4 + $0x598] sm:$0xff]  ;;  %v4279_v20 = vld [vmem:[%s8331_s4 + $0x648] sm:$0xff] }
 0x27b   : > { %2582 = vmatpush.msra.mxu1 %v4226_v42  ;;  %2593 = vmatpush.msra.mxu2 %v4251_v4  ;;  %v4295_v42 = vld [vmem:[%s8331_s4 + $0x6c8] sm:$0xff]  ;;  %v4240_v4 = vld [vmem:[%s8331_s4 + $0x510] sm:$0xff] }
 0x27c   : > { %2613 = vmatpush.msra.mxu3 %v4267_v31  ;;  %2563 = vmatpush.msra.mxu0 %v4209_v40  ;;  %v4256_v31 = vld [vmem:[%s8331_s4 + $0x590] sm:$0xff]  ;;  %v4278_v40 = vld [vmem:[%s8331_s4 + $0x640] sm:$0xff] }
 0x27d   : > { %2583 = vmatpush.msra.mxu1 %v4225_v49  ;;  %2594 = vmatpush.msra.mxu2 %v4250_v54  ;;  %v4294_v49 = vld [vmem:[%s8331_s4 + $0x6c0] sm:$0xff]  ;;  %v4239_v54 = vld [vmem:[%s8331_s4 + $0x508] sm:$0xff] }
 0x27e   : > { %2614 = vmatpush.msra.mxu3 %v4266_v7  ;;  %2462 = vmatmul.f32.vlgmr.msrb.gmra.mxu2 %v7100_v21  ;;  %v4255_v7 = vld [vmem:[%s8331_s4 + $0x588] sm:$0xff] }
 0x27f   : > { %2482 = vmatmul.f32.vlgmr.msrb.gmra.mxu3 %v7105_v1  ;;  %2564 = vmatpush.msra.mxu0 %v4208_v29  ;;  %v4277_v29 = vld [vmem:[%s8331_s4 + $0x638] sm:$0xff] }
 0x280   : > { %2584 = vmatpush.msra.mxu1 %v4224_v36  ;;  %2595 = vmatpush.msra.mxu2 %v4249_v44  ;;  %v4293_v36 = vld [vmem:[%s8331_s4 + $0x6b8] sm:$0xff]  ;;  %v4238_v44 = vld [vmem:[%s8331_s4 + $0x500] sm:$0xff] }
 0x281   : > { %2615 = vmatpush.msra.mxu3 %v4265_v46  ;;  %2565 = vmatpush.msra.mxu0 %v4207_v52  ;;  %v4254_v46 = vld [vmem:[%s8331_s4 + $0x580] sm:$0xff]  ;;  %v4276_v52 = vld [vmem:[%s8331_s4 + $0x630] sm:$0xff] }
 0x282   : > { %2585 = vmatpush.msra.mxu1 %v4223_v53  ;;  %2596 = vmatpush.msra.mxu2 %v4248_v58  ;;  %v7312_v53 = vstv %s7257_s17  ;;  %v7315_v58 = vstv %s7265_s29 }
 0x283   : > { %2616 = vmatpush.msra.mxu3 %v4264_v59  ;;  %2566 = vmatpush.msra.mxu0 %v4206_v60  ;;  %v4292_v59 = vld [vmem:[%s8331_s4 + $0x6b0] sm:$0xff]  ;;  %v4317_v60 = vld [vmem:[%s8331_s4 + $0x778] sm:$0xff] }
 0x284   : > { %2586 = vmatpush.msra.mxu1 %v4222_v61  ;;  %2597 = vmatpush.msra.mxu2 %v4247_v62  ;;  %v4333_v61 = vld [vmem:[%s8331_s4 + $0x7f8] sm:$0xff]  ;;  %v4275_v62 = vld [vmem:[%s8331_s4 + $0x628] sm:$0xff] }
 0x285   : > { %2617 = vmatpush.msra.mxu3 %v4263_v0  ;;  %2567 = vmatmul.f32.vlgmr.msra.gmra.mxu0 %v7037_v50  ;;  %v4291_v0 = vld [vmem:[%s8331_s4 + $0x6a8] sm:$0xff] }
 0x286   : > { %2587 = vmatmul.f32.vlgmr.msra.gmra.mxu1 %v7042_v57  ;;  %2696 = vmatpush.msrb.mxu0 %v4285_v55  ;;  %v4316_v55 = vld [vmem:[%s8331_s4 + $0x770] sm:$0xff] }
 0x287   : > { %2716 = vmatpush.msrb.mxu1 %v4301_v37  ;;  %2598 = vmatpush.msra.mxu2 %v4246_v5  ;;  %v2781_v37 = vmul.f32 %v7312_v53, %v4806_v19  ;;  %v2787_v5 = vmul.f32 %v7315_v58, %v4821_v33  ;;  %v2788_v19 = vmul.f32 %v7315_v58, %v4829_v38  ;;  %v4290_v33 = vld [vmem:[%s8331_s4 + $0x6a0] sm:$0xff]  ;;  %v4273_v38 = vld [vmem:[%s8331_s4 + $0x618] sm:$0xff] }
 0x288   : > { %2618 = vmatpush.msra.mxu3 %v4262_v43  ;;  %2697 = vmatpush.msrb.mxu0 %v4284_v6  ;;  %v4332_v43 = vld [vmem:[%s8331_s4 + $0x7f0] sm:$0xff]  ;;  %v4274_v6 = vld [vmem:[%s8331_s4 + $0x620] sm:$0xff] }
 0x289   : > { %2717 = vmatpush.msrb.mxu1 %v4300_v26  ;;  %2599 = vmatpush.msra.mxu2 %v4245_v48  ;;  %v7350_v26 = vstv %s7291_s20  ;;  %v2782_v48 = vmul.f32 %v7312_v53, %v4814_v27  ;;  %v4331_v27 = vld [vmem:[%s8331_s4 + $0x7e8] sm:$0xff] }
 0x28a   : > { %2619 = vmatpush.msra.mxu3 %v4261_v9  ;;  %2698 = vmatpush.msrb.mxu0 %v4283_v11  ;;  %v4315_v9 = vld [vmem:[%s8331_s4 + $0x768] sm:$0xff]  ;;  %v4289_v11 = vld [vmem:[%s8331_s4 + $0x698] sm:$0xff] }
 0x28b   : > { %2718 = vmatpush.msrb.mxu1 %v4299_v13  ;;  %2600 = vmatpush.msra.mxu2 %v4244_v14  ;;  %v4314_v13 = vld [vmem:[%s8331_s4 + $0x760] sm:$0xff]  ;;  %v2791_v14 = vadd.f32 %v2787_v5, %v2781_v37  ;;  %v4320_v37 = vld [vmem:[%s8331_s4 + $0x790] sm:$0xff] }
 0x28c   : > { %2620 = vmatpush.msra.mxu3 %v4260_v2  ;;  %2699 = vmatpush.msrb.mxu0 %v4282_v16  ;;  %v2797_v2 = vmul.f32 %v7350_v26, %v4832_v41  ;;  %v4330_v16 = vld [vmem:[%s8331_s4 + $0x7e0] sm:$0xff]  ;;  %v4288_v41 = vld [vmem:[%s8331_s4 + $0x690] sm:$0xff] }
 0x28d   : > { %2719 = vmatpush.msrb.mxu1 %v4298_v17  ;;  %2601 = vmatpush.msra.mxu2 %v4243_v18  ;;  %v4272_v17 = vld [vmem:[%s8331_s4 + $0x610] sm:$0xff]  ;;  %v7383_v18 = vstv %s7317_s14 }
 0x28e   : > { %2621 = vmatpush.msra.mxu3 %v4259_v24  ;;  %2700 = vmatpush.msrb.mxu0 %v4281_v25  ;;  %v2792_v24 = vadd.f32 %v2788_v19, %v2782_v48  ;;  %v2798_v25 = vmul.f32 %v7350_v26, %v4842_v47  ;;  %v4271_v47 = vld [vmem:[%s8331_s4 + $0x608] sm:$0xff]  ;;  %v4343_v19 = vld [vmem:[%s8332_s5 + $0x4] sm:$0xf] }
 0x28f   : > { %2720 = vmatpush.msrb.mxu1 %v4297_v63  ;;  %2602 = vmatpush.msra.mxu2 %v4242_v12  ;;  %v4313_v63 = vld [vmem:[%s8331_s4 + $0x758] sm:$0xff]  ;;  %v4319_v48 = vld [vmem:[%s8331_s4 + $0x788] sm:$0xff] }
 0x290   : > { %2622 = vmatpush.msra.mxu3 %v4258_v10  ;;  %2701 = vmatpush.msrb.mxu0 %v4280_v30  ;;  %v4329_v12 = vld [vmem:[%s8331_s4 + $0x7d8] sm:$0xff]  ;;  %v4287_v10 = vld [vmem:[%s8331_s4 + $0x688] sm:$0xff]  ;;  %v4312_v30 = vld [vmem:[%s8331_s4 + $0x750] sm:$0xff] }
 0x291   : > { %2721 = vmatpush.msrb.mxu1 %v4296_v34  ;;  %2603 = vmatpush.msra.mxu2 %v4241_v35  ;;  %v2801_v34 = vadd.f32 %v2797_v2, %v2791_v14  ;;  %v2807_v35 = vmul.f32 %v7383_v18, %v4847_v51  ;;  %v4286_v51 = vld [vmem:[%s8331_s4 + $0x680] sm:$0xff] }
 0x292   : > { %2623 = vmatpush.msra.mxu3 %v4257_v28  ;;  %2702 = vmatpush.msrb.mxu0 %v4279_v20  ;;  %v4328_v28 = vld [vmem:[%s8331_s4 + $0x7d0] sm:$0xff]  ;;  %v4270_v20 = vld [vmem:[%s8331_s4 + $0x600] sm:$0xff] }
 0x293   : > { %2722 = vmatpush.msrb.mxu1 %v4295_v42  ;;  %2604 = vmatpush.msra.mxu2 %v4240_v4  ;;  %v2802_v42 = vadd.f32 %v2798_v25, %v2792_v24  ;;  %v2808_v4 = vmul.f32 %v7383_v18, %v4854_v56  ;;  %v4310_v56 = vld [vmem:[%s8331_s4 + $0x740] sm:$0xff]  ;;  %v3013_v24 = vld [vmem:[%s8331_s4 + $0xd0] sm:$0xff]  ;;  %v2996_v25 = vld [vmem:[%s8331_s4 + $0x48] sm:$0xff] }
 0x294   : > { %2624 = vmatpush.msra.mxu3 %v4256_v31  ;;  %2703 = vmatpush.msrb.mxu0 %v4278_v40  ;;  %v4311_v31 = vld [vmem:[%s8331_s4 + $0x748] sm:$0xff]  ;;  %v2999_v14 = vld [vmem:[%s8331_s4 + $0x60] sm:$0xff] }
 0x295   : > { %2723 = vmatpush.msrb.mxu1 %v4294_v49  ;;  %2605 = vmatpush.msra.mxu2 %v4239_v54  ;;  %v4327_v40 = vld [vmem:[%s8331_s4 + $0x7c8] sm:$0xff]  ;;  %v2811_v49 = vadd.f32 %v2807_v35, %v2801_v34  ;;  %v4326_v54 = vld [vmem:[%s8331_s4 + $0x7c0] sm:$0xff]  ;;  %v3009_v34 = vld [vmem:[%s8331_s4 + $0xb0] sm:$0xff] }
 0x296   : > { %2625 = vmatpush.msra.mxu3 %v4255_v7  ;;  %2704 = vmatpush.msrb.mxu0 %v4277_v29  ;;  %v2812_v7 = vadd.f32 %v2808_v4, %v2802_v42  ;;  %v4309_v29 = vld [vmem:[%s8331_s4 + $0x738] sm:$0xff]  ;;  %v3015_v2 = vld [vmem:[%s8331_s4 + $0xe0] sm:$0xff]  ;;  %v2992_v35 = vld [vmem:[%s8331_s4 + $0x28] sm:$0xff] }
 0x297   : > { %2724 = vmatpush.msrb.mxu1 %v4293_v36  ;;  %2606 = vmatpush.msra.mxu2 %v4238_v44  ;;  %v4325_v36 = vld [vmem:[%s8331_s4 + $0x7b8] sm:$0xff]  ;;  %v4308_v44 = vld [vmem:[%s8331_s4 + $0x730] sm:$0xff] }
 0x298   : > { %2626 = vmatpush.msra.mxu3 %v4254_v46  ;;  %2607 = vmatmul.f32.vlgmr.msra.gmra.mxu2 %v7100_v21  ;;  %v2789_v46 = vmul.f32 %v7315_v58, %v4869_v8  ;;  %v2815_v8 = vld [vmem:[%s8332_s5] sm:$0xf]  ;;  %v3050_v42 = vld [vmem:[%s8331_s4 + $0x1f8] sm:$0xff]  ;;  %v3033_v4 = vld [vmem:[%s8331_s4 + $0x170] sm:$0xff] }
 0x299   : > { %2627 = vmatmul.f32.vlgmr.msra.gmra.mxu3 %v7105_v1  ;;  %2705 = vmatpush.msrb.mxu0 %v4276_v52  ;;  %v4307_v52 = vld [vmem:[%s8331_s4 + $0x728] sm:$0xff] }
 0x29a   : > { %2725 = vmatpush.msrb.mxu1 %v4292_v59  ;;  %2736 = vmatpush.msrb.mxu2 %v4317_v60  ;;  %v2784_v59 = vmul.f32 %v7312_v53, %v4894_v39  ;;  %v2790_v60 = vmul.f32 %v7315_v58, %v4897_v3  ;;  %v4322_v39 = vld [vmem:[%s8331_s4 + $0x7a0] sm:$0xff]  ;;  %v4305_v58 = vld [vmem:[%s8331_s4 + $0x718] sm:$0xff] }
 0x29b   : > { %2756 = vmatpush.msrb.mxu3 %v4333_v61  ;;  %2706 = vmatpush.msrb.mxu0 %v4275_v62  ;;  %v4306_v61 = vld [vmem:[%s8331_s4 + $0x720] sm:$0xff] }
 0x29c   : > { %2726 = vmatpush.msrb.mxu1 %v4291_v0  ;;  %2737 = vmatpush.msrb.mxu2 %v4316_v55  ;;  %v2794_v62 = vadd.f32 %v2790_v60, %v2784_v59  ;;  %v2800_v0 = vmul.f32 %v7350_v26, %v4899_v15  ;;  %v4321_v55 = vld [vmem:[%s8331_s4 + $0x798] sm:$0xff]  ;;  %v2809_v15 = vmul.f32 %v7383_v18, %v4881_v23  ;;  %v4302_v23 = vld [vmem:[%s8331_s4 + $0x700] sm:$0xff]  ;;  %v3004_v59 = vld [vmem:[%s8331_s4 + $0x88] sm:$0xff] }
 0x29d   : > { %2757 = vmatpush.msrb.mxu3 %v4332_v43  ;;  %2707 = vmatpush.msrb.mxu0 %v4274_v6  ;;  %v4303_v43 = vld [vmem:[%s8331_s4 + $0x708] sm:$0xff]  ;;  %v3029_v60 = vld [vmem:[%s8331_s4 + $0x150] sm:$0xff] }
 0x29e   : > { %2727 = vmatpush.msrb.mxu1 %v4290_v33  ;;  %2738 = vmatpush.msrb.mxu2 %v4315_v9  ;;  %v2804_v6 = vadd.f32 %v2800_v0, %v2794_v62  ;;  %v4318_v33 = vld [vmem:[%s8331_s4 + $0x780] sm:$0xff]  ;;  %v4361_v62 = vld [vmem:[%s8331_s4 + $0x268] sm:$0xff] }
 0x29f   : > { %2758 = vmatpush.msrb.mxu3 %v4331_v27  ;;  %2708 = vmatpush.msrb.mxu0 %v4273_v38  ;;  %v3002_v27 = vld [vmem:[%s8331_s4 + $0x78] sm:$0xff]  ;;  %v4377_v0 = vld [vmem:[%s8331_s4 + $0x2e8] sm:$0xff] }
 0x2a0   : > { %2728 = vmatpush.msrb.mxu1 %v4289_v11  ;;  %2739 = vmatpush.msrb.mxu2 %v4314_v13  ;;  %v3018_v38 = vld [vmem:[%s8331_s4 + $0xf8] sm:$0xff]  ;;  %v3000_v11 = vld [vmem:[%s8331_s4 + $0x68] sm:$0xff] }
 0x2a1   : > { %2759 = vmatpush.msrb.mxu3 %v4330_v16  ;;  %2709 = vmatpush.msrb.mxu0 %v4272_v17  ;;  %v3016_v13 = vld [vmem:[%s8331_s4 + $0xe8] sm:$0xff]  ;;  %v2998_v16 = vld [vmem:[%s8331_s4 + $0x58] sm:$0xff] }
 0x2a2   : > { %2729 = vmatpush.msrb.mxu1 %v4288_v41  ;;  %2740 = vmatpush.msrb.mxu2 %v4313_v63  ;;  %v3014_v17 = vld [vmem:[%s8331_s4 + $0xd8] sm:$0xff]  ;;  %v3012_v41 = vld [vmem:[%s8331_s4 + $0xc8] sm:$0xff]  ;;  %v2995_v63 = vld [vmem:[%s8331_s4 + $0x40] sm:$0xff] }
 0x2a3   : > { %2760 = vmatpush.msrb.mxu3 %v4329_v12  ;;  %2710 = vmatpush.msrb.mxu0 %v4271_v47  ;;  %v3011_v12 = vld [vmem:[%s8331_s4 + $0xc0] sm:$0xff]  ;;  %v2994_v47 = vld [vmem:[%s8331_s4 + $0x38] sm:$0xff] }
 0x2a4   : > { %2730 = vmatpush.msrb.mxu1 %v4287_v10  ;;  %2741 = vmatpush.msrb.mxu2 %v4312_v30  ;;  %v3010_v10 = vld [vmem:[%s8331_s4 + $0xb8] sm:$0xff]  ;;  %v2993_v30 = vld [vmem:[%s8331_s4 + $0x30] sm:$0xff] }
 0x2a5   : > { %2761 = vmatpush.msrb.mxu3 %v4328_v28  ;;  %2711 = vmatpush.msrb.mxu0 %v4270_v20  ;;  %v3008_v28 = vld [vmem:[%s8331_s4 + $0xa8] sm:$0xff]  ;;  %v3034_v20 = vld [vmem:[%s8331_s4 + $0x178] sm:$0xff] }
 0x2a6   : > { %2731 = vmatpush.msrb.mxu1 %v4286_v51  ;;  %2742 = vmatpush.msrb.mxu2 %v4311_v31  ;;  %v3049_v51 = vld [vmem:[%s8331_s4 + $0x1f0] sm:$0xff]  ;;  %v2991_v31 = vld [vmem:[%s8331_s4 + $0x20] sm:$0xff] }
 0x2a7   : > { %2762 = vmatpush.msrb.mxu3 %v4327_v40  ;;  %2712 = vmatmul.f32.vlgmr.msrb.gmra.mxu0 %v7037_v50  ;;  %v4324_v50 = vld [vmem:[%s8331_s4 + $0x7b0] sm:$0xff]  ;;  %v3007_v40 = vld [vmem:[%s8331_s4 + $0xa0] sm:$0xff] }
 0x2a8   : > { %2732 = vmatmul.f32.vlgmr.msrb.gmra.mxu1 %v7042_v57  ;;  %2743 = vmatpush.msrb.mxu2 %v4310_v56  ;;  %v2783_v57 = vmul.f32 %v7312_v53, %v4819_v32  ;;  %v4323_v32 = vld [vmem:[%s8331_s4 + $0x7a8] sm:$0xff]  ;;  %v2799_v53 = vmul.f32 %v7350_v26, %v4879_v22  ;;  %v4304_v22 = vld [vmem:[%s8331_s4 + $0x710] sm:$0xff]  ;;  %v2810_v26 = vmul.f32 %v7383_v18, %v4911_v45 }
 0x2a9   : > { %2763 = vmatpush.msrb.mxu3 %v4326_v54  ;;  %2834 = vmatpush.msra.mxu0 %v2811_v49  ;;  %v2997_v18 = vld [vmem:[%s8331_s4 + $0x50] sm:$0xff]  ;;  %v3032_v56 = vld [vmem:[%s8331_s4 + $0x168] sm:$0xff]  ;;  %v2990_v54 = vld [vmem:[%s8331_s4 + $0x18] sm:$0xff] }
 0x2aa   : > { %2744 = vmatpush.msrb.mxu2 %v4309_v29  ;;  %2854 = vmatpush.msra.mxu1 %v2812_v7  ;;  %v2793_v3 = vadd.f32 %v2789_v46, %v2783_v57  ;;  %v2814_v9 = vadd.f32 %v2810_v26, %v2804_v6  ;;  %v3031_v29 = vld [vmem:[%s8331_s4 + $0x160] sm:$0xff]  ;;  %v3030_v57 = vld [vmem:[%s8331_s4 + $0x158] sm:$0xff] }
 0x2ab   : > { %2764 = vmatpush.msrb.mxu3 %v4325_v36  ;;  %2918 = vmatpush.msrb.mxu0 %v2811_v49  ;;  %v3048_v49 = vld [vmem:[%s8331_s4 + $0x1e8] sm:$0xff]  ;;  %v3047_v36 = vld [vmem:[%s8331_s4 + $0x1e0] sm:$0xff]  ;;  %v3046_v46 = vld [vmem:[%s8331_s4 + $0x1d8] sm:$0xff] }
 0x2ac   : > { %2745 = vmatpush.msrb.mxu2 %v4308_v44  ;;  %2938 = vmatpush.msrb.mxu1 %v2812_v7  ;;  %v2803_v5 = vadd.f32 %v2799_v53, %v2793_v3  ;;  %v3006_v7 = vld [vmem:[%s8331_s4 + $0x98] sm:$0xff]  ;;  %v2989_v44 = vld [vmem:[%s8331_s4 + $0x10] sm:$0xff] }
 0x2ad   : > { %2765 = vmatpush.msrb.mxu3 %v4324_v50  ;;  %v3005_v50 = vld [vmem:[%s8331_s4 + $0x90] sm:$0xff]  ;;  %v4379_v3 = vld [vmem:[%s8331_s4 + $0x2f8] sm:$0xff] }
 0x2ae   : > { %2746 = vmatpush.msrb.mxu2 %v4307_v52  ;;  %v2813_v45 = vadd.f32 %v2809_v15, %v2803_v5  ;;  %v2988_v52 = vld [vmem:[%s8331_s4 + $0x8] sm:$0xff]  ;;  %v4362_v53 = vld [vmem:[%s8331_s4 + $0x270] sm:$0xff]  ;;  %v4376_v5 = vld [vmem:[%s8331_s4 + $0x2e0] sm:$0xff] }
 0x2af   : > { %2766 = vmatpush.msrb.mxu3 %v4323_v32  ;;  %4339 = vmatmul.msk.f32.vlgmr.msra.gmra.mxu0 %vm445_vm0, %v2815_v8  ;;  %v3045_v32 = vld [vmem:[%s8331_s4 + $0x1d0] sm:$0xff]  ;;  %v3027_v15 = vld [vmem:[%s8331_s4 + $0x140] sm:$0xff]  ;;  %v4359_v6 = vld [vmem:[%s8331_s4 + $0x258] sm:$0xff] }
 0x2b0   : > { %4340 = vmatmul.msk.f32.vlgmr.msra.gmra.mxu1 %vm445_vm0, %v2815_v8  ;;  %2747 = vmatpush.msrb.mxu2 %v4306_v61  ;;  %v3003_v61 = vld [vmem:[%s8331_s4 + $0x80] sm:$0xff]  ;;  %v4375_v26 = vld [vmem:[%s8331_s4 + $0x2d8] sm:$0xff] }
 0x2b1   : > { %2767 = vmatpush.msrb.mxu3 %v4322_v39  ;;  %3051 = vmatpush.msra.mxu0 %v3002_v27  ;;  %v4363_v39 = vld [vmem:[%s8331_s4 + $0x278] sm:$0xff]  ;;  %v4357_v27 = vld [vmem:[%s8331_s4 + $0x248] sm:$0xff] }
 0x2b2   : > { %2748 = vmatpush.msrb.mxu2 %v4305_v58  ;;  %3071 = vmatpush.msra.mxu1 %v3018_v38  ;;  %v4378_v58 = vld [vmem:[%s8331_s4 + $0x2f0] sm:$0xff]  ;;  %v4373_v38 = vld [vmem:[%s8331_s4 + $0x2c8] sm:$0xff] }
 0x2b3   : > { %2768 = vmatpush.msrb.mxu3 %v4321_v55  ;;  %v3028_v55 = vld [vmem:[%s8331_s4 + $0x148] sm:$0xff] }
 0x2b4   : > { %2749 = vmatpush.msrb.mxu2 %v4304_v22  ;;  %v3044_v22 = vld [vmem:[%s8331_s4 + $0x1c8] sm:$0xff] }
 0x2b5   : > { %2769 = vmatpush.msrb.mxu3 %v4320_v37  ;;  %v4360_v37 = vld [vmem:[%s8331_s4 + $0x260] sm:$0xff] }
 0x2b6   : > { %2750 = vmatpush.msrb.mxu2 %v4303_v43  ;;  %v3043_v43 = vld [vmem:[%s8331_s4 + $0x1c0] sm:$0xff] }
 0x2b7   : > { %2770 = vmatpush.msrb.mxu3 %v4319_v48  ;;  %4344 = vmatmul.msk.f32.vlgmr.msrb.gmra.mxu0 %vm445_vm0, %v4343_v19  ;;  %v3026_v48 = vld [vmem:[%s8331_s4 + $0x138] sm:$0xff] }
 0x2b8   : > { %4345 = vmatmul.msk.f32.vlgmr.msrb.gmra.mxu1 %vm445_vm0, %v4343_v19  ;;  %2751 = vmatpush.msrb.mxu2 %v4302_v23  ;;  %v4358_v23 = vld [vmem:[%s8331_s4 + $0x250] sm:$0xff] }
 0x2b9   : > { %2771 = vmatpush.msrb.mxu3 %v4318_v33  ;;  %2752 = vmatmul.f32.vlgmr.msrb.gmra.mxu2 %v7100_v21  ;;  %v3001_v21 = vld [vmem:[%s8331_s4 + $0x70] sm:$0xff] }
 0x2ba   : > { %2772 = vmatmul.f32.vlgmr.msrb.gmra.mxu3 %v7105_v1  ;;  %2874 = vmatpush.msra.mxu2 %v2813_v45  ;;  %v3017_v1 = vld [vmem:[%s8331_s4 + $0xf0] sm:$0xff] }
 0x2bb   : > { %2894 = vmatpush.msra.mxu3 %v2814_v9  ;;  %3052 = vmatpush.msra.mxu0 %v3001_v21  ;;  %v4374_v33 = vld [vmem:[%s8331_s4 + $0x2d0] sm:$0xff]  ;;  %v3024_v21 = vld [vmem:[%s8331_s4 + $0x128] sm:$0xff] }
 0x2bc   : > { %2958 = vmatpush.msrb.mxu2 %v2813_v45  ;;  %3072 = vmatpush.msra.mxu1 %v3017_v1  ;;  %v3025_v45 = vld [vmem:[%s8331_s4 + $0x130] sm:$0xff]  ;;  %v3040_v1 = vld [vmem:[%s8331_s4 + $0x1a8] sm:$0xff] }
 0x2bd   : > { %2978 = vmatpush.msrb.mxu3 %v2814_v9  ;;  %3053 = vmatpush.msra.mxu0 %v3000_v11  ;;  %v3041_v9 = vld [vmem:[%s8331_s4 + $0x1b0] sm:$0xff]  ;;  %v4356_v11 = vld [vmem:[%s8331_s4 + $0x240] sm:$0xff] }
 0x2be   : > { %3073 = vmatpush.msra.mxu1 %v3016_v13  ;;  %v4372_v13 = vld [vmem:[%s8331_s4 + $0x2c0] sm:$0xff] }
 0x2bf   : > { %3054 = vmatpush.msra.mxu0 %v2999_v14  ;;  %v3023_v14 = vld [vmem:[%s8331_s4 + $0x120] sm:$0xff] }
 0x2c0   : > { %3074 = vmatpush.msra.mxu1 %v3015_v2  ;;  %v3039_v2 = vld [vmem:[%s8331_s4 + $0x1a0] sm:$0xff] }
 0x2c1   : > { %4341 = vmatmul.msk.f32.vlgmr.msra.gmra.mxu2 %vm445_vm0, %v2815_v8  ;;  %3055 = vmatpush.msra.mxu0 %v2998_v16  ;;  %v4355_v16 = vld [vmem:[%s8331_s4 + $0x238] sm:$0xff] }
 0x2c2   : > { %4342 = vmatmul.msk.f32.vlgmr.msra.gmra.mxu3 %vm445_vm0, %v2815_v8  ;;  %3075 = vmatpush.msra.mxu1 %v3014_v17  ;;  %v2987_v8 = vld [vmem:[%s8331_s4] sm:$0xff]  ;;  %v4371_v17 = vld [vmem:[%s8331_s4 + $0x2b8] sm:$0xff] }
 0x2c3   : > { %3056 = vmatpush.msra.mxu0 %v2997_v18  ;;  %3091 = vmatpush.msra.mxu2 %v3034_v20  ;;  %v3022_v18 = vld [vmem:[%s8331_s4 + $0x118] sm:$0xff]  ;;  %v4352_v20 = vld [vmem:[%s8331_s4 + $0x220] sm:$0xff] }
 0x2c4   : > { %3076 = vmatpush.msra.mxu1 %v3013_v24  ;;  %3111 = vmatpush.msra.mxu3 %v3050_v42  ;;  %v3038_v24 = vld [vmem:[%s8331_s4 + $0x198] sm:$0xff]  ;;  %v4368_v42 = vld [vmem:[%s8331_s4 + $0x2a0] sm:$0xff] }
 0x2c5   : > { %3057 = vmatpush.msra.mxu0 %v2996_v25  ;;  %3092 = vmatpush.msra.mxu2 %v3033_v4  ;;  %v4354_v25 = vld [vmem:[%s8331_s4 + $0x230] sm:$0xff]  ;;  %v3019_v4 = vld [vmem:[%s8331_s4 + $0x100] sm:$0xff] }
 0x2c6   : > { %3077 = vmatpush.msra.mxu1 %v3012_v41  ;;  %3112 = vmatpush.msra.mxu3 %v3049_v51  ;;  %v4370_v41 = vld [vmem:[%s8331_s4 + $0x2b0] sm:$0xff]  ;;  %v3035_v51 = vld [vmem:[%s8331_s4 + $0x180] sm:$0xff] }
 0x2c7   : > { %3058 = vmatpush.msra.mxu0 %v2995_v63  ;;  %3093 = vmatpush.msra.mxu2 %v3032_v56  ;;  %v3021_v63 = vld [vmem:[%s8331_s4 + $0x110] sm:$0xff]  ;;  %v4395_v56 = vld [vmem:[%s8331_s4 + $0x378] sm:$0xff] }
 0x2c8   : > { %3078 = vmatpush.msra.mxu1 %v3011_v12  ;;  %3113 = vmatpush.msra.mxu3 %v3048_v49  ;;  %v3037_v12 = vld [vmem:[%s8331_s4 + $0x190] sm:$0xff]  ;;  %v4411_v49 = vld [vmem:[%s8331_s4 + $0x3f8] sm:$0xff] }
 0x2c9   : > { %4346 = vmatmul.msk.f32.vlgmr.msrb.gmra.mxu2 %vm445_vm0, %v4343_v19  ;;  %3059 = vmatpush.msra.mxu0 %v2994_v47 }
 0x2ca   : > { %4347 = vmatmul.msk.f32.vlgmr.msrb.gmra.mxu3 %vm445_vm0, %v4343_v19  ;;  %3079 = vmatpush.msra.mxu1 %v3010_v10  ;;  %v3042_v19 = vld [vmem:[%s8331_s4 + $0x1b8] sm:$0xff] }
 0x2cb   : > { %3060 = vmatpush.msra.mxu0 %v2993_v30  ;;  %3094 = vmatpush.msra.mxu2 %v3031_v29  ;;  %v4353_v30 = vld [vmem:[%s8331_s4 + $0x228] sm:$0xff]  ;;  %v4394_v29 = vld [vmem:[%s8331_s4 + $0x370] sm:$0xff] }
 0x2cc   : > { %3080 = vmatpush.msra.mxu1 %v3009_v34  ;;  %3114 = vmatpush.msra.mxu3 %v3047_v36  ;;  %v4369_v34 = vld [vmem:[%s8331_s4 + $0x2a8] sm:$0xff]  ;;  %v4410_v36 = vld [vmem:[%s8331_s4 + $0x3f0] sm:$0xff] }
 0x2cd   : > { %3061 = vmatpush.msra.mxu0 %v2992_v35  ;;  %3095 = vmatpush.msra.mxu2 %v3030_v57  ;;  %v3020_v35 = vld [vmem:[%s8331_s4 + $0x108] sm:$0xff] }
 0x2ce   : > { %3081 = vmatpush.msra.mxu1 %v3008_v28  ;;  %3115 = vmatpush.msra.mxu3 %v3046_v46  ;;  %v3036_v28 = vld [vmem:[%s8331_s4 + $0x188] sm:$0xff] }
 0x2cf   : > { %3062 = vmatpush.msra.mxu0 %v2991_v31  ;;  %3096 = vmatpush.msra.mxu2 %v3029_v60  ;;  %v4351_v31 = vld [vmem:[%s8331_s4 + $0x218] sm:$0xff]  ;;  %v4365_v57 = vld [vmem:[%s8331_s4 + $0x288] sm:$0xff]  ;;  %v4348_v60 = vld [vmem:[%s8331_s4 + $0x200] sm:$0xff] }
 0x2d0   : > { %3082 = vmatpush.msra.mxu1 %v3007_v40  ;;  %3116 = vmatpush.msra.mxu3 %v3045_v32  ;;  %v4367_v40 = vld [vmem:[%s8331_s4 + $0x298] sm:$0xff]  ;;  %v4393_v46 = vld [vmem:[%s8331_s4 + $0x368] sm:$0xff]  ;;  %v4364_v32 = vld [vmem:[%s8331_s4 + $0x280] sm:$0xff] }
 0x2d1   : > { %3063 = vmatpush.msra.mxu0 %v2990_v54  ;;  %3097 = vmatpush.msra.mxu2 %v3028_v55  ;;  %v4350_v54 = vld [vmem:[%s8331_s4 + $0x210] sm:$0xff]  ;;  %v4389_v55 = vld [vmem:[%s8331_s4 + $0x348] sm:$0xff] }
 0x2d2   : > { %3083 = vmatpush.msra.mxu1 %v3006_v7  ;;  %3117 = vmatpush.msra.mxu3 %v3044_v22  ;;  %v4366_v7 = vld [vmem:[%s8331_s4 + $0x290] sm:$0xff]  ;;  %v4405_v22 = vld [vmem:[%s8331_s4 + $0x3c8] sm:$0xff] }
 0x2d3   : > { %3064 = vmatpush.msra.mxu0 %v2989_v44  ;;  %3098 = vmatpush.msra.mxu2 %v3027_v15  ;;  %v4387_v15 = vld [vmem:[%s8331_s4 + $0x338] sm:$0xff] }
 0x2d4   : > { %3084 = vmatpush.msra.mxu1 %v3005_v50  ;;  %3118 = vmatpush.msra.mxu3 %v3043_v43  ;;  %v4349_v50 = vld [vmem:[%s8331_s4 + $0x208] sm:$0xff]  ;;  %v4403_v43 = vld [vmem:[%s8331_s4 + $0x3b8] sm:$0xff] }
 0x2d5   : > { %3065 = vmatpush.msra.mxu0 %v2988_v52  ;;  %3099 = vmatpush.msra.mxu2 %v3026_v48  ;;  %v4386_v48 = vld [vmem:[%s8331_s4 + $0x330] sm:$0xff] }
 0x2d6   : > { %3085 = vmatpush.msra.mxu1 %v3004_v59  ;;  %3119 = vmatpush.msra.mxu3 %v3042_v19  ;;  %v4409_v59 = vld [vmem:[%s8331_s4 + $0x3e8] sm:$0xff]  ;;  %v4402_v19 = vld [vmem:[%s8331_s4 + $0x3b0] sm:$0xff] }
 0x2d7   : > { %3066 = vmatpush.msra.mxu0 %v2987_v8  ;;  %3100 = vmatpush.msra.mxu2 %v3025_v45  ;;  %v4392_v8 = vld [vmem:[%s8331_s4 + $0x360] sm:$0xff]  ;;  %v4385_v45 = vld [vmem:[%s8331_s4 + $0x328] sm:$0xff] }
 0x2d8   : > { %3086 = vmatpush.msra.mxu1 %v3003_v61  ;;  %3120 = vmatpush.msra.mxu3 %v3041_v9  ;;  %v4408_v61 = vld [vmem:[%s8331_s4 + $0x3e0] sm:$0xff]  ;;  %v4401_v9 = vld [vmem:[%s8331_s4 + $0x3a8] sm:$0xff] }
 0x2d9   : > { %3195 = vmatpush.msrb.mxu0 %v4363_v39  ;;  %3101 = vmatpush.msra.mxu2 %v3024_v21  ;;  %v4391_v39 = vld [vmem:[%s8331_s4 + $0x358] sm:$0xff] }
 0x2da   : > { %3215 = vmatpush.msrb.mxu1 %v4379_v3  ;;  %3121 = vmatpush.msra.mxu3 %v3040_v1  ;;  %v4407_v3 = vld [vmem:[%s8331_s4 + $0x3d8] sm:$0xff] }
 0x2db   : > { %3196 = vmatpush.msrb.mxu0 %v4362_v53  ;;  %3102 = vmatpush.msra.mxu2 %v3023_v14  ;;  %v4390_v53 = vld [vmem:[%s8331_s4 + $0x350] sm:$0xff]  ;;  %v4383_v21 = vld [vmem:[%s8331_s4 + $0x318] sm:$0xff] }
 0x2dc   : > { %3216 = vmatpush.msrb.mxu1 %v4378_v58  ;;  %3122 = vmatpush.msra.mxu3 %v3039_v2  ;;  %v4406_v58 = vld [vmem:[%s8331_s4 + $0x3d0] sm:$0xff]  ;;  %v4399_v1 = vld [vmem:[%s8331_s4 + $0x398] sm:$0xff] }
 0x2dd   : > { %3197 = vmatpush.msrb.mxu0 %v4361_v62  ;;  %3103 = vmatpush.msra.mxu2 %v3022_v18  ;;  %v4381_v18 = vld [vmem:[%s8331_s4 + $0x308] sm:$0xff] }
 0x2de   : > { %3217 = vmatpush.msrb.mxu1 %v4377_v0  ;;  %3123 = vmatpush.msra.mxu3 %v3038_v24  ;;  %v4397_v24 = vld [vmem:[%s8331_s4 + $0x388] sm:$0xff] }
 0x2df   : > { %3198 = vmatpush.msrb.mxu0 %v4360_v37  ;;  %3104 = vmatpush.msra.mxu2 %v3021_v63  ;;  %v4388_v37 = vld [vmem:[%s8331_s4 + $0x340] sm:$0xff] }
 0x2e0   : > { %3218 = vmatpush.msrb.mxu1 %v4376_v5  ;;  %v7752_v47 = vpop.f32.mrf.mxu0  ;;  %3124 = vmatpush.msra.mxu3 %v3037_v12  ;;  %v4404_v5 = vld [vmem:[%s8331_s4 + $0x3c0] sm:$0xff] }
 0x2e1   : > { %3199 = vmatpush.msrb.mxu0 %v4359_v6  ;;  %v7754_v10 = vpop.f32.mrf.mxu1  ;;  %3105 = vmatpush.msra.mxu2 %v3020_v35 }
 0x2e2   : > { %3219 = vmatpush.msrb.mxu1 %v4375_v26  ;;  %3125 = vmatpush.msra.mxu3 %v3036_v28 }
 0x2e3   : > { %3200 = vmatpush.msrb.mxu0 %v4358_v23  ;;  %3106 = vmatpush.msra.mxu2 %v3019_v4 }
 0x2e4   : > { %3220 = vmatpush.msrb.mxu1 %v4374_v33  ;;  %3126 = vmatpush.msra.mxu3 %v3035_v51  ;;  %v4427_v51 = vld [vmem:[%s8331_s4 + $0x478] sm:$0xff] }
 0x2e5   : > { %3201 = vmatpush.msrb.mxu0 %v4357_v27  ;;  %3235 = vmatpush.msrb.mxu2 %v4395_v56  ;;  %v4384_v27 = vld [vmem:[%s8331_s4 + $0x320] sm:$0xff] }
 0x2e6   : > { %3221 = vmatpush.msrb.mxu1 %v4373_v38  ;;  %3255 = vmatpush.msrb.mxu3 %v4411_v49  ;;  %v4400_v38 = vld [vmem:[%s8331_s4 + $0x3a0] sm:$0xff] }
 0x2e7   : > { %3202 = vmatpush.msrb.mxu0 %v4356_v11  ;;  %3236 = vmatpush.msrb.mxu2 %v4394_v29  ;;  %v4382_v11 = vld [vmem:[%s8331_s4 + $0x310] sm:$0xff]  ;;  %v4441_v29 = vld [vmem:[%s8331_s4 + $0x4e8] sm:$0xff] }
 0x2e8   : > { %3222 = vmatpush.msrb.mxu1 %v4372_v13  ;;  %v7804_v44 = vpop.f32.mrf.mxu0  ;;  %3256 = vmatpush.msrb.mxu3 %v4410_v36  ;;  %v4398_v13 = vld [vmem:[%s8331_s4 + $0x390] sm:$0xff] }
 0x2e9   : > { %3203 = vmatpush.msrb.mxu0 %v4355_v16  ;;  %v7815_v52 = vpop.f32.mrf.mxu1  ;;  %3237 = vmatpush.msrb.mxu2 %v4393_v46 }
 0x2ea   : > { %3223 = vmatpush.msrb.mxu1 %v4371_v17  ;;  %3257 = vmatpush.msrb.mxu3 %v4409_v59  ;;  %v2444_v63 = vadd.f32 %v7815_v52, %v7804_v44  ;;  %v4440_v52 = vld [vmem:[%s8331_s4 + $0x4e0] sm:$0xff] }
 0x2eb   : > { %3204 = vmatpush.msrb.mxu0 %v4354_v25  ;;  %3238 = vmatpush.msrb.mxu2 %v4392_v8  ;;  %v4380_v25 = vld [vmem:[%s8331_s4 + $0x300] sm:$0xff]  ;;  %v4423_v8 = vld [vmem:[%s8331_s4 + $0x458] sm:$0xff] }
 0x2ec   : > { %3224 = vmatpush.msrb.mxu1 %v4370_v41  ;;  %3258 = vmatpush.msrb.mxu3 %v4408_v61  ;;  %v4396_v41 = vld [vmem:[%s8331_s4 + $0x380] sm:$0xff]  ;;  %v4439_v61 = vld [vmem:[%s8331_s4 + $0x4d8] sm:$0xff] }
 0x2ed   : > { %3205 = vmatpush.msrb.mxu0 %v4353_v30  ;;  %3239 = vmatpush.msrb.mxu2 %v4391_v39 }
 0x2ee   : > { %3225 = vmatpush.msrb.mxu1 %v4369_v34  ;;  %3259 = vmatpush.msrb.mxu3 %v4407_v3  ;;  %v2300_v34 = vadd.f32 %v7754_v10, %v7752_v47  ;;  %v4426_v47 = vld [vmem:[%s8331_s4 + $0x470] sm:$0xff] }
 0x2ef   : > { %3206 = vmatpush.msrb.mxu0 %v4352_v20  ;;  %3240 = vmatpush.msrb.mxu2 %v4390_v53  ;;  %v4442_v10 = vld [vmem:[%s8331_s4 + $0x4f0] sm:$0xff] }
 0x2f0   : > { %3226 = vmatpush.msrb.mxu1 %v4368_v42  ;;  %3260 = vmatpush.msrb.mxu3 %v4406_v58  ;;  %v4422_v53 = vld [vmem:[%s8331_s4 + $0x450] sm:$0xff] }
 0x2f1   : > { %3207 = vmatpush.msrb.mxu0 %v4351_v31  ;;  %3241 = vmatpush.msrb.mxu2 %v4389_v55  ;;  %v4438_v58 = vld [vmem:[%s8331_s4 + $0x4d0] sm:$0xff]  ;;  %v4437_v55 = vld [vmem:[%s8331_s4 + $0x4c8] sm:$0xff] }
 0x2f2   : > { %3227 = vmatpush.msrb.mxu1 %v4367_v40  ;;  %3261 = vmatpush.msrb.mxu3 %v4405_v22  ;;  %v4443_v40 = vld [vmem:[%s8331_s4 + $0x4f8] sm:$0xff]  ;;  %v4420_v22 = vld [vmem:[%s8331_s4 + $0x440] sm:$0xff] }
 0x2f3   : > { %3208 = vmatpush.msrb.mxu0 %v4350_v54  ;;  %3242 = vmatpush.msrb.mxu2 %v4388_v37 }
 0x2f4   : > { %3228 = vmatpush.msrb.mxu1 %v4366_v7  ;;  %3262 = vmatpush.msrb.mxu3 %v4404_v5  ;;  %v4425_v7 = vld [vmem:[%s8331_s4 + $0x468] sm:$0xff]  ;;  %v4436_v5 = vld [vmem:[%s8331_s4 + $0x4c0] sm:$0xff] }
 0x2f5   : > { %3209 = vmatpush.msrb.mxu0 %v4349_v50  ;;  %3243 = vmatpush.msrb.mxu2 %v4387_v15 }
 0x2f6   : > { %3229 = vmatpush.msrb.mxu1 %v4365_v57  ;;  %3263 = vmatpush.msrb.mxu3 %v4403_v43  ;;  %v4424_v57 = vld [vmem:[%s8331_s4 + $0x460] sm:$0xff]  ;;  %v4419_v43 = vld [vmem:[%s8331_s4 + $0x438] sm:$0xff] }
 0x2f7   : > { %3210 = vmatpush.msrb.mxu0 %v4348_v60  ;;  %3244 = vmatpush.msrb.mxu2 %v4386_v48  ;;  %v4434_v48 = vld [vmem:[%s8331_s4 + $0x4b0] sm:$0xff] }
 0x2f8   : > { %3230 = vmatpush.msrb.mxu1 %v4364_v32  ;;  %v2319_v6 = vpop.f32.mrf.mxu2  ;;  %3264 = vmatpush.msrb.mxu3 %v4402_v19  ;;  %v4417_v19 = vld [vmem:[%s8331_s4 + $0x428] sm:$0xff] }
 0x2f9   : > { %v2339_v26 = vpop.f32.mrf.mxu3  ;;  %3245 = vmatpush.msrb.mxu2 %v4385_v45  ;;  %v2320_v56 = vadd.f32 %v2319_v6, %v2300_v34  ;;  %v4435_v6 = vld [vmem:[%s8331_s4 + $0x4b8] sm:$0xff]  ;;  %v4456_v34 = vld [vmem:[%s8331_s4 + $0x560] sm:$0xff] }
 0x2fa   : > { %3265 = vmatpush.msrb.mxu3 %v4401_v9  ;;  %v4432_v9 = vld [vmem:[%s8331_s4 + $0x4a0] sm:$0xff] }
 0x2fb   : > { %3246 = vmatpush.msrb.mxu2 %v4384_v27  ;;  %v2340_v36 = vadd.f32 %v2339_v26, %v2320_v56  ;;  %v4418_v26 = vld [vmem:[%s8331_s4 + $0x430] sm:$0xff] }
 0x2fc   : > { %3266 = vmatpush.msrb.mxu3 %v4400_v38  ;;  %v4506_v56 = vld [vmem:[%s8331_s4 + $0x6f0] sm:$0xff] }
 0x2fd   : > { %3247 = vmatpush.msrb.mxu2 %v4383_v21  ;;  %v4415_v21 = vld [vmem:[%s8331_s4 + $0x418] sm:$0xff] }
 0x2fe   : > { %3267 = vmatpush.msrb.mxu3 %v4399_v1 }
 0x2ff   : > { %3248 = vmatpush.msrb.mxu2 %v4382_v11  ;;  %v4431_v11 = vld [vmem:[%s8331_s4 + $0x498] sm:$0xff] }
 0x300   : > { %3268 = vmatpush.msrb.mxu3 %v4398_v13  ;;  %v4459_v13 = vld [vmem:[%s8331_s4 + $0x578] sm:$0xff] }
 0x301   : > { %v2463_v14 = vpop.f32.mrf.mxu2  ;;  %3249 = vmatpush.msrb.mxu2 %v4381_v18  ;;  %v4474_v18 = vld [vmem:[%s8331_s4 + $0x5f0] sm:$0xff] }
 0x302   : > { %v2568_v62 = vpop.f32.mrf.mxu0  ;;  %v2483_v16 = vpop.f32.mrf.mxu3  ;;  %3269 = vmatpush.msrb.mxu3 %v4397_v24  ;;  %v2464_v28 = vadd.f32 %v2463_v14, %v2444_v63  ;;  %v4475_v14 = vld [vmem:[%s8331_s4 + $0x5f8] sm:$0xff]  ;;  %v4413_v24 = vld [vmem:[%s8331_s4 + $0x408] sm:$0xff] }
 0x303   : > { %v2588_v0 = vpop.f32.mrf.mxu1  ;;  %3250 = vmatpush.msrb.mxu2 %v4380_v25  ;;  %v4429_v25 = vld [vmem:[%s8331_s4 + $0x488] sm:$0xff] }
 0x304   : > { %3270 = vmatpush.msrb.mxu3 %v4396_v41  ;;  %v2589_v35 = vadd.f32 %v2588_v0, %v2568_v62  ;;  %v2484_v54 = vadd.f32 %v2483_v16, %v2464_v28  ;;  %v4421_v0 = vld [vmem:[%s8331_s4 + $0x448] sm:$0xff]  ;;  %v4430_v16 = vld [vmem:[%s8331_s4 + $0x490] sm:$0xff]  ;;  %v4491_v28 = vld [vmem:[%s8331_s4 + $0x678] sm:$0xff] }
 0x305   : > { %v4457_v41 = vld [vmem:[%s8331_s4 + $0x568] sm:$0xff] }
 0x306   : > { %v2486_v59 = vmax.f32 %v2340_v36, %v2484_v54  ;;  %v4473_v63 = vld [vmem:[%s8331_s4 + $0x5e8] sm:$0xff]  ;;  %v4488_v36 = vld [vmem:[%s8331_s4 + $0x660] sm:$0xff] }
 0x307   : > { %v4505_v54 = vld [vmem:[%s8331_s4 + $0x6e8] sm:$0xff] }
 0x31b   : > { %v2608_v12 = vpop.f32.mrf.mxu2 }
 0x31c   : > { %v2628_v20 = vpop.f32.mrf.mxu3  ;;  %v2609_v49 = vadd.f32 %v2608_v12, %v2589_v35  ;;  %v4412_v12 = vld [vmem:[%s8331_s4 + $0x400] sm:$0xff] }
 0x31d   : > { %v4472_v35 = vld [vmem:[%s8331_s4 + $0x5e0] sm:$0xff] }
 0x31e   : > { %v2629_v44 = vadd.f32 %v2628_v20, %v2609_v49  ;;  %v4507_v20 = vld [vmem:[%s8331_s4 + $0x6f8] sm:$0xff]  ;;  %v4454_v49 = vld [vmem:[%s8331_s4 + $0x550] sm:$0xff] }
 0x320   : > { %v2631_v39 = vmax.f32 %v2486_v59, %v2629_v44  ;;  %v4504_v44 = vld [vmem:[%s8331_s4 + $0x6e0] sm:$0xff]  ;;  %v4451_v59 = vld [vmem:[%s8331_s4 + $0x538] sm:$0xff] }
 0x324   : > { %v2713_v23 = vpop.f32.mrf.mxu0 }
 0x325   : > { %v2733_v33 = vpop.f32.mrf.mxu1 }
 0x326   : > { %v2734_v50 = vadd.f32 %v2733_v33, %v2713_v23  ;;  %v4433_v23 = vld [vmem:[%s8331_s4 + $0x4a8] sm:$0xff]  ;;  %v4416_v33 = vld [vmem:[%s8331_s4 + $0x420] sm:$0xff] }
 0x32c   : > { %v2836_v2 = vpop.f32.mrf.mxu0 }
 0x32d   : > { %v2856_v17 = vpop.f32.mrf.mxu1 }
 0x334   : > { %v2920_v30 = vpop.f32.mrf.mxu0 }
 0x335   : > { %v7908_v42 = vmax.f32 %v2836_v2, %v2920_v30  ;;  %v2940_v4 = vpop.f32.mrf.mxu1  ;;  %v4414_v2 = vld [vmem:[%s8331_s4 + $0x410] sm:$0xff]  ;;  %v4428_v30 = vld [vmem:[%s8331_s4 + $0x480] sm:$0xff] }
 0x336   : > { %v7913_v31 = vmax.f32 %v2856_v17, %v2940_v4  ;;  %v4458_v17 = vld [vmem:[%s8331_s4 + $0x570] sm:$0xff]  ;;  %v4455_v4 = vld [vmem:[%s8331_s4 + $0x558] sm:$0xff] }
 0x337   : > { %3067 = vmatmul.f32.vlgmr.msra.gmra.mxu0 %v7908_v42 }
 0x338   : > { %3087 = vmatmul.f32.vlgmr.msra.gmra.mxu1 %v7913_v31  ;;  %3340 = vmatpush.msra.mxu0 %v4427_v51  ;;  %v4471_v51 = vld [vmem:[%s8331_s4 + $0x5d8] sm:$0xff] }
 0x339   : > { %3360 = vmatpush.msra.mxu1 %v4443_v40  ;;  %v4490_v40 = vld [vmem:[%s8331_s4 + $0x670] sm:$0xff] }
 0x33a   : > { %3341 = vmatpush.msra.mxu0 %v4426_v47  ;;  %v4470_v47 = vld [vmem:[%s8331_s4 + $0x5d0] sm:$0xff] }
 0x33b   : > { %3361 = vmatpush.msra.mxu1 %v4442_v10  ;;  %v4489_v10 = vld [vmem:[%s8331_s4 + $0x668] sm:$0xff] }
 0x33c   : > { %3342 = vmatpush.msra.mxu0 %v4425_v7  ;;  %v2753_v46 = vpop.f32.mrf.mxu2  ;;  %v4453_v7 = vld [vmem:[%s8331_s4 + $0x548] sm:$0xff] }
 0x33d   : > { %3362 = vmatpush.msra.mxu1 %v4441_v29  ;;  %v2754_v60 = vadd.f32 %v2753_v46, %v2734_v50  ;;  %v2773_v32 = vpop.f32.mrf.mxu3  ;;  %v4469_v29 = vld [vmem:[%s8331_s4 + $0x5c8] sm:$0xff]  ;;  %v4452_v50 = vld [vmem:[%s8331_s4 + $0x540] sm:$0xff]  ;;  %v4487_v46 = vld [vmem:[%s8331_s4 + $0x658] sm:$0xff] }
 0x33e   : > { %3343 = vmatpush.msra.mxu0 %v4424_v57  ;;  %v4468_v57 = vld [vmem:[%s8331_s4 + $0x5c0] sm:$0xff] }
 0x33f   : > { %v2774_v3 = vadd.f32 %v2773_v32, %v2754_v60  ;;  %3363 = vmatpush.msra.mxu1 %v4440_v52  ;;  %3211 = vmatmul.f32.vlgmr.msrb.gmra.mxu0 %v7908_v42  ;;  %v4503_v52 = vld [vmem:[%s8331_s4 + $0x6d8] sm:$0xff]  ;;  %v4486_v32 = vld [vmem:[%s8331_s4 + $0x650] sm:$0xff] }
 0x340   : > { %3344 = vmatpush.msra.mxu0 %v4423_v8  ;;  %3231 = vmatmul.f32.vlgmr.msrb.gmra.mxu1 %v7913_v31  ;;  %v4467_v60 = vld [vmem:[%s8331_s4 + $0x5b8] sm:$0xff]  ;;  %v4502_v8 = vld [vmem:[%s8331_s4 + $0x6d0] sm:$0xff] }
 0x341   : > { %v2776_v62 = vmax.f32 %v2631_v39, %v2774_v3  ;;  %3364 = vmatpush.msra.mxu1 %v4439_v61  ;;  %v4450_v61 = vld [vmem:[%s8331_s4 + $0x530] sm:$0xff]  ;;  %v4485_v3 = vld [vmem:[%s8331_s4 + $0x648] sm:$0xff] }
 0x342   : > { %3345 = vmatpush.msra.mxu0 %v4422_v53  ;;  %v4466_v39 = vld [vmem:[%s8331_s4 + $0x5b0] sm:$0xff]  ;;  %v4501_v53 = vld [vmem:[%s8331_s4 + $0x6c8] sm:$0xff] }
 0x343   : > { %4334 = vst [vmem:[%s6172_s24 + $0x8] sm:$0xf] %v2776_v62  ;;  %3365 = vmatpush.msra.mxu1 %v4438_v58  ;;  %v4449_v58 = vld [vmem:[%s8331_s4 + $0x528] sm:$0xff] }
 0x344   : > { %3346 = vmatpush.msra.mxu0 %v4421_v0  ;;  %v2876_v37 = vpop.f32.mrf.mxu2  ;;  %v4465_v62 = vld [vmem:[%s8331_s4 + $0x5a8] sm:$0xff]  ;;  %v4484_v0 = vld [vmem:[%s8331_s4 + $0x640] sm:$0xff] }
 0x345   : > { %3366 = vmatpush.msra.mxu1 %v4437_v55  ;;  %v2896_v15 = vpop.f32.mrf.mxu3  ;;  %v4500_v55 = vld [vmem:[%s8331_s4 + $0x6c0] sm:$0xff] }
 0x346   : > { %3347 = vmatpush.msra.mxu0 %v4420_v22  ;;  %v4448_v22 = vld [vmem:[%s8331_s4 + $0x520] sm:$0xff] }
 0x347   : > { %3367 = vmatpush.msra.mxu1 %v4436_v5  ;;  %v4483_v5 = vld [vmem:[%s8331_s4 + $0x638] sm:$0xff] }
 0x348   : > { %3348 = vmatpush.msra.mxu0 %v4419_v43  ;;  %v4447_v43 = vld [vmem:[%s8331_s4 + $0x518] sm:$0xff] }
 0x349   : > { %3368 = vmatpush.msra.mxu1 %v4435_v6  ;;  %v4463_v6 = vld [vmem:[%s8331_s4 + $0x598] sm:$0xff] }
 0x34a   : > { %3349 = vmatpush.msra.mxu0 %v4418_v26  ;;  %v4482_v26 = vld [vmem:[%s8331_s4 + $0x630] sm:$0xff] }
 0x34b   : > { %3369 = vmatpush.msra.mxu1 %v4434_v48  ;;  %v4498_v48 = vld [vmem:[%s8331_s4 + $0x6b0] sm:$0xff] }
 0x34c   : > { %3350 = vmatpush.msra.mxu0 %v4417_v19  ;;  %v2960_v45 = vpop.f32.mrf.mxu2  ;;  %v4446_v19 = vld [vmem:[%s8331_s4 + $0x510] sm:$0xff] }
 0x34d   : > { %3370 = vmatpush.msra.mxu1 %v4433_v23  ;;  %v7989_v27 = vmax.f32 %v2876_v37, %v2960_v45  ;;  %v2980_v38 = vpop.f32.mrf.mxu3  ;;  %v4464_v37 = vld [vmem:[%s8331_s4 + $0x5a0] sm:$0xff]  ;;  %v4462_v23 = vld [vmem:[%s8331_s4 + $0x590] sm:$0xff]  ;;  %v4497_v45 = vld [vmem:[%s8331_s4 + $0x6a8] sm:$0xff] }
 0x34e   : > { %v7994_v1 = vmax.f32 %v2896_v15, %v2980_v38  ;;  %3351 = vmatpush.msra.mxu0 %v4416_v33  ;;  %v4499_v15 = vld [vmem:[%s8331_s4 + $0x6b8] sm:$0xff]  ;;  %v4481_v33 = vld [vmem:[%s8331_s4 + $0x628] sm:$0xff] }
 0x34f   : > { %3371 = vmatpush.msra.mxu1 %v4432_v9  ;;  %3107 = vmatmul.f32.vlgmr.msra.gmra.mxu2 %v7989_v27  ;;  %v4445_v9 = vld [vmem:[%s8331_s4 + $0x508] sm:$0xff] }
 0x350   : > { %3127 = vmatmul.f32.vlgmr.msra.gmra.mxu3 %v7994_v1  ;;  %3352 = vmatpush.msra.mxu0 %v4415_v21  ;;  %v4461_v38 = vld [vmem:[%s8331_s4 + $0x588] sm:$0xff]  ;;  %v4480_v21 = vld [vmem:[%s8331_s4 + $0x620] sm:$0xff] }
 0x351   : > { %3372 = vmatpush.msra.mxu1 %v4431_v11  ;;  %3380 = vmatpush.msra.mxu2 %v4459_v13  ;;  %v4496_v11 = vld [vmem:[%s8331_s4 + $0x6a0] sm:$0xff] }
 0x352   : > { %3400 = vmatpush.msra.mxu3 %v4475_v14  ;;  %3353 = vmatpush.msra.mxu0 %v4414_v2  ;;  %v4444_v13 = vld [vmem:[%s8331_s4 + $0x500] sm:$0xff]  ;;  %v4479_v2 = vld [vmem:[%s8331_s4 + $0x618] sm:$0xff] }
 0x353   : > { %3373 = vmatpush.msra.mxu1 %v4430_v16  ;;  %3381 = vmatpush.msra.mxu2 %v4458_v17  ;;  %v4460_v14 = vld [vmem:[%s8331_s4 + $0x580] sm:$0xff]  ;;  %v4495_v16 = vld [vmem:[%s8331_s4 + $0x698] sm:$0xff] }
 0x354   : > { %3401 = vmatpush.msra.mxu3 %v4474_v18  ;;  %3354 = vmatpush.msra.mxu0 %v4413_v24  ;;  %v4523_v17 = vld [vmem:[%s8331_s4 + $0x778] sm:$0xff]  ;;  %v4478_v24 = vld [vmem:[%s8331_s4 + $0x610] sm:$0xff] }
 0x355   : > { %3374 = vmatpush.msra.mxu1 %v4429_v25  ;;  %3382 = vmatpush.msra.mxu2 %v4457_v41  ;;  %v4539_v18 = vld [vmem:[%s8331_s4 + $0x7f8] sm:$0xff]  ;;  %v4494_v25 = vld [vmem:[%s8331_s4 + $0x690] sm:$0xff] }
 0x356   : > { %3402 = vmatpush.msra.mxu3 %v4473_v63  ;;  %3355 = vmatpush.msra.mxu0 %v4412_v12  ;;  %v4522_v41 = vld [vmem:[%s8331_s4 + $0x770] sm:$0xff]  ;;  %v4477_v12 = vld [vmem:[%s8331_s4 + $0x608] sm:$0xff] }
 0x357   : > { %3375 = vmatpush.msra.mxu1 %v4428_v30  ;;  %3383 = vmatpush.msra.mxu2 %v4456_v34  ;;  %v4538_v63 = vld [vmem:[%s8331_s4 + $0x7f0] sm:$0xff]  ;;  %v4493_v30 = vld [vmem:[%s8331_s4 + $0x688] sm:$0xff] }
 0x358   : > { %3403 = vmatpush.msra.mxu3 %v4472_v35  ;;  %3356 = vmatmul.f32.vlgmr.msra.gmra.mxu0 %v7908_v42  ;;  %v4521_v34 = vld [vmem:[%s8331_s4 + $0x768] sm:$0xff] }
 0x359   : > { %3376 = vmatmul.f32.vlgmr.msra.gmra.mxu1 %v7913_v31  ;;  %3485 = vmatpush.msrb.mxu0 %v4491_v28  ;;  %v4537_v35 = vld [vmem:[%s8331_s4 + $0x7e8] sm:$0xff]  ;;  %v4476_v28 = vld [vmem:[%s8331_s4 + $0x600] sm:$0xff] }
 0x35a   : > { %3505 = vmatpush.msrb.mxu1 %v4507_v20  ;;  %3251 = vmatmul.f32.vlgmr.msrb.gmra.mxu2 %v7989_v27  ;;  %v4492_v20 = vld [vmem:[%s8331_s4 + $0x680] sm:$0xff] }
 0x35b   : > { %3271 = vmatmul.f32.vlgmr.msrb.gmra.mxu3 %v7994_v1  ;;  %3384 = vmatpush.msra.mxu2 %v4455_v4  ;;  %v4520_v4 = vld [vmem:[%s8331_s4 + $0x760] sm:$0xff] }
 0x35c   : > { %3404 = vmatpush.msra.mxu3 %v4471_v51  ;;  %3486 = vmatpush.msrb.mxu0 %v4490_v40  ;;  %v4536_v51 = vld [vmem:[%s8331_s4 + $0x7e0] sm:$0xff]  ;;  %v4519_v40 = vld [vmem:[%s8331_s4 + $0x758] sm:$0xff] }
 0x35d   : > { %3506 = vmatpush.msrb.mxu1 %v4506_v56  ;;  %3385 = vmatpush.msra.mxu2 %v4454_v49  ;;  %v4535_v56 = vld [vmem:[%s8331_s4 + $0x7d8] sm:$0xff]  ;;  %v4518_v49 = vld [vmem:[%s8331_s4 + $0x750] sm:$0xff] }
 0x35e   : > { %3405 = vmatpush.msra.mxu3 %v4470_v47  ;;  %3487 = vmatpush.msrb.mxu0 %v4489_v10  ;;  %v4534_v47 = vld [vmem:[%s8331_s4 + $0x7d0] sm:$0xff]  ;;  %v4517_v10 = vld [vmem:[%s8331_s4 + $0x748] sm:$0xff] }
 0x35f   : > { %3507 = vmatpush.msrb.mxu1 %v4505_v54  ;;  %3386 = vmatpush.msra.mxu2 %v4453_v7  ;;  %v4532_v54 = vld [vmem:[%s8331_s4 + $0x7c0] sm:$0xff]  ;;  %v4515_v7 = vld [vmem:[%s8331_s4 + $0x738] sm:$0xff] }
 0x360   : > { %3406 = vmatpush.msra.mxu3 %v4469_v29  ;;  %3488 = vmatpush.msrb.mxu0 %v4488_v36  ;;  %v4531_v29 = vld [vmem:[%s8331_s4 + $0x7b8] sm:$0xff]  ;;  %v4514_v36 = vld [vmem:[%s8331_s4 + $0x730] sm:$0xff] }
 0x361   : > { %3508 = vmatpush.msrb.mxu1 %v4504_v44  ;;  %3387 = vmatpush.msra.mxu2 %v4452_v50  ;;  %v4530_v44 = vld [vmem:[%s8331_s4 + $0x7b0] sm:$0xff]  ;;  %v4513_v50 = vld [vmem:[%s8331_s4 + $0x728] sm:$0xff] }
 0x362   : > { %3407 = vmatpush.msra.mxu3 %v4468_v57  ;;  %3489 = vmatpush.msrb.mxu0 %v4487_v46  ;;  %v4529_v57 = vld [vmem:[%s8331_s4 + $0x7a8] sm:$0xff]  ;;  %v4512_v46 = vld [vmem:[%s8331_s4 + $0x720] sm:$0xff] }
 0x363   : > { %3509 = vmatpush.msrb.mxu1 %v4503_v52  ;;  %3388 = vmatpush.msra.mxu2 %v4451_v59  ;;  %v4528_v52 = vld [vmem:[%s8331_s4 + $0x7a0] sm:$0xff]  ;;  %v4511_v59 = vld [vmem:[%s8331_s4 + $0x718] sm:$0xff] }
 0x364   : > { %3408 = vmatpush.msra.mxu3 %v4467_v60  ;;  %3490 = vmatpush.msrb.mxu0 %v4486_v32  ;;  %v4527_v60 = vld [vmem:[%s8331_s4 + $0x798] sm:$0xff]  ;;  %v4510_v32 = vld [vmem:[%s8331_s4 + $0x710] sm:$0xff] }
 0x365   : > { %3510 = vmatpush.msrb.mxu1 %v4502_v8  ;;  %3389 = vmatpush.msra.mxu2 %v4450_v61  ;;  %v4526_v8 = vld [vmem:[%s8331_s4 + $0x790] sm:$0xff]  ;;  %v4509_v61 = vld [vmem:[%s8331_s4 + $0x708] sm:$0xff] }
 0x366   : > { %3409 = vmatpush.msra.mxu3 %v4466_v39  ;;  %3491 = vmatpush.msrb.mxu0 %v4485_v3  ;;  %v4525_v39 = vld [vmem:[%s8331_s4 + $0x788] sm:$0xff]  ;;  %v4508_v3 = vld [vmem:[%s8331_s4 + $0x700] sm:$0xff] }
 0x367   : > { %3511 = vmatpush.msrb.mxu1 %v4501_v53  ;;  %3390 = vmatpush.msra.mxu2 %v4449_v58  ;;  %v4524_v53 = vld [vmem:[%s8331_s4 + $0x780] sm:$0xff] }
 0x368   : > { %3410 = vmatpush.msra.mxu3 %v4465_v62  ;;  %3492 = vmatpush.msrb.mxu0 %v4484_v0 }
 0x369   : > { %3512 = vmatpush.msrb.mxu1 %v4500_v55  ;;  %3391 = vmatpush.msra.mxu2 %v4448_v22 }
 0x36a   : > { %3411 = vmatpush.msra.mxu3 %v4464_v37  ;;  %3493 = vmatpush.msrb.mxu0 %v4483_v5 }
 0x36b   : > { %3513 = vmatpush.msrb.mxu1 %v4499_v15  ;;  %3392 = vmatpush.msra.mxu2 %v4447_v43 }
 0x36c   : > { %3412 = vmatpush.msra.mxu3 %v4463_v6  ;;  %3494 = vmatpush.msrb.mxu0 %v4482_v26 }
 0x36d   : > { %3514 = vmatpush.msrb.mxu1 %v4498_v48  ;;  %3393 = vmatpush.msra.mxu2 %v4446_v19 }
 0x36e   : > { %3413 = vmatpush.msra.mxu3 %v4462_v23  ;;  %3495 = vmatpush.msrb.mxu0 %v4481_v33 }
 0x36f   : > { %3515 = vmatpush.msrb.mxu1 %v4497_v45  ;;  %3394 = vmatpush.msra.mxu2 %v4445_v9 }
 0x370   : > { %3414 = vmatpush.msra.mxu3 %v4461_v38  ;;  %3496 = vmatpush.msrb.mxu0 %v4480_v21 }
 0x371   : > { %3516 = vmatpush.msrb.mxu1 %v4496_v11  ;;  %3395 = vmatpush.msra.mxu2 %v4444_v13 }
 0x372   : > { %3415 = vmatpush.msra.mxu3 %v4460_v14  ;;  %3396 = vmatmul.f32.vlgmr.msra.gmra.mxu2 %v7989_v27 }
 0x373   : > { %3416 = vmatmul.f32.vlgmr.msra.gmra.mxu3 %v7994_v1  ;;  %3497 = vmatpush.msrb.mxu0 %v4479_v2 }
 0x374   : > { %3517 = vmatpush.msrb.mxu1 %v4495_v16  ;;  %3525 = vmatpush.msrb.mxu2 %v4523_v17 }
 0x375   : > { %3545 = vmatpush.msrb.mxu3 %v4539_v18  ;;  %3498 = vmatpush.msrb.mxu0 %v4478_v24 }
 0x376   : > { %3518 = vmatpush.msrb.mxu1 %v4494_v25  ;;  %3526 = vmatpush.msrb.mxu2 %v4522_v41 }
 0x377   : > { %3546 = vmatpush.msrb.mxu3 %v4538_v63  ;;  %3499 = vmatpush.msrb.mxu0 %v4477_v12 }
 0x378   : > { %3519 = vmatpush.msrb.mxu1 %v4493_v30  ;;  %3527 = vmatpush.msrb.mxu2 %v4521_v34 }
 0x379   : > { %3547 = vmatpush.msrb.mxu3 %v4537_v35  ;;  %3500 = vmatpush.msrb.mxu0 %v4476_v28 }
 0x37a   : > { %3520 = vmatpush.msrb.mxu1 %v4492_v20  ;;  %3528 = vmatpush.msrb.mxu2 %v4520_v4 }
 0x37b   : > { %3548 = vmatpush.msrb.mxu3 %v4536_v51  ;;  %3501 = vmatmul.f32.vlgmr.msrb.gmra.mxu0 %v7908_v42  ;;  %v4533_v42 = vld [vmem:[%s8331_s4 + $0x7c8] sm:$0xff] }
 0x37c   : > { %3521 = vmatmul.f32.vlgmr.msrb.gmra.mxu1 %v7913_v31  ;;  %3529 = vmatpush.msrb.mxu2 %v4519_v40  ;;  %v4516_v31 = vld [vmem:[%s8331_s4 + $0x740] sm:$0xff] }
 0x37d   : > { %3549 = vmatpush.msrb.mxu3 %v4535_v56 }
 0x37e   : > { %3530 = vmatpush.msrb.mxu2 %v4518_v49 }
 0x37f   : > { %3550 = vmatpush.msrb.mxu3 %v4534_v47 }
 0x380   : > { %3531 = vmatpush.msrb.mxu2 %v4517_v10 }
 0x381   : > { %3551 = vmatpush.msrb.mxu3 %v4533_v42 }
 0x382   : > { %3532 = vmatpush.msrb.mxu2 %v4516_v31 }
 0x383   : > { %3552 = vmatpush.msrb.mxu3 %v4532_v54 }
 0x384   : > { %3533 = vmatpush.msrb.mxu2 %v4515_v7 }
 0x385   : > { %3553 = vmatpush.msrb.mxu3 %v4531_v29 }
 0x386   : > { %3534 = vmatpush.msrb.mxu2 %v4514_v36 }
 0x387   : > { %3554 = vmatpush.msrb.mxu3 %v4530_v44 }
 0x388   : > { %3535 = vmatpush.msrb.mxu2 %v4513_v50 }
 0x389   : > { %3555 = vmatpush.msrb.mxu3 %v4529_v57 }
 0x38a   : > { %3536 = vmatpush.msrb.mxu2 %v4512_v46 }
 0x38b   : > { %3556 = vmatpush.msrb.mxu3 %v4528_v52 }
 0x38c   : > { %3537 = vmatpush.msrb.mxu2 %v4511_v59 }
 0x38d   : > { %3557 = vmatpush.msrb.mxu3 %v4527_v60 }
 0x38e   : > { %3538 = vmatpush.msrb.mxu2 %v4510_v32 }
 0x38f   : > { %3558 = vmatpush.msrb.mxu3 %v4526_v8 }
 0x390   : > { %3539 = vmatpush.msrb.mxu2 %v4509_v61 }
 0x391   : > { %3559 = vmatpush.msrb.mxu3 %v4525_v39 }
 0x392   : > { %3540 = vmatpush.msrb.mxu2 %v4508_v3 }
 0x393   : > { %3560 = vmatpush.msrb.mxu3 %v4524_v53  ;;  %3541 = vmatmul.f32.vlgmr.msrb.gmra.mxu2 %v7989_v27 }
 0x394   : > { %3561 = vmatmul.f32.vlgmr.msrb.gmra.mxu3 %v7994_v1 }
 0x3b4   : > { %v3068_v58 = vpop.f32.mrf.mxu0 }
 0x3b5   : > { %v3088_v62 = vpop.f32.mrf.mxu1 }
 0x3b6   : > { %v3089_v19 = vadd.f32 %v3088_v62, %v3068_v58 }
 0x3bc   : > { %v3212_v22 = vpop.f32.mrf.mxu0 }
 0x3bd   : > { %v3232_v37 = vpop.f32.mrf.mxu1 }
 0x3be   : > { %v3233_v26 = vadd.f32 %v3232_v37, %v3212_v22 }
 0x3d2   : > { %v3108_v0 = vpop.f32.mrf.mxu2 }
 0x3d3   : > { %v3128_v55 = vpop.f32.mrf.mxu3  ;;  %v3109_v27 = vadd.f32 %v3108_v0, %v3089_v19 }
 0x3d5   : > { %v3357_v43 = vpop.f32.mrf.mxu0  ;;  %v3129_v11 = vadd.f32 %v3128_v55, %v3109_v27 }
 0x3d6   : > { %v3377_v6 = vpop.f32.mrf.mxu1 }
 0x3d7   : > { %v3378_v23 = vadd.f32 %v3377_v6, %v3357_v43 }
 0x3dd   : > { %v3252_v5 = vpop.f32.mrf.mxu2 }
 0x3de   : > { %v3272_v15 = vpop.f32.mrf.mxu3  ;;  %v3253_v33 = vadd.f32 %v3252_v5, %v3233_v26 }
 0x3e0   : > { %v3273_v21 = vadd.f32 %v3272_v15, %v3253_v33 }
 0x3e2   : > { %v3275_v16 = vmax.f32 %v3129_v11, %v3273_v21 }
 0x3f5   : > { %v3397_v48 = vpop.f32.mrf.mxu2 }
 0x3f6   : > { %v3417_v45 = vpop.f32.mrf.mxu3  ;;  %v3398_v9 = vadd.f32 %v3397_v48, %v3378_v23 }
 0x3f8   : > { %v3502_v1 = vpop.f32.mrf.mxu0  ;;  %v3418_v13 = vadd.f32 %v3417_v45, %v3398_v9 }
 0x3f9   : > { %v3522_v38 = vpop.f32.mrf.mxu1 }
 0x3fa   : > { %v3523_v14 = vadd.f32 %v3522_v38, %v3502_v1  ;;  %v3420_v24 = vmax.f32 %v3275_v16, %v3418_v13 }
 0x416   : > { %v3542_v2 = vpop.f32.mrf.mxu2 }
 0x417   : > { %v3543_v17 = vadd.f32 %v3542_v2, %v3523_v14  ;;  %v3562_v18 = vpop.f32.mrf.mxu3 }
 0x419   : > { %v3563_v25 = vadd.f32 %v3562_v18, %v3543_v17 }
 0x41b   : > { %v3565_v41 = vmax.f32 %v3420_v24, %v3563_v25 }
 0x41d   : > { %4540 = vst [vmem:[%s6172_s24 + $0xc] sm:$0xf] %v3565_v41 }
 0x41e PF: > { %s18_s23 = sadd.s32 1, %s4675_s23   ;;  %s8336_s21 = smov %s4671_s22 }
 0x41f   : > { %p15_p8 = scmp.ge.s32.totalorder %s18_s23, 4   ;;  %s8337_s22 = smov %s8339_s30 }
 0x421   :  { %17 = sbr.rel (!%p15_p8) target bundleno = 3 (0x3), region = 97 }
 0x426   :  { %3595 = vsyncpa [#allocation3], 1 }
 0x427   :  { %3597 = vsyncpa [#allocation3 + $0x1], 1 }
 0x428   :  { %3598 = vsyncpa [#allocation5], 1 }

</bundles_post_ra>
